<compile_context>
chip_gen: v7x
topology: tpu7x:2x2x1
jax: 0.10.0
libtpu: 0.0.40
codegen_flags: <defaults>
</compile_context>

<pallas_src>
import jax
import jax.numpy as jnp
from jax.experimental import pallas as pl
from jax.experimental.pallas import tpu as pltpu  # noqa: F401  (TPU backend)

LANES = 128


# ----------------------------- Pallas kernels ------------------------------

def _conv_pool_kernel(a_ref, w_ref, b_ref, o_ref):
    """Fused conv (im2col matmul) + bias + ReLU + 2x2 max-pool.

    a_ref: (4, M, Kp) bf16 -- patches, one slab per pool-window quadrant
    w_ref: (Kp, 128)  bf16 -- zero-padded weight matrix
    b_ref: (1, 128)   f32  -- zero-padded bias
    o_ref: (M, 128)   bf16 -- pooled activations, rows ordered (b, ph, pw)
    """
    w = w_ref[...]
    z0 = jnp.dot(a_ref[0], w, preferred_element_type=jnp.float32)
    z1 = jnp.dot(a_ref[1], w, preferred_element_type=jnp.float32)
    z2 = jnp.dot(a_ref[2], w, preferred_element_type=jnp.float32)
    z3 = jnp.dot(a_ref[3], w, preferred_element_type=jnp.float32)
    # relu(max_i(z_i) + b) == max_i(relu(z_i + b)): pool first, one epilogue.
    z = jnp.maximum(jnp.maximum(z0, z1), jnp.maximum(z2, z3))
    o_ref[...] = jnp.maximum(z + b_ref[...], 0.0).astype(o_ref.dtype)


def _mlp_kernel(x_ref, w1_ref, b1_ref, w2_ref, b2_ref, w3_ref, b3_ref, o_ref):
    """fc1+ReLU -> fc2+ReLU -> fc3, all intermediates stay on-chip (f32 math)."""
    h = jnp.dot(x_ref[...], w1_ref[...], preferred_element_type=jnp.float32)
    h = jnp.maximum(h + b1_ref[...], 0.0)
    h = jnp.dot(h.astype(jnp.bfloat16), w2_ref[...],
                preferred_element_type=jnp.float32)
    h = jnp.maximum(h + b2_ref[...], 0.0)
    h = jnp.dot(h.astype(jnp.bfloat16), w3_ref[...],
                preferred_element_type=jnp.float32)
    o_ref[...] = (h + b3_ref[...]).astype(o_ref.dtype)


# ------------------------------ kernel wrappers -----------------------------

def conv_pool(quads, w, b):
    Q, M, Kp = quads.shape
    N = w.shape[1]
    return pl.pallas_call(
        _conv_pool_kernel,
        out_shape=jax.ShapeDtypeStruct((M, N), jnp.bfloat16),
        grid=(1,),
        in_specs=[
            pl.BlockSpec((Q, M, Kp), lambda i: (0, 0, 0)),
            pl.BlockSpec((Kp, N), lambda i: (0, 0)),
            pl.BlockSpec((1, N), lambda i: (0, 0)),
        ],
        out_specs=pl.BlockSpec((M, N), lambda i: (0, 0)),
    )(quads, w, b)


def mlp(x, w1, b1, w2, b2, w3, b3):
    B, K1 = x.shape
    N = w1.shape[1]

    def spec2(shp):
        return pl.BlockSpec(shp, lambda i: (0, 0))

    return pl.pallas_call(
        _mlp_kernel,
        out_shape=jax.ShapeDtypeStruct((B, N), jnp.float32),
        grid=(1,),
        in_specs=[spec2((B, K1)),
                  spec2(w1.shape), spec2(b1.shape),
                  spec2(w2.shape), spec2(b2.shape),
                  spec2(w3.shape), spec2(b3.shape)],
        out_specs=spec2((B, N)),
    )(x, w1, b1, w2, b2, w3, b3)


# ------------------------------- JAX glue -----------------------------------

def _im2col_pool_quadrants(x_nhwc, kh, kw, k_pad):
    """im2col patches zero-padded to k_pad, grouped by 2x2 pool-window position.

    Returns (4, B*PH*PW, k_pad) with row order (b, ph, pw), quadrant q = 2*i+j.
    """
    B, H, W, C = x_nhwc.shape
    OH, OW = H - kh + 1, W - kw + 1
    PH, PW = OH // 2, OW // 2
    cols = [x_nhwc[:, di:di + OH, dj:dj + OW, :]
            for di in range(kh) for dj in range(kw)]
    k_real = kh * kw * C
    if k_pad > k_real:
        cols.append(jnp.zeros((B, OH, OW, k_pad - k_real), x_nhwc.dtype))
    patches = jnp.concatenate(cols, axis=-1)                  # (B, OH, OW, Kp)
    patches = patches.reshape(B, PH, 2, PW, 2, k_pad)
    patches = jnp.transpose(patches, (2, 4, 0, 1, 3, 5))       # (2,2,B,PH,PW,Kp)
    return patches.reshape(4, B * PH * PW, k_pad)


def net_forward(x_nchw, p):
    B = x_nchw.shape[0]
    x = jnp.transpose(x_nchw, (0, 2, 3, 1)).astype(jnp.bfloat16)  # NHWC bf16

    # conv1 + ReLU + pool -> (B*14*14, 128) bf16 (channels 0..5 real)
    q1 = _im2col_pool_quadrants(x, 5, 5, p["conv1_w"].shape[0])
    y1 = conv_pool(q1, p["conv1_w"], p["conv1_b"])

    # conv2 + ReLU + pool -> (B*5*5, 128) bf16 (channels 0..15 real)
    y1 = y1.reshape(B, 14, 14, LANES)[:, :, :, :6]
    q2 = _im2col_pool_quadrants(y1, 5, 5, p["conv2_w"].shape[0])
    y2 = conv_pool(q2, p["conv2_w"], p["conv2_b"])

    # Fused fc1->fc2->fc3. fc1 weight rows are pre-permuted to the
    # (h, w, c_pad128) order of the pooled slab, so a contiguous reshape is
    # all that is needed (reproduces torch's x.view(-1, 16*5*5) semantics).
    feat = y2.reshape(B, 5 * 5 * LANES)
    out = mlp(feat, p["fc1_w"], p["fc1_b"], p["fc2_w"], p["fc2_b"],
              p["fc3_w"], p["fc3_b"])
    return out[:, :10]


# ------------------------------ param handling -------------------------------

def init_params(key):
    """PyTorch-layout parameters (conv: (O,I,KH,KW); linear: (out,in))."""
    ks = jax.random.split(key, 10)

    def u(k, shape, fan_in):
        bound = 1.0 / jnp.sqrt(fan_in)
        return jax.random.uniform(k, shape, jnp.float32, -bound, bound)

    return {
        "conv1_w": u(ks[0], (6, 3, 5, 5), 3 * 5 * 5),
        "conv1_b": u(ks[1], (6,), 3 * 5 * 5),
        "conv2_w": u(ks[2], (16, 6, 5, 5), 6 * 5 * 5),
        "conv2_b": u(ks[3], (16,), 6 * 5 * 5),
        "fc1_w": u(ks[4], (120, 400), 400),
        "fc1_b": u(ks[5], (120,), 400),
        "fc2_w": u(ks[6], (84, 120), 120),
        "fc2_b": u(ks[7], (84,), 120),
        "fc3_w": u(ks[8], (10, 84), 84),
        "fc3_b": u(ks[9], (10,), 84),
    }


def prepare_params(raw):
    """One-time (hoisted) weight repacking: MXU-friendly padded bf16 matrices."""
    def pad2(m, rows, cols):
        r, c = m.shape
        return jnp.pad(m, ((0, rows - r), (0, cols - c)))

    def pad_bias(b):
        return jnp.pad(b, (0, LANES - b.shape[0])).reshape(1, LANES).astype(jnp.float32)

    def conv_w(w, k_pad):
        # (O, I, KH, KW) -> (KH*KW*I, O), matching im2col (di, dj, c) ordering.
        o = w.shape[0]
        m = jnp.transpose(w, (2, 3, 1, 0)).reshape(-1, o)
        return pad2(m, k_pad, LANES).astype(jnp.bfloat16)

    # fc1: torch flattens in (c, h, w) order; re-index rows to the
    # (h, w, c_pad128) order of the pooled conv2 output slab.
    w1 = raw["fc1_w"].reshape(120, 16, 5, 5)
    w1 = jnp.transpose(w1, (2, 3, 1, 0))                       # (h, w, c, o)
    w1 = jnp.pad(w1, ((0, 0), (0, 0), (0, LANES - 16), (0, LANES - 120)))
    w1 = w1.reshape(5 * 5 * LANES, LANES).astype(jnp.bfloat16)

    return {
        "conv1_w": conv_w(raw["conv1_w"], 128),     # K: 75  -> 128
        "conv1_b": pad_bias(raw["conv1_b"]),
        "conv2_w": conv_w(raw["conv2_w"], 256),     # K: 150 -> 256
        "conv2_b": pad_bias(raw["conv2_b"]),
        "fc1_w": w1,                                # (3200, 128)
        "fc1_b": pad_bias(raw["fc1_b"]),
        "fc2_w": pad2(raw["fc2_w"].T, LANES, LANES).astype(jnp.bfloat16),
        "fc2_b": pad_bias(raw["fc2_b"]),
        "fc3_w": pad2(raw["fc3_w"].T, LANES, LANES).astype(jnp.bfloat16),
        "fc3_b": pad_bias(raw["fc3_b"]),
    }


# --------------------------------- main --------------------------------------

if __name__ == "__main__":
    key = jax.random.PRNGKey(0)
    pkey, xkey = jax.random.split(key)
    raw_params = init_params(pkey)
    params = prepare_params(raw_params)   # hoisted: runs once, not per forward
    # fc1 (16*5*5 inputs) forces 32x32 spatial input; small batch=2.
    x = jax.random.normal(xkey, (2, 3, 32, 32), dtype=jnp.float32)

    fwd = jax.jit(net_forward)
    out = jax.block_until_ready(fwd(x, params))
    assert out.shape == (2, 10) and out.dtype == jnp.float32
    print("KERNEL_OK")
</pallas_src>

<mosaic_0001>
module attributes {stable_mosaic.version = 11 : i64} {
  func.func @_conv_pool_kernel(%arg0: i32, %arg1: memref<4x392x128xbf16, #tpu.memory_space<vmem>>, %arg2: memref<128x128xbf16, #tpu.memory_space<vmem>>, %arg3: memref<1x128xf32, #tpu.memory_space<vmem>>, %arg4: memref<392x128xbf16, #tpu.memory_space<vmem>>) attributes {dimension_semantics = [#tpu.dimension_semantics<arbitrary>], iteration_bounds = array<i64: 1>, scalar_prefetch = 0 : i64, scratch_operands = 0 : i64, tpu.core_type = #tpu.core_type<tc>, window_params = [{pipeline_mode = #tpu.pipeline_mode<synchronous>, transform_indices = @transform_0, window_bounds = array<i64: 4, 392, 128>}, {pipeline_mode = #tpu.pipeline_mode<synchronous>, transform_indices = @transform_1, window_bounds = array<i64: 128, 128>}, {pipeline_mode = #tpu.pipeline_mode<synchronous>, transform_indices = @transform_2, window_bounds = array<i64: 1, 128>}, {pipeline_mode = #tpu.pipeline_mode<synchronous>, transform_indices = @transform_3, window_bounds = array<i64: 392, 128>}]} {
    %c0 = arith.constant 0 : index
    %c0_0 = arith.constant 0 : index
    %0 = vector.load %arg2[%c0, %c0_0] : memref<128x128xbf16, #tpu.memory_space<vmem>>, vector<128x128xbf16>
    %c0_1 = arith.constant 0 : index
    %c0_2 = arith.constant 0 : index
    %c0_3 = arith.constant 0 : index
    %1 = vector.load %arg1[%c0_1, %c0_2, %c0_3] : memref<4x392x128xbf16, #tpu.memory_space<vmem>>, vector<1x392x128xbf16>
    %2 = vector.shape_cast %1 : vector<1x392x128xbf16> to vector<392x128xbf16>
    %cst = arith.constant dense<0.000000e+00> : vector<392x128xf32>
    %3 = tpu.matmul %2, %0, %cst {dimension_numbers = #tpu.dot_dimension_numbers<[1], [0], [0], [1], [0, 0, 1, 1], [], []>} : vector<392x128xbf16>, vector<128x128xbf16>, vector<392x128xf32> -> vector<392x128xf32>
    %c1 = arith.constant 1 : index
    %c0_4 = arith.constant 0 : index
    %c0_5 = arith.constant 0 : index
    %4 = vector.load %arg1[%c1, %c0_4, %c0_5] : memref<4x392x128xbf16, #tpu.memory_space<vmem>>, vector<1x392x128xbf16>
    %5 = vector.shape_cast %4 : vector<1x392x128xbf16> to vector<392x128xbf16>
    %cst_6 = arith.constant dense<0.000000e+00> : vector<392x128xf32>
    %6 = tpu.matmul %5, %0, %cst_6 {dimension_numbers = #tpu.dot_dimension_numbers<[1], [0], [0], [1], [0, 0, 1, 1], [], []>} : vector<392x128xbf16>, vector<128x128xbf16>, vector<392x128xf32> -> vector<392x128xf32>
    %c2 = arith.constant 2 : index
    %c0_7 = arith.constant 0 : index
    %c0_8 = arith.constant 0 : index
    %7 = vector.load %arg1[%c2, %c0_7, %c0_8] : memref<4x392x128xbf16, #tpu.memory_space<vmem>>, vector<1x392x128xbf16>
    %8 = vector.shape_cast %7 : vector<1x392x128xbf16> to vector<392x128xbf16>
    %cst_9 = arith.constant dense<0.000000e+00> : vector<392x128xf32>
    %9 = tpu.matmul %8, %0, %cst_9 {dimension_numbers = #tpu.dot_dimension_numbers<[1], [0], [0], [1], [0, 0, 1, 1], [], []>} : vector<392x128xbf16>, vector<128x128xbf16>, vector<392x128xf32> -> vector<392x128xf32>
    %c3 = arith.constant 3 : index
    %c0_10 = arith.constant 0 : index
    %c0_11 = arith.constant 0 : index
    %10 = vector.load %arg1[%c3, %c0_10, %c0_11] : memref<4x392x128xbf16, #tpu.memory_space<vmem>>, vector<1x392x128xbf16>
    %11 = vector.shape_cast %10 : vector<1x392x128xbf16> to vector<392x128xbf16>
    %cst_12 = arith.constant dense<0.000000e+00> : vector<392x128xf32>
    %12 = tpu.matmul %11, %0, %cst_12 {dimension_numbers = #tpu.dot_dimension_numbers<[1], [0], [0], [1], [0, 0, 1, 1], [], []>} : vector<392x128xbf16>, vector<128x128xbf16>, vector<392x128xf32> -> vector<392x128xf32>
    %13 = arith.maximumf %3, %6 : vector<392x128xf32>
    %14 = arith.maximumf %9, %12 : vector<392x128xf32>
    %15 = arith.maximumf %13, %14 : vector<392x128xf32>
    %c0_13 = arith.constant 0 : index
    %c0_14 = arith.constant 0 : index
    %16 = vector.load %arg3[%c0_13, %c0_14] : memref<1x128xf32, #tpu.memory_space<vmem>>, vector<1x128xf32>
    %17 = vector.broadcast %16 : vector<1x128xf32> to vector<392x128xf32>
    %18 = arith.addf %15, %17 : vector<392x128xf32>
    %cst_15 = arith.constant 0.000000e+00 : f32
    %19 = vector.broadcast %cst_15 : f32 to vector<392x128xf32>
    %20 = arith.maximumf %18, %19 : vector<392x128xf32>
    %21 = arith.truncf %20 : vector<392x128xf32> to vector<392x128xbf16>
    %c0_16 = arith.constant 0 : index
    %c0_17 = arith.constant 0 : index
    %22 = vector.load %arg4[%c0_16, %c0_17] : memref<392x128xbf16, #tpu.memory_space<vmem>>, vector<392x128xbf16>
    tpu.vector_store %arg4[%c0_16, %c0_17], %21 {strides = array<i32>} : memref<392x128xbf16, #tpu.memory_space<vmem>>, vector<392x128xbf16>,
    return
  }
  func.func @transform_0(%arg0: i32) -> (i32, i32, i32) {
    %c0_i32 = arith.constant 0 : i32
    %c0_i32_0 = arith.constant 0 : i32
    %c0_i32_1 = arith.constant 0 : i32
    %c0_i32_2 = arith.constant 0 : i32
    return %c0_i32, %c0_i32_0, %c0_i32_1 : i32, i32, i32
  }
  func.func @transform_1(%arg0: i32) -> (i32, i32) {
    %c0_i32 = arith.constant 0 : i32
    %c0_i32_0 = arith.constant 0 : i32
    %c0_i32_1 = arith.constant 0 : i32
    return %c0_i32, %c0_i32_0 : i32, i32
  }
  func.func @transform_2(%arg0: i32) -> (i32, i32) {
    %c0_i32 = arith.constant 0 : i32
    %c0_i32_0 = arith.constant 0 : i32
    %c0_i32_1 = arith.constant 0 : i32
    return %c0_i32, %c0_i32_0 : i32, i32
  }
  func.func @transform_3(%arg0: i32) -> (i32, i32) {
    %c0_i32 = arith.constant 0 : i32
    %c0_i32_0 = arith.constant 0 : i32
    %c0_i32_1 = arith.constant 0 : i32
    return %c0_i32, %c0_i32_0 : i32, i32
  }
}

module attributes {stable_mosaic.version = 11 : i64} {
  func.func @_conv_pool_kernel(%arg0: i32, %arg1: memref<4x50x256xbf16, #tpu.memory_space<vmem>>, %arg2: memref<256x128xbf16, #tpu.memory_space<vmem>>, %arg3: memref<1x128xf32, #tpu.memory_space<vmem>>, %arg4: memref<50x128xbf16, #tpu.memory_space<vmem>>) attributes {dimension_semantics = [#tpu.dimension_semantics<arbitrary>], iteration_bounds = array<i64: 1>, scalar_prefetch = 0 : i64, scratch_operands = 0 : i64, tpu.core_type = #tpu.core_type<tc>, window_params = [{pipeline_mode = #tpu.pipeline_mode<synchronous>, transform_indices = @transform_0, window_bounds = array<i64: 4, 50, 256>}, {pipeline_mode = #tpu.pipeline_mode<synchronous>, transform_indices = @transform_1, window_bounds = array<i64: 256, 128>}, {pipeline_mode = #tpu.pipeline_mode<synchronous>, transform_indices = @transform_2, window_bounds = array<i64: 1, 128>}, {pipeline_mode = #tpu.pipeline_mode<synchronous>, transform_indices = @transform_3, window_bounds = array<i64: 50, 128>}]} {
    %c0 = arith.constant 0 : index
    %c0_0 = arith.constant 0 : index
    %0 = vector.load %arg2[%c0, %c0_0] : memref<256x128xbf16, #tpu.memory_space<vmem>>, vector<256x128xbf16>
    %c0_1 = arith.constant 0 : index
    %c0_2 = arith.constant 0 : index
    %c0_3 = arith.constant 0 : index
    %1 = vector.load %arg1[%c0_1, %c0_2, %c0_3] : memref<4x50x256xbf16, #tpu.memory_space<vmem>>, vector<1x50x256xbf16>
    %2 = vector.shape_cast %1 : vector<1x50x256xbf16> to vector<50x256xbf16>
    %cst = arith.constant dense<0.000000e+00> : vector<50x128xf32>
    %3 = tpu.matmul %2, %0, %cst {dimension_numbers = #tpu.dot_dimension_numbers<[1], [0], [0], [1], [0, 0, 1, 1], [], []>} : vector<50x256xbf16>, vector<256x128xbf16>, vector<50x128xf32> -> vector<50x128xf32>
    %c1 = arith.constant 1 : index
    %c0_4 = arith.constant 0 : index
    %c0_5 = arith.constant 0 : index
    %4 = vector.load %arg1[%c1, %c0_4, %c0_5] : memref<4x50x256xbf16, #tpu.memory_space<vmem>>, vector<1x50x256xbf16>
    %5 = vector.shape_cast %4 : vector<1x50x256xbf16> to vector<50x256xbf16>
    %cst_6 = arith.constant dense<0.000000e+00> : vector<50x128xf32>
    %6 = tpu.matmul %5, %0, %cst_6 {dimension_numbers = #tpu.dot_dimension_numbers<[1], [0], [0], [1], [0, 0, 1, 1], [], []>} : vector<50x256xbf16>, vector<256x128xbf16>, vector<50x128xf32> -> vector<50x128xf32>
    %c2 = arith.constant 2 : index
    %c0_7 = arith.constant 0 : index
    %c0_8 = arith.constant 0 : index
    %7 = vector.load %arg1[%c2, %c0_7, %c0_8] : memref<4x50x256xbf16, #tpu.memory_space<vmem>>, vector<1x50x256xbf16>
    %8 = vector.shape_cast %7 : vector<1x50x256xbf16> to vector<50x256xbf16>
    %cst_9 = arith.constant dense<0.000000e+00> : vector<50x128xf32>
    %9 = tpu.matmul %8, %0, %cst_9 {dimension_numbers = #tpu.dot_dimension_numbers<[1], [0], [0], [1], [0, 0, 1, 1], [], []>} : vector<50x256xbf16>, vector<256x128xbf16>, vector<50x128xf32> -> vector<50x128xf32>
    %c3 = arith.constant 3 : index
    %c0_10 = arith.constant 0 : index
    %c0_11 = arith.constant 0 : index
    %10 = vector.load %arg1[%c3, %c0_10, %c0_11] : memref<4x50x256xbf16, #tpu.memory_space<vmem>>, vector<1x50x256xbf16>
    %11 = vector.shape_cast %10 : vector<1x50x256xbf16> to vector<50x256xbf16>
    %cst_12 = arith.constant dense<0.000000e+00> : vector<50x128xf32>
    %12 = tpu.matmul %11, %0, %cst_12 {dimension_numbers = #tpu.dot_dimension_numbers<[1], [0], [0], [1], [0, 0, 1, 1], [], []>} : vector<50x256xbf16>, vector<256x128xbf16>, vector<50x128xf32> -> vector<50x128xf32>
    %13 = arith.maximumf %3, %6 : vector<50x128xf32>
    %14 = arith.maximumf %9, %12 : vector<50x128xf32>
    %15 = arith.maximumf %13, %14 : vector<50x128xf32>
    %c0_13 = arith.constant 0 : index
    %c0_14 = arith.constant 0 : index
    %16 = vector.load %arg3[%c0_13, %c0_14] : memref<1x128xf32, #tpu.memory_space<vmem>>, vector<1x128xf32>
    %17 = vector.broadcast %16 : vector<1x128xf32> to vector<50x128xf32>
    %18 = arith.addf %15, %17 : vector<50x128xf32>
    %cst_15 = arith.constant 0.000000e+00 : f32
    %19 = vector.broadcast %cst_15 : f32 to vector<50x128xf32>
    %20 = arith.maximumf %18, %19 : vector<50x128xf32>
    %21 = arith.truncf %20 : vector<50x128xf32> to vector<50x128xbf16>
    %c0_16 = arith.constant 0 : index
    %c0_17 = arith.constant 0 : index
    %22 = vector.load %arg4[%c0_16, %c0_17] : memref<50x128xbf16, #tpu.memory_space<vmem>>, vector<50x128xbf16>
    tpu.vector_store %arg4[%c0_16, %c0_17], %21 {strides = array<i32>} : memref<50x128xbf16, #tpu.memory_space<vmem>>, vector<50x128xbf16>,
    return
  }
  func.func @transform_0(%arg0: i32) -> (i32, i32, i32) {
    %c0_i32 = arith.constant 0 : i32
    %c0_i32_0 = arith.constant 0 : i32
    %c0_i32_1 = arith.constant 0 : i32
    %c0_i32_2 = arith.constant 0 : i32
    return %c0_i32, %c0_i32_0, %c0_i32_1 : i32, i32, i32
  }
  func.func @transform_1(%arg0: i32) -> (i32, i32) {
    %c0_i32 = arith.constant 0 : i32
    %c0_i32_0 = arith.constant 0 : i32
    %c0_i32_1 = arith.constant 0 : i32
    return %c0_i32, %c0_i32_0 : i32, i32
  }
  func.func @transform_2(%arg0: i32) -> (i32, i32) {
    %c0_i32 = arith.constant 0 : i32
    %c0_i32_0 = arith.constant 0 : i32
    %c0_i32_1 = arith.constant 0 : i32
    return %c0_i32, %c0_i32_0 : i32, i32
  }
  func.func @transform_3(%arg0: i32) -> (i32, i32) {
    %c0_i32 = arith.constant 0 : i32
    %c0_i32_0 = arith.constant 0 : i32
    %c0_i32_1 = arith.constant 0 : i32
    return %c0_i32, %c0_i32_0 : i32, i32
  }
}

module attributes {stable_mosaic.version = 11 : i64} {
  func.func @_mlp_kernel(%arg0: i32, %arg1: memref<2x3200xbf16, #tpu.memory_space<vmem>>, %arg2: memref<3200x128xbf16, #tpu.memory_space<vmem>>, %arg3: memref<1x128xf32, #tpu.memory_space<vmem>>, %arg4: memref<128x128xbf16, #tpu.memory_space<vmem>>, %arg5: memref<1x128xf32, #tpu.memory_space<vmem>>, %arg6: memref<128x128xbf16, #tpu.memory_space<vmem>>, %arg7: memref<1x128xf32, #tpu.memory_space<vmem>>, %arg8: memref<2x128xf32, #tpu.memory_space<vmem>>) attributes {dimension_semantics = [#tpu.dimension_semantics<arbitrary>], iteration_bounds = array<i64: 1>, scalar_prefetch = 0 : i64, scratch_operands = 0 : i64, tpu.core_type = #tpu.core_type<tc>, window_params = [{pipeline_mode = #tpu.pipeline_mode<synchronous>, transform_indices = @transform_0, window_bounds = array<i64: 2, 3200>}, {pipeline_mode = #tpu.pipeline_mode<synchronous>, transform_indices = @transform_1, window_bounds = array<i64: 3200, 128>}, {pipeline_mode = #tpu.pipeline_mode<synchronous>, transform_indices = @transform_2, window_bounds = array<i64: 1, 128>}, {pipeline_mode = #tpu.pipeline_mode<synchronous>, transform_indices = @transform_3, window_bounds = array<i64: 128, 128>}, {pipeline_mode = #tpu.pipeline_mode<synchronous>, transform_indices = @transform_4, window_bounds = array<i64: 1, 128>}, {pipeline_mode = #tpu.pipeline_mode<synchronous>, transform_indices = @transform_5, window_bounds = array<i64: 128, 128>}, {pipeline_mode = #tpu.pipeline_mode<synchronous>, transform_indices = @transform_6, window_bounds = array<i64: 1, 128>}, {pipeline_mode = #tpu.pipeline_mode<synchronous>, transform_indices = @transform_7, window_bounds = array<i64: 2, 128>}]} {
    %c0 = arith.constant 0 : index
    %c0_0 = arith.constant 0 : index
    %0 = vector.load %arg1[%c0, %c0_0] : memref<2x3200xbf16, #tpu.memory_space<vmem>>, vector<2x3200xbf16>
    %c0_1 = arith.constant 0 : index
    %c0_2 = arith.constant 0 : index
    %1 = vector.load %arg2[%c0_1, %c0_2] : memref<3200x128xbf16, #tpu.memory_space<vmem>>, vector<3200x128xbf16>
    %cst = arith.constant dense<0.000000e+00> : vector<2x128xf32>
    %2 = tpu.matmul %0, %1, %cst {dimension_numbers = #tpu.dot_dimension_numbers<[1], [0], [0], [1], [0, 0, 1, 1], [], []>} : vector<2x3200xbf16>, vector<3200x128xbf16>, vector<2x128xf32> -> vector<2x128xf32>
    %c0_3 = arith.constant 0 : index
    %c0_4 = arith.constant 0 : index
    %3 = vector.load %arg3[%c0_3, %c0_4] : memref<1x128xf32, #tpu.memory_space<vmem>>, vector<1x128xf32>
    %4 = vector.broadcast %3 : vector<1x128xf32> to vector<2x128xf32>
    %5 = arith.addf %2, %4 : vector<2x128xf32>
    %cst_5 = arith.constant 0.000000e+00 : f32
    %6 = vector.broadcast %cst_5 : f32 to vector<2x128xf32>
    %7 = arith.maximumf %5, %6 : vector<2x128xf32>
    %8 = arith.truncf %7 : vector<2x128xf32> to vector<2x128xbf16>
    %c0_6 = arith.constant 0 : index
    %c0_7 = arith.constant 0 : index
    %9 = vector.load %arg4[%c0_6, %c0_7] : memref<128x128xbf16, #tpu.memory_space<vmem>>, vector<128x128xbf16>
    %cst_8 = arith.constant dense<0.000000e+00> : vector<2x128xf32>
    %10 = tpu.matmul %8, %9, %cst_8 {dimension_numbers = #tpu.dot_dimension_numbers<[1], [0], [0], [1], [0, 0, 1, 1], [], []>} : vector<2x128xbf16>, vector<128x128xbf16>, vector<2x128xf32> -> vector<2x128xf32>
    %c0_9 = arith.constant 0 : index
    %c0_10 = arith.constant 0 : index
    %11 = vector.load %arg5[%c0_9, %c0_10] : memref<1x128xf32, #tpu.memory_space<vmem>>, vector<1x128xf32>
    %12 = vector.broadcast %11 : vector<1x128xf32> to vector<2x128xf32>
    %13 = arith.addf %10, %12 : vector<2x128xf32>
    %cst_11 = arith.constant 0.000000e+00 : f32
    %14 = vector.broadcast %cst_11 : f32 to vector<2x128xf32>
    %15 = arith.maximumf %13, %14 : vector<2x128xf32>
    %16 = arith.truncf %15 : vector<2x128xf32> to vector<2x128xbf16>
    %c0_12 = arith.constant 0 : index
    %c0_13 = arith.constant 0 : index
    %17 = vector.load %arg6[%c0_12, %c0_13] : memref<128x128xbf16, #tpu.memory_space<vmem>>, vector<128x128xbf16>
    %cst_14 = arith.constant dense<0.000000e+00> : vector<2x128xf32>
    %18 = tpu.matmul %16, %17, %cst_14 {dimension_numbers = #tpu.dot_dimension_numbers<[1], [0], [0], [1], [0, 0, 1, 1], [], []>} : vector<2x128xbf16>, vector<128x128xbf16>, vector<2x128xf32> -> vector<2x128xf32>
    %c0_15 = arith.constant 0 : index
    %c0_16 = arith.constant 0 : index
    %19 = vector.load %arg7[%c0_15, %c0_16] : memref<1x128xf32, #tpu.memory_space<vmem>>, vector<1x128xf32>
    %20 = vector.broadcast %19 : vector<1x128xf32> to vector<2x128xf32>
    %21 = arith.addf %18, %20 : vector<2x128xf32>
    %c0_17 = arith.constant 0 : index
    %c0_18 = arith.constant 0 : index
    %22 = vector.load %arg8[%c0_17, %c0_18] : memref<2x128xf32, #tpu.memory_space<vmem>>, vector<2x128xf32>
    tpu.vector_store %arg8[%c0_17, %c0_18], %21 {strides = array<i32>} : memref<2x128xf32, #tpu.memory_space<vmem>>, vector<2x128xf32>,
    return
  }
  func.func @transform_0(%arg0: i32) -> (i32, i32) {
    %c0_i32 = arith.constant 0 : i32
    %c0_i32_0 = arith.constant 0 : i32
    %c0_i32_1 = arith.constant 0 : i32
    return %c0_i32, %c0_i32_0 : i32, i32
  }
  func.func @transform_1(%arg0: i32) -> (i32, i32) {
    %c0_i32 = arith.constant 0 : i32
    %c0_i32_0 = arith.constant 0 : i32
    %c0_i32_1 = arith.constant 0 : i32
    return %c0_i32, %c0_i32_0 : i32, i32
  }
  func.func @transform_2(%arg0: i32) -> (i32, i32) {
    %c0_i32 = arith.constant 0 : i32
    %c0_i32_0 = arith.constant 0 : i32
    %c0_i32_1 = arith.constant 0 : i32
    return %c0_i32, %c0_i32_0 : i32, i32
  }
  func.func @transform_3(%arg0: i32) -> (i32, i32) {
    %c0_i32 = arith.constant 0 : i32
    %c0_i32_0 = arith.constant 0 : i32
    %c0_i32_1 = arith.constant 0 : i32
    return %c0_i32, %c0_i32_0 : i32, i32
  }
  func.func @transform_4(%arg0: i32) -> (i32, i32) {
    %c0_i32 = arith.constant 0 : i32
    %c0_i32_0 = arith.constant 0 : i32
    %c0_i32_1 = arith.constant 0 : i32
    return %c0_i32, %c0_i32_0 : i32, i32
  }
  func.func @transform_5(%arg0: i32) -> (i32, i32) {
    %c0_i32 = arith.constant 0 : i32
    %c0_i32_0 = arith.constant 0 : i32
    %c0_i32_1 = arith.constant 0 : i32
    return %c0_i32, %c0_i32_0 : i32, i32
  }
  func.func @transform_6(%arg0: i32) -> (i32, i32) {
    %c0_i32 = arith.constant 0 : i32
    %c0_i32_0 = arith.constant 0 : i32
    %c0_i32_1 = arith.constant 0 : i32
    return %c0_i32, %c0_i32_0 : i32, i32
  }
  func.func @transform_7(%arg0: i32) -> (i32, i32) {
    %c0_i32 = arith.constant 0 : i32
    %c0_i32_0 = arith.constant 0 : i32
    %c0_i32_1 = arith.constant 0 : i32
    return %c0_i32, %c0_i32_0 : i32, i32
  }
}

</mosaic_0001>

<bundles_post_ra>
// kernel: net_forward.3
= control target key start
LH: loop header
LB: loop body
LE: loop exit
PB: predicated region body
PF: predicated region fallthrough
CT: control target
= control target key end

     0   :  { %v4655_v0 = vmov 0.0   ;;  %vm3504_vm0 = vmmov 0   ;;  %s4651_s1 = inlined_call_operand.vmem [shape: bf16[128,128], index: 1, kind: input, shape index: {}]   ;;  %s4652_s0 = inlined_call_operand.vmem [shape: bf16[4,392,128], index: 0, kind: input, shape index: {}]   ;;  %s4653_s2 = inlined_call_operand.vmem [shape: f32[1,128], index: 2, kind: input, shape index: {}]   ;;  %s4654_s3 = inlined_call_operand.vmem [shape: bf16[392,128], index: 3, kind: output, shape index: {}]  }
   0x1   :  { %2929 = vmatprep.subr.bf16.mxu0 %v4655_v0  ;;  %3045 = vmatprep.subr.bf16.mxu1 %v4655_v0  ;;  %v3395_v1 = vld [vmem:[%s4651_s1] sm:$0xff]   ;;  %v3396_v2 = vld [vmem:[%s4651_s1 + $0x8] sm:$0xff]   ;;  %v3397_v3 = vld [vmem:[%s4651_s1 + $0x10] sm:$0xff]  }
   0x2   :  { %2945 = vmatprep.mubr.msk.bf16.mxu0 %vm3504_vm0, %v4655_v0  ;;  %3061 = vmatprep.mubr.msk.bf16.mxu1 %vm3504_vm0, %v4655_v0  ;;  %v3398_v4 = vld [vmem:[%s4651_s1 + $0x18] sm:$0xff]   ;;  %v3399_v5 = vld [vmem:[%s4651_s1 + $0x20] sm:$0xff]   ;;  %v3400_v6 = vld [vmem:[%s4651_s1 + $0x28] sm:$0xff]  }
   0x3   :  { %2930 = vmatpush3.bf16.msra.mxu0 %v3395_v1  ;;  %3046 = vmatpush3.bf16.msra.mxu1 %v3395_v1  ;;  %v3401_v7 = vld [vmem:[%s4651_s1 + $0x30] sm:$0xff]   ;;  %v3402_v8 = vld [vmem:[%s4651_s1 + $0x38] sm:$0xff]   ;;  %v3403_v9 = vld [vmem:[%s4652_s0] sm:$0xff]  }
   0x4   :  { %2931 = vmatprep.subr.bf16.mxu0 %v4655_v0  ;;  %3047 = vmatprep.subr.bf16.mxu1 %v4655_v0  ;;  %v3404_v10 = vld [vmem:[%s4652_s0 + $0xc4] sm:$0xff]   ;;  %v3406_v12 = vld [vmem:[%s4652_s0 + $0xcc] sm:$0xff]   ;;  %v3408_v14 = vld [vmem:[%s4652_s0 + $0xd4] sm:$0xff]  }
   0x5   :  { %v3405_v11 = vld [vmem:[%s4652_s0 + $0x8] sm:$0xff]   ;;  %v3407_v13 = vld [vmem:[%s4652_s0 + $0x10] sm:$0xff]   ;;  %v3409_v15 = vld [vmem:[%s4652_s0 + $0x18] sm:$0xff]  }
   0x6   :  { %v3410_v16 = vld [vmem:[%s4652_s0 + $0xdc] sm:$0xff]   ;;  %v3412_v18 = vld [vmem:[%s4652_s0 + $0xe4] sm:$0xff]   ;;  %v3414_v20 = vld [vmem:[%s4652_s0 + $0xec] sm:$0xff]  }
   0x7   :  { %2932 = vmatpush3.bf16.msra.mxu0 %v3396_v2  ;;  %3048 = vmatpush3.bf16.msra.mxu1 %v3396_v2  ;;  %v3411_v17 = vld [vmem:[%s4652_s0 + $0x20] sm:$0xff]   ;;  %v3413_v19 = vld [vmem:[%s4652_s0 + $0x28] sm:$0xff]   ;;  %v3415_v21 = vld [vmem:[%s4652_s0 + $0x30] sm:$0xff]  }
   0x8   :  { %2933 = vmatprep.subr.bf16.mxu0 %v4655_v0  ;;  %3049 = vmatprep.subr.bf16.mxu1 %v4655_v0  ;;  %v3416_v22 = vld [vmem:[%s4652_s0 + $0xf4] sm:$0xff]   ;;  %v3418_v24 = vld [vmem:[%s4652_s0 + $0xfc] sm:$0xff]   ;;  %v3420_v26 = vld [vmem:[%s4652_s0 + $0x104] sm:$0xff]  }
   0x9   :  { %v3417_v23 = vld [vmem:[%s4652_s0 + $0x38] sm:$0xff]   ;;  %v3419_v25 = vld [vmem:[%s4652_s0 + $0x40] sm:$0xff]   ;;  %v3421_v27 = vld [vmem:[%s4652_s0 + $0x48] sm:$0xff]  }
   0xa   :  { %v3422_v28 = vld [vmem:[%s4652_s0 + $0x10c] sm:$0xff]   ;;  %v3424_v30 = vld [vmem:[%s4652_s0 + $0x114] sm:$0xff]   ;;  %v3426_v32 = vld [vmem:[%s4652_s0 + $0x11c] sm:$0xff]  }
   0xb   :  { %2934 = vmatpush3.bf16.msra.mxu0 %v3397_v3  ;;  %3050 = vmatpush3.bf16.msra.mxu1 %v3397_v3  ;;  %v3423_v29 = vld [vmem:[%s4652_s0 + $0x50] sm:$0xff]   ;;  %v3425_v31 = vld [vmem:[%s4652_s0 + $0x58] sm:$0xff]   ;;  %v3427_v33 = vld [vmem:[%s4652_s0 + $0x60] sm:$0xff]  }
   0xc   :  { %2935 = vmatprep.subr.bf16.mxu0 %v4655_v0  ;;  %3051 = vmatprep.subr.bf16.mxu1 %v4655_v0  ;;  %v3428_v34 = vld [vmem:[%s4652_s0 + $0x124] sm:$0xff]   ;;  %v3430_v36 = vld [vmem:[%s4652_s0 + $0x12c] sm:$0xff]   ;;  %v3432_v38 = vld [vmem:[%s4652_s0 + $0x134] sm:$0xff]  }
   0xd   :  { %v3429_v35 = vld [vmem:[%s4652_s0 + $0x68] sm:$0xff]   ;;  %v3431_v37 = vld [vmem:[%s4652_s0 + $0x70] sm:$0xff]   ;;  %v3433_v39 = vld [vmem:[%s4652_s0 + $0x78] sm:$0xff]  }
   0xe   :  { %v3434_v40 = vld [vmem:[%s4652_s0 + $0x13c] sm:$0xff]   ;;  %v3436_v42 = vld [vmem:[%s4652_s0 + $0x144] sm:$0xff]   ;;  %v3438_v44 = vld [vmem:[%s4652_s0 + $0x14c] sm:$0xff]  }
   0xf   :  { %2936 = vmatpush3.bf16.msra.mxu0 %v3398_v4  ;;  %3052 = vmatpush3.bf16.msra.mxu1 %v3398_v4  ;;  %v3435_v41 = vld [vmem:[%s4652_s0 + $0x80] sm:$0xff]   ;;  %v3437_v43 = vld [vmem:[%s4652_s0 + $0x88] sm:$0xff]   ;;  %v3439_v45 = vld [vmem:[%s4652_s0 + $0x90] sm:$0xff]  }
  0x10   :  { %2937 = vmatprep.subr.bf16.mxu0 %v4655_v0  ;;  %3053 = vmatprep.subr.bf16.mxu1 %v4655_v0  ;;  %v3440_v46 = vld [vmem:[%s4652_s0 + $0x154] sm:$0xff]   ;;  %v3442_v48 = vld [vmem:[%s4652_s0 + $0x15c] sm:$0xff]   ;;  %v3444_v50 = vld [vmem:[%s4652_s0 + $0x164] sm:$0xff]  }
  0x11   :  { %v3441_v47 = vld [vmem:[%s4652_s0 + $0x98] sm:$0xff]   ;;  %v3443_v49 = vld [vmem:[%s4652_s0 + $0xa0] sm:$0xff]   ;;  %v3445_v51 = vld [vmem:[%s4652_s0 + $0xa8] sm:$0xff]  }
  0x12   :  { %v3446_v52 = vld [vmem:[%s4652_s0 + $0x16c] sm:$0xff]   ;;  %v3448_v54 = vld [vmem:[%s4652_s0 + $0x174] sm:$0xff]   ;;  %v3450_v56 = vld [vmem:[%s4652_s0 + $0x17c] sm:$0xff]  }
  0x13   :  { %2938 = vmatpush3.bf16.msra.mxu0 %v3399_v5  ;;  %3054 = vmatpush3.bf16.msra.mxu1 %v3399_v5  ;;  %v3447_v53 = vld [vmem:[%s4652_s0 + $0xb0] sm:$0xff]   ;;  %v3449_v55 = vld [vmem:[%s4652_s0 + $0xb8] sm:$0xff]   ;;  %v3451_v57 = vld [vmem:[%s4652_s0 + $0xc0] ss:$0 sps:$4 sm:$0xff]  }
  0x14   :  { %2939 = vmatprep.subr.bf16.mxu0 %v4655_v0  ;;  %3055 = vmatprep.subr.bf16.mxu1 %v4655_v0  ;;  %v3452_v58 = vld [vmem:[%s4652_s0 + $0x184] ss:$0 sps:$4 sm:$0xff]   ;;  %v3453_v59 = vld [vmem:[%s4652_s0 + $0x188] sm:$0xff]   ;;  %v3455_v61 = vld [vmem:[%s4652_s0 + $0x190] sm:$0xff]  }
  0x15   :  { %v3454_v60 = vld [vmem:[%s4652_s0 + $0x24c] sm:$0xff]   ;;  %v3456_v62 = vld [vmem:[%s4652_s0 + $0x254] sm:$0xff]  }
  0x17   :  { %2940 = vmatpush3.bf16.msra.mxu0 %v3400_v6  ;;  %3056 = vmatpush3.bf16.msra.mxu1 %v3400_v6 }
  0x18   :  { %2941 = vmatprep.subr.bf16.mxu0 %v4655_v0  ;;  %3057 = vmatprep.subr.bf16.mxu1 %v4655_v0 }
  0x1b   :  { %2942 = vmatpush3.bf16.msra.mxu0 %v3401_v7  ;;  %3058 = vmatpush3.bf16.msra.mxu1 %v3401_v7 }
  0x1c   :  { %2943 = vmatprep.subr.bf16.mxu0 %v4655_v0  ;;  %3059 = vmatprep.subr.bf16.mxu1 %v4655_v0 }
  0x1f   :  { %2944 = vmatpush3.bf16.msra.mxu0 %v3402_v8  ;;  %3060 = vmatpush3.bf16.msra.mxu1 %v3402_v8 }
  0x20   :  { %3161 = vmatprep.subr.bf16.mxu0 %v4655_v0  ;;  %3277 = vmatprep.subr.bf16.mxu1 %v4655_v0 }
  0x22   :  { %2946 = vmatmul.mubr.bf16.vlgmr.msra.gmra.mrb[0].mxu0 %v3403_v9  ;;  %3062 = vmatmul.mubr.bf16.vlgmr.msra.gmra.mrb[0].mxu1 %v3404_v10 }
  0x23   :  { %3162 = vmatpush3.bf16.msra.mxu0 %v3395_v1  ;;  %3278 = vmatpush3.bf16.msra.mxu1 %v3395_v1 }
  0x24   :  { %2949 = vmatprep.mubr.msk.bf16.mxu0 %vm3504_vm0, %v4655_v0  ;;  %3065 = vmatprep.mubr.msk.bf16.mxu1 %vm3504_vm0, %v4655_v0 }
  0x25   :  { %3163 = vmatprep.subr.bf16.mxu0 %v4655_v0  ;;  %3279 = vmatprep.subr.bf16.mxu1 %v4655_v0 }
  0x27   :  { %3164 = vmatpush3.bf16.msra.mxu0 %v3396_v2  ;;  %3280 = vmatpush3.bf16.msra.mxu1 %v3396_v2 }
  0x28   :  { %3165 = vmatprep.subr.bf16.mxu0 %v4655_v0  ;;  %3281 = vmatprep.subr.bf16.mxu1 %v4655_v0 }
  0x2a   :  { %2950 = vmatmul.mubr.bf16.gmra.mrb[4].mxu0 %v3405_v11  ;;  %3066 = vmatmul.mubr.bf16.gmra.mrb[4].mxu1 %v3406_v12 }
  0x2b   :  { %2953 = vmatprep.mubr.msk.bf16.mxu0 %vm3504_vm0, %v4655_v0  ;;  %3069 = vmatprep.mubr.msk.bf16.mxu1 %vm3504_vm0, %v4655_v0 }
  0x2c   :  { %3166 = vmatpush3.bf16.msra.mxu0 %v3397_v3  ;;  %3282 = vmatpush3.bf16.msra.mxu1 %v3397_v3 }
  0x2d   :  { %3167 = vmatprep.subr.bf16.mxu0 %v4655_v0  ;;  %3283 = vmatprep.subr.bf16.mxu1 %v4655_v0 }
  0x30   :  { %3168 = vmatpush3.bf16.msra.mxu0 %v3398_v4  ;;  %3284 = vmatpush3.bf16.msra.mxu1 %v3398_v4 }
  0x31   :  { %3169 = vmatprep.subr.bf16.mxu0 %v4655_v0  ;;  %3285 = vmatprep.subr.bf16.mxu1 %v4655_v0 }
  0x32   :  { %2954 = vmatmul.mubr.bf16.gmra.mrb[8].mxu0 %v3407_v13  ;;  %3070 = vmatmul.mubr.bf16.gmra.mrb[8].mxu1 %v3408_v14 }
  0x33   :  { %2957 = vmatprep.mubr.msk.bf16.mxu0 %vm3504_vm0, %v4655_v0  ;;  %3073 = vmatprep.mubr.msk.bf16.mxu1 %vm3504_vm0, %v4655_v0 }
  0x34   :  { %3170 = vmatpush3.bf16.msra.mxu0 %v3399_v5  ;;  %3286 = vmatpush3.bf16.msra.mxu1 %v3399_v5  ;;  %v3457_v5 = vld [vmem:[%s4652_s0 + $0x198] sm:$0xff]  }
  0x35   :  { %3171 = vmatprep.subr.bf16.mxu0 %v4655_v0  ;;  %3287 = vmatprep.subr.bf16.mxu1 %v4655_v0 }
  0x38   :  { %3172 = vmatpush3.bf16.msra.mxu0 %v3400_v6  ;;  %3288 = vmatpush3.bf16.msra.mxu1 %v3400_v6  ;;  %v3458_v6 = vld [vmem:[%s4652_s0 + $0x25c] sm:$0xff]  }
  0x39   :  { %3173 = vmatprep.subr.bf16.mxu0 %v4655_v0  ;;  %3289 = vmatprep.subr.bf16.mxu1 %v4655_v0 }
  0x3a   :  { %2958 = vmatmul.mubr.bf16.gmra.mrb[12].mxu0 %v3409_v15  ;;  %3074 = vmatmul.mubr.bf16.gmra.mrb[12].mxu1 %v3410_v16 }
  0x3b   :  { %2961 = vmatprep.mubr.msk.bf16.mxu0 %vm3504_vm0, %v4655_v0  ;;  %3077 = vmatprep.mubr.msk.bf16.mxu1 %vm3504_vm0, %v4655_v0 }
  0x3c   :  { %3174 = vmatpush3.bf16.msra.mxu0 %v3401_v7  ;;  %3290 = vmatpush3.bf16.msra.mxu1 %v3401_v7 }
  0x3d   :  { %3175 = vmatprep.subr.bf16.mxu0 %v4655_v0  ;;  %3291 = vmatprep.subr.bf16.mxu1 %v4655_v0 }
  0x40   :  { %3176 = vmatpush3.bf16.msra.mxu0 %v3402_v8  ;;  %3292 = vmatpush3.bf16.msra.mxu1 %v3402_v8 }
  0x42   :  { %2962 = vmatmul.mubr.bf16.gmra.mrb[16].mxu0 %v3411_v17  ;;  %3078 = vmatmul.mubr.bf16.gmra.mrb[16].mxu1 %v3412_v18  ;;  %v3459_v17 = vld [vmem:[%s4652_s0 + $0x1a0] sm:$0xff]  }
  0x43   :  { %2965 = vmatprep.mubr.msk.bf16.mxu0 %vm3504_vm0, %v4655_v0  ;;  %3081 = vmatprep.mubr.msk.bf16.mxu1 %vm3504_vm0, %v4655_v0  ;;  %v3460_v18 = vld [vmem:[%s4652_s0 + $0x264] sm:$0xff]  }
  0x4a   :  { %2966 = vmatmul.mubr.bf16.gmra.mrb[20].mxu0 %v3413_v19  ;;  %3082 = vmatmul.mubr.bf16.gmra.mrb[20].mxu1 %v3414_v20 }
  0x4b   :  { %2969 = vmatprep.mubr.msk.bf16.mxu0 %vm3504_vm0, %v4655_v0  ;;  %3085 = vmatprep.mubr.msk.bf16.mxu1 %vm3504_vm0, %v4655_v0 }
  0x52   :  { %2970 = vmatmul.mubr.bf16.gmra.mrb[24].mxu0 %v3415_v21  ;;  %3086 = vmatmul.mubr.bf16.gmra.mrb[24].mxu1 %v3416_v22 }
  0x53   :  { %2973 = vmatprep.mubr.msk.bf16.mxu0 %vm3504_vm0, %v4655_v0  ;;  %3089 = vmatprep.mubr.msk.bf16.mxu1 %vm3504_vm0, %v4655_v0 }
  0x5a   :  { %2974 = vmatmul.mubr.bf16.gmra.mrb[28].mxu0 %v3417_v23  ;;  %3090 = vmatmul.mubr.bf16.gmra.mrb[28].mxu1 %v3418_v24 }
  0x5b   :  { %2977 = vmatprep.mubr.msk.bf16.mxu0 %vm3504_vm0, %v4655_v0  ;;  %3093 = vmatprep.mubr.msk.bf16.mxu1 %vm3504_vm0, %v4655_v0 }
  0x62   :  { %2978 = vmatmul.mubr.bf16.gmra.mrb[32].mxu0 %v3419_v25  ;;  %3094 = vmatmul.mubr.bf16.gmra.mrb[32].mxu1 %v3420_v26 }
  0x63   :  { %2981 = vmatprep.mubr.msk.bf16.mxu0 %vm3504_vm0, %v4655_v0  ;;  %3097 = vmatprep.mubr.msk.bf16.mxu1 %vm3504_vm0, %v4655_v0 }
  0x6a   :  { %2982 = vmatmul.mubr.bf16.gmra.mrb[36].mxu0 %v3421_v27  ;;  %3098 = vmatmul.mubr.bf16.gmra.mrb[36].mxu1 %v3422_v28 }
  0x6b   :  { %2985 = vmatprep.mubr.msk.bf16.mxu0 %vm3504_vm0, %v4655_v0  ;;  %3101 = vmatprep.mubr.msk.bf16.mxu1 %vm3504_vm0, %v4655_v0 }
  0x72   :  { %2986 = vmatmul.mubr.bf16.gmra.mrb[40].mxu0 %v3423_v29  ;;  %3102 = vmatmul.mubr.bf16.gmra.mrb[40].mxu1 %v3424_v30  ;;  %v3461_v29 = vld [vmem:[%s4652_s0 + $0x1a8] sm:$0xff]  }
  0x73   :  { %2989 = vmatprep.mubr.msk.bf16.mxu0 %vm3504_vm0, %v4655_v0  ;;  %3105 = vmatprep.mubr.msk.bf16.mxu1 %vm3504_vm0, %v4655_v0  ;;  %v3462_v30 = vld [vmem:[%s4652_s0 + $0x26c] sm:$0xff]  }
  0x7a   :  { %2990 = vmatmul.mubr.bf16.gmra.mrb[44].mxu0 %v3425_v31  ;;  %3106 = vmatmul.mubr.bf16.gmra.mrb[44].mxu1 %v3426_v32 }
  0x7b   :  { %2993 = vmatprep.mubr.msk.bf16.mxu0 %vm3504_vm0, %v4655_v0  ;;  %3109 = vmatprep.mubr.msk.bf16.mxu1 %vm3504_vm0, %v4655_v0 }
  0x82   :  { %2994 = vmatmul.mubr.bf16.gmra.mrb[48].mxu0 %v3427_v33  ;;  %3110 = vmatmul.mubr.bf16.gmra.mrb[48].mxu1 %v3428_v34 }
  0x83   :  { %2997 = vmatprep.mubr.msk.bf16.mxu0 %vm3504_vm0, %v4655_v0  ;;  %3113 = vmatprep.mubr.msk.bf16.mxu1 %vm3504_vm0, %v4655_v0 }
  0x8a   :  { %2998 = vmatmul.mubr.bf16.gmra.mrb[52].mxu0 %v3429_v35  ;;  %3114 = vmatmul.mubr.bf16.gmra.mrb[52].mxu1 %v3430_v36 }
  0x8b   :  { %3001 = vmatprep.mubr.msk.bf16.mxu0 %vm3504_vm0, %v4655_v0  ;;  %3117 = vmatprep.mubr.msk.bf16.mxu1 %vm3504_vm0, %v4655_v0 }
  0x92   :  { %3002 = vmatmul.mubr.bf16.gmra.mrb[56].mxu0 %v3431_v37  ;;  %3118 = vmatmul.mubr.bf16.gmra.mrb[56].mxu1 %v3432_v38 }
  0x93   :  { %3005 = vmatprep.mubr.msk.bf16.mxu0 %vm3504_vm0, %v4655_v0  ;;  %3121 = vmatprep.mubr.msk.bf16.mxu1 %vm3504_vm0, %v4655_v0 }
  0x9a   :  { %3006 = vmatmul.mubr.bf16.gmra.mrb[60].mxu0 %v3433_v39  ;;  %3122 = vmatmul.mubr.bf16.gmra.mrb[60].mxu1 %v3434_v40 }
  0x9b   :  { %3009 = vmatprep.mubr.msk.bf16.mxu0 %vm3504_vm0, %v4655_v0  ;;  %3125 = vmatprep.mubr.msk.bf16.mxu1 %vm3504_vm0, %v4655_v0 }
  0xa2   :  { %3010 = vmatmul.mubr.bf16.gmra.mrb[64].mxu0 %v3435_v41  ;;  %3126 = vmatmul.mubr.bf16.gmra.mrb[64].mxu1 %v3436_v42  ;;  %v3463_v41 = vld [vmem:[%s4652_s0 + $0x1b0] sm:$0xff]  }
  0xa3   :  { %3013 = vmatprep.mubr.msk.bf16.mxu0 %vm3504_vm0, %v4655_v0  ;;  %3129 = vmatprep.mubr.msk.bf16.mxu1 %vm3504_vm0, %v4655_v0  ;;  %v3464_v42 = vld [vmem:[%s4652_s0 + $0x274] sm:$0xff]  }
  0xaa   :  { %3014 = vmatmul.mubr.bf16.gmra.mrb[68].mxu0 %v3437_v43  ;;  %3130 = vmatmul.mubr.bf16.gmra.mrb[68].mxu1 %v3438_v44 }
  0xab   :  { %3017 = vmatprep.mubr.msk.bf16.mxu0 %vm3504_vm0, %v4655_v0  ;;  %3133 = vmatprep.mubr.msk.bf16.mxu1 %vm3504_vm0, %v4655_v0 }
  0xb2   :  { %3018 = vmatmul.mubr.bf16.gmra.mrb[72].mxu0 %v3439_v45  ;;  %3134 = vmatmul.mubr.bf16.gmra.mrb[72].mxu1 %v3440_v46 }
  0xb3   :  { %3021 = vmatprep.mubr.msk.bf16.mxu0 %vm3504_vm0, %v4655_v0  ;;  %3137 = vmatprep.mubr.msk.bf16.mxu1 %vm3504_vm0, %v4655_v0 }
  0xba   :  { %3022 = vmatmul.mubr.bf16.gmra.mrb[76].mxu0 %v3441_v47  ;;  %3138 = vmatmul.mubr.bf16.gmra.mrb[76].mxu1 %v3442_v48 }
  0xbb   :  { %3025 = vmatprep.mubr.msk.bf16.mxu0 %vm3504_vm0, %v4655_v0  ;;  %3141 = vmatprep.mubr.msk.bf16.mxu1 %vm3504_vm0, %v4655_v0 }
  0xc2   :  { %3026 = vmatmul.mubr.bf16.gmra.mrb[80].mxu0 %v3443_v49  ;;  %3142 = vmatmul.mubr.bf16.gmra.mrb[80].mxu1 %v3444_v50 }
  0xc3   :  { %3029 = vmatprep.mubr.msk.bf16.mxu0 %vm3504_vm0, %v4655_v0  ;;  %3145 = vmatprep.mubr.msk.bf16.mxu1 %vm3504_vm0, %v4655_v0 }
  0xca   :  { %3030 = vmatmul.mubr.bf16.gmra.mrb[84].mxu0 %v3445_v51  ;;  %3146 = vmatmul.mubr.bf16.gmra.mrb[84].mxu1 %v3446_v52 }
  0xcb   :  { %3033 = vmatprep.mubr.msk.bf16.mxu0 %vm3504_vm0, %v4655_v0  ;;  %3149 = vmatprep.mubr.msk.bf16.mxu1 %vm3504_vm0, %v4655_v0 }
  0xd2   :  { %3034 = vmatmul.mubr.bf16.gmra.mrb[88].mxu0 %v3447_v53  ;;  %3150 = vmatmul.mubr.bf16.gmra.mrb[88].mxu1 %v3448_v54  ;;  %v3465_v53 = vld [vmem:[%s4652_s0 + $0x1b8] sm:$0xff]  }
  0xd3   :  { %3037 = vmatprep.mubr.msk.bf16.mxu0 %vm3504_vm0, %v4655_v0  ;;  %3153 = vmatprep.mubr.msk.bf16.mxu1 %vm3504_vm0, %v4655_v0  ;;  %v3466_v54 = vld [vmem:[%s4652_s0 + $0x27c] sm:$0xff]  }
  0xda   :  { %3038 = vmatmul.mubr.bf16.gmra.mrb[92].mxu0 %v3449_v55  ;;  %3154 = vmatmul.mubr.bf16.gmra.mrb[92].mxu1 %v3450_v56 }
  0xdb   :  { %3041 = vmatprep.mubr.msk.bf16.mxu0 %vm3504_vm0, %v4655_v0  ;;  %3157 = vmatprep.mubr.msk.bf16.mxu1 %vm3504_vm0, %v4655_v0 }
  0xe2   :  { %3042 = vmatmul.mubr.bf16.gmra.mrb[96].mxu0 %v3451_v57  ;;  %3158 = vmatmul.mubr.bf16.gmra.mrb[96].mxu1 %v3452_v58 }
  0xe3   :  { %3177 = vmatprep.mubr.msk.bf16.mxu0 %vm3504_vm0, %v4655_v0  ;;  %3293 = vmatprep.mubr.msk.bf16.mxu1 %vm3504_vm0, %v4655_v0 }
  0xea   :  { %3178 = vmatmul.mubr.bf16.vlgmr.msra.gmra.mrb[100].mxu0 %v3453_v59  ;;  %3294 = vmatmul.mubr.bf16.vlgmr.msra.gmra.mrb[100].mxu1 %v3454_v60 }
  0xeb   :  { %3181 = vmatprep.mubr.msk.bf16.mxu0 %vm3504_vm0, %v4655_v0  ;;  %3297 = vmatprep.mubr.msk.bf16.mxu1 %vm3504_vm0, %v4655_v0 }
  0xf2   :  { %3182 = vmatmul.mubr.bf16.gmra.mrb[104].mxu0 %v3455_v61  ;;  %3298 = vmatmul.mubr.bf16.gmra.mrb[104].mxu1 %v3456_v62 }
  0xf3   :  { %3185 = vmatprep.mubr.msk.bf16.mxu0 %vm3504_vm0, %v4655_v0  ;;  %3301 = vmatprep.mubr.msk.bf16.mxu1 %vm3504_vm0, %v4655_v0 }
  0xf5   :  { %v3855_v63 = vpop.f32.mrb[0].mxu0  ;;  %v3857_v1 = vpop.f32.mrb[0].mxu1 }
  0xf6   :  { %v2947_v3 = vpop.f32.mrb[1].mxu0  ;;  %v3063_v4 = vpop.f32.mrb[1].mxu1 }
  0xf7   :  { %v3867_v7 = vpop.f32.mrb[2].mxu0  ;;  %v3869_v8 = vpop.f32.mrb[2].mxu1 }
  0xf8   :  { %v2948_v10 = vpop.f32.mrb[3].mxu0  ;;  %v3064_v11 = vpop.f32.mrb[3].mxu1 }
  0xfa   :  { %3186 = vmatmul.mubr.bf16.gmra.mrb[108].mxu0 %v3457_v5  ;;  %3302 = vmatmul.mubr.bf16.gmra.mrb[108].mxu1 %v3458_v6  ;;  %v3467_v5 = vld [vmem:[%s4652_s0 + $0x1c0] sm:$0xff]  }
  0xfb   :  { %3189 = vmatprep.mubr.msk.bf16.mxu0 %vm3504_vm0, %v4655_v0  ;;  %3305 = vmatprep.mubr.msk.bf16.mxu1 %vm3504_vm0, %v4655_v0  ;;  %v3468_v6 = vld [vmem:[%s4652_s0 + $0x284] sm:$0xff]  }
  0xfd   :  { %v3877_v12 = vpop.f32.mrb[4].mxu0  ;;  %v3879_v13 = vpop.f32.mrb[4].mxu1 }
  0xfe   :  { %v2951_v15 = vpop.f32.mrb[5].mxu0  ;;  %v3067_v16 = vpop.f32.mrb[5].mxu1 }
  0xff   :  { %v3889_v19 = vpop.f32.mrb[6].mxu0  ;;  %v3891_v20 = vpop.f32.mrb[6].mxu1 }
 0x100   :  { %v2952_v22 = vpop.f32.mrb[7].mxu0  ;;  %v3068_v23 = vpop.f32.mrb[7].mxu1 }
 0x102   :  { %3190 = vmatmul.mubr.bf16.gmra.mrb[112].mxu0 %v3459_v17  ;;  %3306 = vmatmul.mubr.bf16.gmra.mrb[112].mxu1 %v3460_v18 }
 0x103   :  { %3193 = vmatprep.mubr.msk.bf16.mxu0 %vm3504_vm0, %v4655_v0  ;;  %3309 = vmatprep.mubr.msk.bf16.mxu1 %vm3504_vm0, %v4655_v0 }
 0x105   :  { %v3899_v24 = vpop.f32.mrb[8].mxu0  ;;  %v3901_v25 = vpop.f32.mrb[8].mxu1 }
 0x106   :  { %v2955_v27 = vpop.f32.mrb[9].mxu0  ;;  %v3071_v28 = vpop.f32.mrb[9].mxu1 }
 0x107   :  { %v3911_v31 = vpop.f32.mrb[10].mxu0  ;;  %v3913_v32 = vpop.f32.mrb[10].mxu1 }
 0x108   :  { %v2956_v34 = vpop.f32.mrb[11].mxu0  ;;  %v3072_v35 = vpop.f32.mrb[11].mxu1 }
 0x10a   :  { %3194 = vmatmul.mubr.bf16.gmra.mrb[116].mxu0 %v3461_v29  ;;  %3310 = vmatmul.mubr.bf16.gmra.mrb[116].mxu1 %v3462_v30  ;;  %v3469_v29 = vld [vmem:[%s4652_s0 + $0x1c8] sm:$0xff]  }
 0x10b   :  { %3197 = vmatprep.mubr.msk.bf16.mxu0 %vm3504_vm0, %v4655_v0  ;;  %3313 = vmatprep.mubr.msk.bf16.mxu1 %vm3504_vm0, %v4655_v0  ;;  %v3470_v30 = vld [vmem:[%s4652_s0 + $0x28c] sm:$0xff]  }
 0x10d   :  { %v3921_v36 = vpop.f32.mrb[12].mxu0  ;;  %v3923_v37 = vpop.f32.mrb[12].mxu1 }
 0x10e   :  { %v2959_v39 = vpop.f32.mrb[13].mxu0  ;;  %v3075_v40 = vpop.f32.mrb[13].mxu1 }
 0x10f   :  { %v3933_v43 = vpop.f32.mrb[14].mxu0  ;;  %v3935_v44 = vpop.f32.mrb[14].mxu1 }
 0x110   :  { %v2960_v46 = vpop.f32.mrb[15].mxu0  ;;  %v3076_v47 = vpop.f32.mrb[15].mxu1 }
 0x112   :  { %3198 = vmatmul.mubr.bf16.gmra.mrb[120].mxu0 %v3463_v41  ;;  %3314 = vmatmul.mubr.bf16.gmra.mrb[120].mxu1 %v3464_v42 }
 0x113   :  { %3201 = vmatprep.mubr.msk.bf16.mxu0 %vm3504_vm0, %v4655_v0  ;;  %3317 = vmatprep.mubr.msk.bf16.mxu1 %vm3504_vm0, %v4655_v0 }
 0x115   :  { %v3943_v48 = vpop.f32.mrb[16].mxu0  ;;  %v3945_v49 = vpop.f32.mrb[16].mxu1 }
 0x116   :  { %v2963_v51 = vpop.f32.mrb[17].mxu0  ;;  %v3079_v52 = vpop.f32.mrb[17].mxu1 }
 0x117   :  { %v3955_v55 = vpop.f32.mrb[18].mxu0  ;;  %v3957_v56 = vpop.f32.mrb[18].mxu1 }
 0x118   :  { %v2964_v58 = vpop.f32.mrb[19].mxu0  ;;  %v3080_v59 = vpop.f32.mrb[19].mxu1 }
 0x11a   :  { %3202 = vmatmul.mubr.bf16.gmra.mrb[124].mxu0 %v3465_v53  ;;  %3318 = vmatmul.mubr.bf16.gmra.mrb[124].mxu1 %v3466_v54  ;;  %v3471_v53 = vld [vmem:[%s4652_s0 + $0x1d0] sm:$0xff]  }
 0x11b   :  { %3205 = vmatprep.mubr.msk.bf16.mxu0 %vm3504_vm0, %v4655_v0  ;;  %3321 = vmatprep.mubr.msk.bf16.mxu1 %vm3504_vm0, %v4655_v0  ;;  %v3472_v54 = vld [vmem:[%s4652_s0 + $0x294] sm:$0xff]  }
 0x11d   :  { %v3965_v60 = vpop.f32.mrb[20].mxu0  ;;  %v3967_v61 = vpop.f32.mrb[20].mxu1 }
 0x11e   :  { %v2967_v3 = vpop.f32.mrb[21].mxu0  ;;  %v3083_v4 = vpop.f32.mrb[21].mxu1 }
 0x11f   :  { %v3977_v10 = vpop.f32.mrb[22].mxu0  ;;  %v3979_v11 = vpop.f32.mrb[22].mxu1 }
 0x120   :  { %v2968_v16 = vpop.f32.mrb[23].mxu0  ;;  %v3084_v17 = vpop.f32.mrb[23].mxu1 }
 0x122   :  { %3206 = vmatmul.mubr.bf16.gmra.mrb[128].mxu0 %v3467_v5  ;;  %3322 = vmatmul.mubr.bf16.gmra.mrb[128].mxu1 %v3468_v6 }
 0x123   :  { %3209 = vmatprep.mubr.msk.bf16.mxu0 %vm3504_vm0, %v4655_v0  ;;  %3325 = vmatprep.mubr.msk.bf16.mxu1 %vm3504_vm0, %v4655_v0 }
 0x125   :  { %v3987_v18 = vpop.f32.mrb[24].mxu0  ;;  %v3989_v22 = vpop.f32.mrb[24].mxu1 }
 0x126   :  { %v2971_v27 = vpop.f32.mrb[25].mxu0  ;;  %v3087_v28 = vpop.f32.mrb[25].mxu1 }
 0x127   :  { %v3999_v34 = vpop.f32.mrb[26].mxu0  ;;  %v4001_v35 = vpop.f32.mrb[26].mxu1 }
 0x128   :  { %v2972_v40 = vpop.f32.mrb[27].mxu0  ;;  %v3088_v41 = vpop.f32.mrb[27].mxu1 }
 0x12a   :  { %3210 = vmatmul.mubr.bf16.gmra.mrb[132].mxu0 %v3469_v29  ;;  %3326 = vmatmul.mubr.bf16.gmra.mrb[132].mxu1 %v3470_v30  ;;  %v3473_v29 = vld [vmem:[%s4652_s0 + $0x1d8] sm:$0xff]  }
 0x12b   :  { %3213 = vmatprep.mubr.msk.bf16.mxu0 %vm3504_vm0, %v4655_v0  ;;  %3329 = vmatprep.mubr.msk.bf16.mxu1 %vm3504_vm0, %v4655_v0  ;;  %v3474_v30 = vld [vmem:[%s4652_s0 + $0x29c] sm:$0xff]  }
 0x12d   :  { %v4009_v42 = vpop.f32.mrb[28].mxu0  ;;  %v4011_v46 = vpop.f32.mrb[28].mxu1 }
 0x12e   :  { %v2975_v51 = vpop.f32.mrb[29].mxu0  ;;  %v3091_v52 = vpop.f32.mrb[29].mxu1 }
 0x12f   :  { %v4021_v58 = vpop.f32.mrb[30].mxu0  ;;  %v4023_v59 = vpop.f32.mrb[30].mxu1 }
 0x130   :  { %v2976_v4 = vpop.f32.mrb[31].mxu0  ;;  %v3092_v5 = vpop.f32.mrb[31].mxu1 }
 0x132   :  { %3214 = vmatmul.mubr.bf16.gmra.mrb[136].mxu0 %v3471_v53  ;;  %3330 = vmatmul.mubr.bf16.gmra.mrb[136].mxu1 %v3472_v54 }
 0x133   :  { %3217 = vmatprep.mubr.msk.bf16.mxu0 %vm3504_vm0, %v4655_v0  ;;  %3333 = vmatprep.mubr.msk.bf16.mxu1 %vm3504_vm0, %v4655_v0 }
 0x135   :  { %v4031_v6 = vpop.f32.mrb[32].mxu0  ;;  %v4033_v16 = vpop.f32.mrb[32].mxu1 }
 0x136   :  { %v2979_v27 = vpop.f32.mrb[33].mxu0  ;;  %v3095_v28 = vpop.f32.mrb[33].mxu1 }
 0x137   :  { %v4043_v40 = vpop.f32.mrb[34].mxu0  ;;  %v4045_v41 = vpop.f32.mrb[34].mxu1 }
 0x138   :  { %v2980_v52 = vpop.f32.mrb[35].mxu0  ;;  %v3096_v53 = vpop.f32.mrb[35].mxu1 }
 0x13a   :  { %3218 = vmatmul.mubr.bf16.gmra.mrb[140].mxu0 %v3473_v29  ;;  %3334 = vmatmul.mubr.bf16.gmra.mrb[140].mxu1 %v3474_v30  ;;  %v3475_v29 = vld [vmem:[%s4652_s0 + $0x1e0] sm:$0xff]  }
 0x13b   :  { %3221 = vmatprep.mubr.msk.bf16.mxu0 %vm3504_vm0, %v4655_v0  ;;  %3337 = vmatprep.mubr.msk.bf16.mxu1 %vm3504_vm0, %v4655_v0  ;;  %v3476_v30 = vld [vmem:[%s4652_s0 + $0x2a4] sm:$0xff]  }
 0x13d   :  { %v4053_v54 = vpop.f32.mrb[36].mxu0  ;;  %v4055_v4 = vpop.f32.mrb[36].mxu1 }
 0x13e   :  { %v2983_v27 = vpop.f32.mrb[37].mxu0  ;;  %v3099_v28 = vpop.f32.mrb[37].mxu1 }
 0x13f   :  { %v4065_v52 = vpop.f32.mrb[38].mxu0  ;;  %v4067_v53 = vpop.f32.mrb[38].mxu1 }
 0x140   :  { %v2984_v17 = vpop.f32.mrb[39].mxu0  ;;  %v3100_v3 = vpop.f32.mrb[39].mxu1 }
 0x141   :  { %v3477_v3 = vld [vmem:[%s4652_s0 + $0x1e8] sm:$0xff]  }
 0x142   :  { %3222 = vmatmul.mubr.bf16.gmra.mrb[144].mxu0 %v3475_v29  ;;  %3338 = vmatmul.mubr.bf16.gmra.mrb[144].mxu1 %v3476_v30  ;;  %v3478_v17 = vld [vmem:[%s4652_s0 + $0x2ac] sm:$0xff]  }
 0x143   :  { %3225 = vmatprep.mubr.msk.bf16.mxu0 %vm3504_vm0, %v4655_v0  ;;  %3341 = vmatprep.mubr.msk.bf16.mxu1 %vm3504_vm0, %v4655_v0 }
 0x145   :  { %v4075_v27 = vpop.f32.mrb[40].mxu0  ;;  %v4077_v28 = vpop.f32.mrb[40].mxu1 }
 0x146   :  { %v2987_v47 = vpop.f32.mrb[41].mxu0  ;;  %v3103_v39 = vpop.f32.mrb[41].mxu1 }
 0x147   :  { %v4087_v29 = vpop.f32.mrb[42].mxu0  ;;  %v4089_v30 = vpop.f32.mrb[42].mxu1 }
 0x148   :  { %v2988_v23 = vpop.f32.mrb[43].mxu0  ;;  %v3104_v15 = vpop.f32.mrb[43].mxu1 }
 0x149   :  { %v3479_v15 = vld [vmem:[%s4652_s0 + $0x1f0] sm:$0xff]  }
 0x14a   :  { %3226 = vmatmul.mubr.bf16.gmra.mrb[148].mxu0 %v3477_v3  ;;  %3342 = vmatmul.mubr.bf16.gmra.mrb[148].mxu1 %v3478_v17  ;;  %v3480_v23 = vld [vmem:[%s4652_s0 + $0x2b4] sm:$0xff]  }
 0x14b   :  { %3229 = vmatprep.mubr.msk.bf16.mxu0 %vm3504_vm0, %v4655_v0  ;;  %3345 = vmatprep.mubr.msk.bf16.mxu1 %vm3504_vm0, %v4655_v0 }
 0x14d   :  { %v4097_v39 = vpop.f32.mrb[44].mxu0  ;;  %v4099_v47 = vpop.f32.mrb[44].mxu1 }
 0x14e   :  { %4711 = vst [vmem:[#allocation2_spill] sm:$0xff] %v4097_v39  ;;  %4712 = vst [vmem:[#allocation3_spill] sm:$0xff] %v4099_v47  ;;  %v2991_v62 = vpop.f32.mrb[45].mxu0  ;;  %v3107_v57 = vpop.f32.mrb[45].mxu1 }
 0x14f   :  { %v4109_v3 = vpop.f32.mrb[46].mxu0  ;;  %v4111_v17 = vpop.f32.mrb[46].mxu1 }
 0x150   :  { %4713 = vst [vmem:[#allocation4_spill] sm:$0xff] %v4109_v3  ;;  %4714 = vst [vmem:[#allocation5_spill] sm:$0xff] %v4111_v17  ;;  %v2992_v50 = vpop.f32.mrb[47].mxu0  ;;  %v3108_v45 = vpop.f32.mrb[47].mxu1 }
 0x151   :  { %v3481_v45 = vld [vmem:[%s4652_s0 + $0x1f8] sm:$0xff]  }
 0x152   :  { %3230 = vmatmul.mubr.bf16.gmra.mrb[152].mxu0 %v3479_v15  ;;  %3346 = vmatmul.mubr.bf16.gmra.mrb[152].mxu1 %v3480_v23  ;;  %v3482_v50 = vld [vmem:[%s4652_s0 + $0x2bc] sm:$0xff]  }
 0x153   :  { %3233 = vmatprep.mubr.msk.bf16.mxu0 %vm3504_vm0, %v4655_v0  ;;  %3349 = vmatprep.mubr.msk.bf16.mxu1 %vm3504_vm0, %v4655_v0 }
 0x155   :  { %v4119_v57 = vpop.f32.mrb[48].mxu0  ;;  %v4121_v62 = vpop.f32.mrb[48].mxu1 }
 0x156   :  { %4715 = vst [vmem:[#allocation6_spill] sm:$0xff] %v4119_v57  ;;  %4716 = vst [vmem:[#allocation7_spill] sm:$0xff] %v4121_v62  ;;  %v2995_v38 = vpop.f32.mrb[49].mxu0  ;;  %v3111_v33 = vpop.f32.mrb[49].mxu1 }
 0x157   :  { %v4131_v15 = vpop.f32.mrb[50].mxu0  ;;  %v4133_v23 = vpop.f32.mrb[50].mxu1 }
 0x158   :  { %4717 = vst [vmem:[#allocation8_spill] sm:$0xff] %v4131_v15  ;;  %4718 = vst [vmem:[#allocation9_spill] sm:$0xff] %v4133_v23  ;;  %v2996_v26 = vpop.f32.mrb[51].mxu0  ;;  %v3112_v21 = vpop.f32.mrb[51].mxu1 }
 0x159   :  { %v3483_v21 = vld [vmem:[%s4652_s0 + $0x200] sm:$0xff]  }
 0x15a   :  { %3234 = vmatmul.mubr.bf16.gmra.mrb[156].mxu0 %v3481_v45  ;;  %3350 = vmatmul.mubr.bf16.gmra.mrb[156].mxu1 %v3482_v50  ;;  %v3484_v26 = vld [vmem:[%s4652_s0 + $0x2c4] sm:$0xff]  }
 0x15b   :  { %3237 = vmatprep.mubr.msk.bf16.mxu0 %vm3504_vm0, %v4655_v0  ;;  %3353 = vmatprep.mubr.msk.bf16.mxu1 %vm3504_vm0, %v4655_v0 }
 0x15d   :  { %v4141_v33 = vpop.f32.mrb[52].mxu0  ;;  %v4143_v38 = vpop.f32.mrb[52].mxu1 }
 0x15e   :  { %4719 = vst [vmem:[#allocation10_spill] sm:$0xff] %v4141_v33  ;;  %4720 = vst [vmem:[#allocation11_spill] sm:$0xff] %v4143_v38  ;;  %v2999_v14 = vpop.f32.mrb[53].mxu0  ;;  %v3115_v9 = vpop.f32.mrb[53].mxu1 }
 0x15f   :  { %v4153_v45 = vpop.f32.mrb[54].mxu0  ;;  %v4155_v50 = vpop.f32.mrb[54].mxu1  ;;  %v4723_v9 = vmov 0.0  }
 0x160   :  { %4721 = vst [vmem:[#allocation12_spill] sm:$0xff] %v4153_v45  ;;  %4722 = vst [vmem:[#allocation13_spill] sm:$0xff] %v4155_v50  ;;  %v3000_v2 = vpop.f32.mrb[55].mxu0  ;;  %v3116_v0 = vpop.f32.mrb[55].mxu1 }
 0x161   :  { %v3485_v0 = vld [vmem:[%s4652_s0 + $0x208] sm:$0xff]  }
 0x162   :  { %3238 = vmatmul.mubr.bf16.gmra.mrb[160].mxu0 %v3483_v21  ;;  %3354 = vmatmul.mubr.bf16.gmra.mrb[160].mxu1 %v3484_v26  ;;  %v3486_v2 = vld [vmem:[%s4652_s0 + $0x2cc] sm:$0xff]  }
 0x163   :  { %3241 = vmatprep.mubr.msk.bf16.mxu0 %vm3504_vm0, %v4723_v9  ;;  %3357 = vmatprep.mubr.msk.bf16.mxu1 %vm3504_vm0, %v4723_v9 }
 0x165   :  { %v4163_v14 = vpop.f32.mrb[56].mxu0  ;;  %v4165_v5 = vpop.f32.mrb[56].mxu1 }
 0x166   :  { %4724 = vst [vmem:[#allocation14_spill] sm:$0xff] %v4163_v14  ;;  %4725 = vst [vmem:[#allocation15_spill] sm:$0xff] %v4165_v5  ;;  %v3003_v33 = vpop.f32.mrb[57].mxu0  ;;  %v3119_v23 = vpop.f32.mrb[57].mxu1 }
 0x167   :  { %v4175_v21 = vpop.f32.mrb[58].mxu0  ;;  %v4177_v26 = vpop.f32.mrb[58].mxu1 }
 0x168   :  { %4726 = vst [vmem:[#allocation16_spill] sm:$0xff] %v4175_v21  ;;  %4727 = vst [vmem:[#allocation17_spill] sm:$0xff] %v4177_v26  ;;  %v3004_v50 = vpop.f32.mrb[59].mxu0  ;;  %v3120_v45 = vpop.f32.mrb[59].mxu1 }
 0x169   :  { %v3487_v45 = vld [vmem:[%s4652_s0 + $0x210] sm:$0xff]  }
 0x16a   :  { %3242 = vmatmul.mubr.bf16.gmra.mrb[164].mxu0 %v3485_v0  ;;  %3358 = vmatmul.mubr.bf16.gmra.mrb[164].mxu1 %v3486_v2  ;;  %v3488_v50 = vld [vmem:[%s4652_s0 + $0x2d4] sm:$0xff]  }
 0x16b   :  { %3245 = vmatprep.mubr.msk.bf16.mxu0 %vm3504_vm0, %v4723_v9  ;;  %3361 = vmatprep.mubr.msk.bf16.mxu1 %vm3504_vm0, %v4723_v9 }
 0x16d   :  { %v4185_v23 = vpop.f32.mrb[60].mxu0  ;;  %v4187_v33 = vpop.f32.mrb[60].mxu1 }
 0x16e   :  { %4728 = vst [vmem:[#allocation18_spill] sm:$0xff] %v4185_v23  ;;  %4729 = vst [vmem:[#allocation19_spill] sm:$0xff] %v4187_v33  ;;  %v3007_v5 = vpop.f32.mrb[61].mxu0  ;;  %v3123_v14 = vpop.f32.mrb[61].mxu1 }
 0x16f   :  { %v4197_v0 = vpop.f32.mrb[62].mxu0  ;;  %v4199_v2 = vpop.f32.mrb[62].mxu1 }
 0x170   :  { %4730 = vst [vmem:[#allocation20_spill] sm:$0xff] %v4197_v0  ;;  %4731 = vst [vmem:[#allocation21_spill] sm:$0xff] %v4199_v2  ;;  %v3008_v26 = vpop.f32.mrb[63].mxu0  ;;  %v3124_v21 = vpop.f32.mrb[63].mxu1 }
 0x171   :  { %v3489_v21 = vld [vmem:[%s4652_s0 + $0x218] sm:$0xff]  }
 0x172   :  { %3246 = vmatmul.mubr.bf16.gmra.mrb[168].mxu0 %v3487_v45  ;;  %3362 = vmatmul.mubr.bf16.gmra.mrb[168].mxu1 %v3488_v50  ;;  %v3490_v26 = vld [vmem:[%s4652_s0 + $0x2dc] sm:$0xff]  }
 0x173   :  { %3249 = vmatprep.mubr.msk.bf16.mxu0 %vm3504_vm0, %v4723_v9  ;;  %3365 = vmatprep.mubr.msk.bf16.mxu1 %vm3504_vm0, %v4723_v9 }
 0x175   :  { %v4207_v5 = vpop.f32.mrb[64].mxu0  ;;  %v4209_v14 = vpop.f32.mrb[64].mxu1 }
 0x176   :  { %4732 = vst [vmem:[#allocation22_spill] sm:$0xff] %v4207_v5  ;;  %4733 = vst [vmem:[#allocation23_spill] sm:$0xff] %v4209_v14  ;;  %v3011_v33 = vpop.f32.mrb[65].mxu0  ;;  %v3127_v23 = vpop.f32.mrb[65].mxu1 }
 0x177   :  { %v4219_v45 = vpop.f32.mrb[66].mxu0  ;;  %v4221_v50 = vpop.f32.mrb[66].mxu1 }
 0x178   :  { %4734 = vst [vmem:[#allocation24_spill] sm:$0xff] %v4219_v45  ;;  %4735 = vst [vmem:[#allocation25_spill] sm:$0xff] %v4221_v50  ;;  %v3012_v2 = vpop.f32.mrb[67].mxu0  ;;  %v3128_v0 = vpop.f32.mrb[67].mxu1 }
 0x179   :  { %v3491_v0 = vld [vmem:[%s4652_s0 + $0x220] sm:$0xff]  }
 0x17a   :  { %3250 = vmatmul.mubr.bf16.gmra.mrb[172].mxu0 %v3489_v21  ;;  %3366 = vmatmul.mubr.bf16.gmra.mrb[172].mxu1 %v3490_v26  ;;  %v3492_v2 = vld [vmem:[%s4652_s0 + $0x2e4] sm:$0xff]  }
 0x17b   :  { %3253 = vmatprep.mubr.msk.bf16.mxu0 %vm3504_vm0, %v4723_v9  ;;  %3369 = vmatprep.mubr.msk.bf16.mxu1 %vm3504_vm0, %v4723_v9 }
 0x17d   :  { %v4229_v23 = vpop.f32.mrb[68].mxu0  ;;  %v4231_v33 = vpop.f32.mrb[68].mxu1 }
 0x17e   :  { %4736 = vst [vmem:[#allocation26_spill] sm:$0xff] %v4229_v23  ;;  %4737 = vst [vmem:[#allocation27_spill] sm:$0xff] %v4231_v33  ;;  %v3015_v14 = vpop.f32.mrb[69].mxu0  ;;  %v3131_v5 = vpop.f32.mrb[69].mxu1 }
 0x17f   :  { %v4241_v21 = vpop.f32.mrb[70].mxu0  ;;  %v4243_v26 = vpop.f32.mrb[70].mxu1 }
 0x180   :  { %4738 = vst [vmem:[#allocation28_spill] sm:$0xff] %v4241_v21  ;;  %4739 = vst [vmem:[#allocation29_spill] sm:$0xff] %v4243_v26  ;;  %v3016_v50 = vpop.f32.mrb[71].mxu0  ;;  %v3132_v45 = vpop.f32.mrb[71].mxu1 }
 0x181   :  { %v3493_v45 = vld [vmem:[%s4652_s0 + $0x228] sm:$0xff]  }
 0x182   :  { %3254 = vmatmul.mubr.bf16.gmra.mrb[176].mxu0 %v3491_v0  ;;  %3370 = vmatmul.mubr.bf16.gmra.mrb[176].mxu1 %v3492_v2  ;;  %v3494_v50 = vld [vmem:[%s4652_s0 + $0x2ec] sm:$0xff]  }
 0x183   :  { %3257 = vmatprep.mubr.msk.bf16.mxu0 %vm3504_vm0, %v4723_v9  ;;  %3373 = vmatprep.mubr.msk.bf16.mxu1 %vm3504_vm0, %v4723_v9 }
 0x185   :  { %v4251_v5 = vpop.f32.mrb[72].mxu0  ;;  %v4253_v14 = vpop.f32.mrb[72].mxu1 }
 0x186   :  { %4740 = vst [vmem:[#allocation30_spill] sm:$0xff] %v4251_v5  ;;  %4741 = vst [vmem:[#allocation31_spill] sm:$0xff] %v4253_v14  ;;  %v3019_v33 = vpop.f32.mrb[73].mxu0  ;;  %v3135_v23 = vpop.f32.mrb[73].mxu1 }
 0x187   :  { %v4263_v0 = vpop.f32.mrb[74].mxu0  ;;  %v4265_v2 = vpop.f32.mrb[74].mxu1 }
 0x188   :  { %4742 = vst [vmem:[#allocation32_spill] sm:$0xff] %v4263_v0  ;;  %4743 = vst [vmem:[#allocation33_spill] sm:$0xff] %v4265_v2  ;;  %v3020_v26 = vpop.f32.mrb[75].mxu0  ;;  %v3136_v21 = vpop.f32.mrb[75].mxu1 }
 0x189   :  { %v3495_v21 = vld [vmem:[%s4652_s0 + $0x230] sm:$0xff]  }
 0x18a   :  { %3258 = vmatmul.mubr.bf16.gmra.mrb[180].mxu0 %v3493_v45  ;;  %3374 = vmatmul.mubr.bf16.gmra.mrb[180].mxu1 %v3494_v50  ;;  %v3496_v26 = vld [vmem:[%s4652_s0 + $0x2f4] sm:$0xff]  }
 0x18b   :  { %3261 = vmatprep.mubr.msk.bf16.mxu0 %vm3504_vm0, %v4723_v9  ;;  %3377 = vmatprep.mubr.msk.bf16.mxu1 %vm3504_vm0, %v4723_v9 }
 0x18d   :  { %v4273_v23 = vpop.f32.mrb[76].mxu0  ;;  %v4275_v33 = vpop.f32.mrb[76].mxu1 }
 0x18e   :  { %4744 = vst [vmem:[#allocation34_spill] sm:$0xff] %v4273_v23  ;;  %4745 = vst [vmem:[#allocation35_spill] sm:$0xff] %v4275_v33  ;;  %v3023_v14 = vpop.f32.mrb[77].mxu0  ;;  %v3139_v5 = vpop.f32.mrb[77].mxu1 }
 0x18f   :  { %v4285_v45 = vpop.f32.mrb[78].mxu0  ;;  %v4287_v50 = vpop.f32.mrb[78].mxu1 }
 0x190   :  { %4746 = vst [vmem:[#allocation36_spill] sm:$0xff] %v4285_v45  ;;  %4747 = vst [vmem:[#allocation37_spill] sm:$0xff] %v4287_v50  ;;  %v3024_v2 = vpop.f32.mrb[79].mxu0  ;;  %v3140_v0 = vpop.f32.mrb[79].mxu1 }
 0x191   :  { %v3497_v0 = vld [vmem:[%s4652_s0 + $0x238] sm:$0xff]  }
 0x192   :  { %3262 = vmatmul.mubr.bf16.gmra.mrb[184].mxu0 %v3495_v21  ;;  %3378 = vmatmul.mubr.bf16.gmra.mrb[184].mxu1 %v3496_v26  ;;  %v3498_v2 = vld [vmem:[%s4652_s0 + $0x2fc] sm:$0xff]  }
 0x193   :  { %3265 = vmatprep.mubr.msk.bf16.mxu0 %vm3504_vm0, %v4723_v9  ;;  %3381 = vmatprep.mubr.msk.bf16.mxu1 %vm3504_vm0, %v4723_v9 }
 0x195   :  { %v4295_v5 = vpop.f32.mrb[80].mxu0  ;;  %v4297_v14 = vpop.f32.mrb[80].mxu1 }
 0x196   :  { %4748 = vst [vmem:[#allocation38_spill] sm:$0xff] %v4295_v5  ;;  %4749 = vst [vmem:[#allocation39_spill] sm:$0xff] %v4297_v14  ;;  %v3027_v33 = vpop.f32.mrb[81].mxu0  ;;  %v3143_v23 = vpop.f32.mrb[81].mxu1 }
 0x197   :  { %v4307_v21 = vpop.f32.mrb[82].mxu0  ;;  %v4309_v26 = vpop.f32.mrb[82].mxu1 }
 0x198   :  { %4750 = vst [vmem:[#allocation40_spill] sm:$0xff] %v4307_v21  ;;  %4751 = vst [vmem:[#allocation41_spill] sm:$0xff] %v4309_v26  ;;  %v3028_v50 = vpop.f32.mrb[83].mxu0  ;;  %v3144_v45 = vpop.f32.mrb[83].mxu1 }
 0x199   :  { %v3499_v45 = vld [vmem:[%s4652_s0 + $0x240] sm:$0xff]  }
 0x19a   :  { %3266 = vmatmul.mubr.bf16.gmra.mrb[188].mxu0 %v3497_v0  ;;  %3382 = vmatmul.mubr.bf16.gmra.mrb[188].mxu1 %v3498_v2  ;;  %v3500_v50 = vld [vmem:[%s4652_s0 + $0x304] sm:$0xff]  }
 0x19b   :  { %3269 = vmatprep.mubr.msk.bf16.mxu0 %vm3504_vm0, %v4723_v9  ;;  %3385 = vmatprep.mubr.msk.bf16.mxu1 %vm3504_vm0, %v4723_v9 }
 0x19d   :  { %v4317_v23 = vpop.f32.mrb[84].mxu0  ;;  %v4319_v33 = vpop.f32.mrb[84].mxu1 }
 0x19e   :  { %4752 = vst [vmem:[#allocation42_spill] sm:$0xff] %v4317_v23  ;;  %4753 = vst [vmem:[#allocation43_spill] sm:$0xff] %v4319_v33  ;;  %v3031_v14 = vpop.f32.mrb[85].mxu0  ;;  %v3147_v5 = vpop.f32.mrb[85].mxu1 }
 0x19f   :  { %v4329_v0 = vpop.f32.mrb[86].mxu0  ;;  %v4331_v2 = vpop.f32.mrb[86].mxu1 }
 0x1a0   :  { %4754 = vst [vmem:[#allocation44_spill] sm:$0xff] %v4329_v0  ;;  %4755 = vst [vmem:[#allocation45_spill] sm:$0xff] %v4331_v2  ;;  %v3032_v26 = vpop.f32.mrb[87].mxu0  ;;  %v3148_v21 = vpop.f32.mrb[87].mxu1 }
 0x1a1   :  { %v3501_v21 = vld [vmem:[%s4652_s0 + $0x248] ss:$0 sps:$4 sm:$0xff]   ;;  %v3502_v26 = vld [vmem:[%s4652_s0 + $0x30c] ss:$0 sps:$4 sm:$0xff]  }
 0x1a2   :  { %3270 = vmatmul.mubr.bf16.gmra.mrb[192].mxu0 %v3499_v45  ;;  %3386 = vmatmul.mubr.bf16.gmra.mrb[192].mxu1 %v3500_v50 }
 0x1a3   :  { %3273 = vmatprep.mubr.msk.bf16.mxu0 %vm3504_vm0, %v4723_v9  ;;  %3389 = vmatprep.mubr.msk.bf16.mxu1 %vm3504_vm0, %v4723_v9 }
 0x1a5   :  { %v4339_v5 = vpop.f32.mrb[88].mxu0  ;;  %v4341_v14 = vpop.f32.mrb[88].mxu1 }
 0x1a6   :  { %4756 = vst [vmem:[#allocation46_spill] sm:$0xff] %v4339_v5  ;;  %4757 = vst [vmem:[#allocation47_spill] sm:$0xff] %v4341_v14  ;;  %v3035_v33 = vpop.f32.mrb[89].mxu0  ;;  %v3151_v23 = vpop.f32.mrb[89].mxu1 }
 0x1a7   :  { %v4351_v45 = vpop.f32.mrb[90].mxu0  ;;  %v4353_v9 = vpop.f32.mrb[90].mxu1 }
 0x1a8   :  { %4758 = vst [vmem:[#allocation48_spill] sm:$0xff] %v4351_v45  ;;  %4759 = vst [vmem:[#allocation49_spill] sm:$0xff] %v4353_v9  ;;  %v3036_v51 = vpop.f32.mrb[91].mxu0  ;;  %v3152_v2 = vpop.f32.mrb[91].mxu1 }
 0x1aa   :  { %3274 = vmatmul.mubr.bf16.gmra.mrb[196].mxu0 %v3501_v21  ;;  %3390 = vmatmul.mubr.bf16.gmra.mrb[196].mxu1 %v3502_v26 }
 0x1ad   :  { %v4357_v23 = vpop.f32.mrb[92].mxu0  ;;  %v4359_v33 = vpop.f32.mrb[92].mxu1 }
 0x1ae   :  { %4760 = vst [vmem:[#allocation50_spill] sm:$0xff] %v4357_v23  ;;  %4761 = vst [vmem:[#allocation51_spill] sm:$0xff] %v4359_v33  ;;  %v3039_v14 = vpop.f32.mrb[93].mxu0  ;;  %v3155_v5 = vpop.f32.mrb[93].mxu1 }
 0x1af   :  { %v4363_v0 = vpop.f32.mrb[94].mxu0  ;;  %v4365_v15 = vpop.f32.mrb[94].mxu1 }
 0x1b0   :  { %4762 = vst [vmem:[#allocation52_spill] sm:$0xff] %v4363_v0  ;;  %4763 = vst [vmem:[#allocation53_spill] sm:$0xff] %v4365_v15  ;;  %v3040_v51 = vpop.f32.mrb[95].mxu0  ;;  %v3156_v2 = vpop.f32.mrb[95].mxu1 }
 0x1b1   :  { %v4378_v51 = vld [vmem:[%s4653_s2] ss:$0 sm:$0xff] }
 0x1b5   :  { %v4369_v21 = vpop.f32.mrb[96].mxu0  ;;  %v4371_v26 = vpop.f32.mrb[96].mxu1 }
 0x1b6   :  { %4764 = vst [vmem:[#allocation54_spill] sm:$0xff] %v4369_v21  ;;  %4765 = vst [vmem:[#allocation55_spill] sm:$0xff] %v4371_v26  ;;  %v3043_v45 = vpop.f32.mrb[97].mxu0  ;;  %v3159_v38 = vpop.f32.mrb[97].mxu1 }
 0x1b7   :  { %v505_v14 = vpop.f32.mrb[98].mxu0  ;;  %v935_v5 = vpop.f32.mrb[98].mxu1  ;;  %v4766_v45 = vmax.f32 %v3855_v63, %v3857_v1 }
 0x1b8   :  { %v3044_v33 = vpop.f32.mrb[99].mxu0  ;;  %v3160_v23 = vpop.f32.mrb[99].mxu1 }
 0x1bd   :  { %v1170_v62 = vpop.f32.mrb[100].mxu0  ;;  %v1600_v57 = vpop.f32.mrb[100].mxu1 }
 0x1be   :  { %v1847_v17 = vmax.f32 %v1170_v62, %v1600_v57  ;;  %v3179_v3 = vpop.f32.mrb[101].mxu0  ;;  %v3295_v50 = vpop.f32.mrb[101].mxu1 }
 0x1bf   :  { %v1173_v2 = vpop.f32.mrb[102].mxu0  ;;  %v1603_v15 = vpop.f32.mrb[102].mxu1  ;;  %v4767_v3 = vmax.f32 %v3867_v7, %v3869_v8 }
 0x1c0   :  { %v1896_v38 = vmax.f32 %v4766_v45, %v1847_v17  ;;  %v1848_v14 = vmax.f32 %v1173_v2, %v1603_v15  ;;  %v3180_v5 = vpop.f32.mrb[103].mxu0  ;;  %v3296_v33 = vpop.f32.mrb[103].mxu1  ;;  %v4768_v15 = vmax.f32 %v3877_v12, %v3879_v13 }
 0x1c2   :  { %v1952_v23 = vadd.f32 %v4378_v51, %v1896_v38  ;;  %v1897_v57 = vmax.f32 %v4767_v3, %v1848_v14 }
 0x1c4   :  { %v1953_v62 = vadd.f32 %v4378_v51, %v1897_v57  ;;  %v2001_v26 = vmax.f32 %v1952_v23, 0.0  ;;  %v4770_v57 = vmax.f32 %v3899_v24, %v3901_v25 }
 0x1c5   :  { %v1178_v50 = vpop.f32.mrb[104].mxu0  ;;  %v1608_v9 = vpop.f32.mrb[104].mxu1 }
 0x1c6   :  { %v2002_v21 = vmax.f32 %v1953_v62, 0.0  ;;  %v1849_v0 = vmax.f32 %v1178_v50, %v1608_v9  ;;  %v3183_v47 = vpop.f32.mrb[105].mxu0  ;;  %v3299_v39 = vpop.f32.mrb[105].mxu1 }
 0x1c7   :  { %v1181_v63 = vpop.f32.mrb[106].mxu0  ;;  %v1611_v1 = vpop.f32.mrb[106].mxu1  ;;  %v4769_v47 = vmax.f32 %v3889_v19, %v3891_v20 }
 0x1c8   :  { %v2657_v17 = vpack.c.bf16 %v2002_v21, %v2001_v26  ;;  %v1898_v2 = vmax.f32 %v4768_v15, %v1849_v0  ;;  %v1850_v45 = vmax.f32 %v1181_v63, %v1611_v1  ;;  %v3184_v38 = vpop.f32.mrb[107].mxu0  ;;  %v3300_v7 = vpop.f32.mrb[107].mxu1  ;;  %v4771_v1 = vmax.f32 %v3911_v31, %v3913_v32 }
 0x1ca   :  { %2658 = vst [vmem:[%s4654_s3] sm:$0xff] %v2657_v17   ;;  %v1954_v8 = vadd.f32 %v4378_v51, %v1898_v2  ;;  %v1899_v39 = vmax.f32 %v4769_v47, %v1850_v45 }
 0x1cc   :  { %v1955_v9 = vadd.f32 %v4378_v51, %v1899_v39  ;;  %v2003_v14 = vmax.f32 %v1954_v8, 0.0 }
 0x1cd   :  { %v1186_v21 = vpop.f32.mrb[108].mxu0  ;;  %v1616_v26 = vpop.f32.mrb[108].mxu1 }
 0x1ce   :  { %v2004_v12 = vmax.f32 %v1955_v9, 0.0  ;;  %v1851_v13 = vmax.f32 %v1186_v21, %v1616_v26  ;;  %v3187_v0 = vpop.f32.mrb[109].mxu0  ;;  %v3303_v5 = vpop.f32.mrb[109].mxu1  ;;  %v4772_v21 = vmax.f32 %v3921_v36, %v3923_v37 }
 0x1cf   :  { %v1189_v33 = vpop.f32.mrb[110].mxu0  ;;  %v1619_v23 = vpop.f32.mrb[110].mxu1 }
 0x1d0   :  { %v2662_v3 = vpack.c.bf16 %v2004_v12, %v2003_v14  ;;  %v1900_v62 = vmax.f32 %v4770_v57, %v1851_v13  ;;  %v1852_v50 = vmax.f32 %v1189_v33, %v1619_v23  ;;  %v3188_v63 = vpop.f32.mrb[111].mxu0  ;;  %v3304_v19 = vpop.f32.mrb[111].mxu1  ;;  %v4773_v13 = vmax.f32 %v3933_v43, %v3935_v44 }
 0x1d2   :  { %2774 = vst [vmem:[%s4654_s3 + $0x8] sm:$0xff] %v2662_v3   ;;  %v1956_v20 = vadd.f32 %v4378_v51, %v1900_v62  ;;  %v1901_v17 = vmax.f32 %v4771_v1, %v1852_v50 }
 0x1d4   :  { %v1957_v15 = vadd.f32 %v4378_v51, %v1901_v17  ;;  %v2005_v38 = vmax.f32 %v1956_v20, 0.0  ;;  %v4774_v20 = vmax.f32 %v3943_v48, %v3945_v49 }
 0x1d5   :  { %v1194_v2 = vpop.f32.mrb[112].mxu0  ;;  %v1624_v45 = vpop.f32.mrb[112].mxu1 }
 0x1d6   :  { %v2006_v24 = vmax.f32 %v1957_v15, 0.0  ;;  %v1853_v25 = vmax.f32 %v1194_v2, %v1624_v45  ;;  %v3191_v7 = vpop.f32.mrb[113].mxu0  ;;  %v3307_v8 = vpop.f32.mrb[113].mxu1  ;;  %v4775_v2 = vmax.f32 %v3955_v55, %v3957_v56 }
 0x1d7   :  { %v1197_v47 = vpop.f32.mrb[114].mxu0  ;;  %v1627_v39 = vpop.f32.mrb[114].mxu1 }
 0x1d8   :  { %v2667_v9 = vpack.c.bf16 %v2006_v24, %v2005_v38  ;;  %v1902_v26 = vmax.f32 %v4772_v21, %v1853_v25  ;;  %v1854_v14 = vmax.f32 %v1197_v47, %v1627_v39  ;;  %v3192_v12 = vpop.f32.mrb[115].mxu0  ;;  %v3308_v31 = vpop.f32.mrb[115].mxu1 }
 0x1da   :  { %2775 = vst [vmem:[%s4654_s3 + $0x10] sm:$0xff] %v2667_v9   ;;  %v1958_v32 = vadd.f32 %v4378_v51, %v1902_v26  ;;  %v1903_v0 = vmax.f32 %v4773_v13, %v1854_v14  ;;  %v4776_v26 = vmax.f32 %v3965_v60, %v3967_v61 }
 0x1dc   :  { %v1959_v5 = vadd.f32 %v4378_v51, %v1903_v0  ;;  %v2007_v3 = vmax.f32 %v1958_v32, 0.0  ;;  %v4777_v32 = vmax.f32 %v3977_v10, %v3979_v11 }
 0x1dd   :  { %v1202_v33 = vpop.f32.mrb[116].mxu0  ;;  %v1632_v23 = vpop.f32.mrb[116].mxu1 }
 0x1de   :  { %v2008_v36 = vmax.f32 %v1959_v5, 0.0  ;;  %v1855_v37 = vmax.f32 %v1202_v33, %v1632_v23  ;;  %v3195_v57 = vpop.f32.mrb[117].mxu0  ;;  %v3311_v62 = vpop.f32.mrb[117].mxu1 }
 0x1df   :  { %v1205_v50 = vpop.f32.mrb[118].mxu0  ;;  %v1635_v63 = vpop.f32.mrb[118].mxu1 }
 0x1e0   :  { %v2672_v19 = vpack.c.bf16 %v2008_v36, %v2007_v3  ;;  %v1904_v1 = vmax.f32 %v4774_v20, %v1855_v37  ;;  %v1856_v17 = vmax.f32 %v1205_v50, %v1635_v63  ;;  %v3196_v15 = vpop.f32.mrb[119].mxu0  ;;  %v3312_v43 = vpop.f32.mrb[119].mxu1  ;;  %v4778_v50 = vmax.f32 %v3987_v18, %v3989_v22 }
 0x1e2   :  { %2776 = vst [vmem:[%s4654_s3 + $0x18] sm:$0xff] %v2672_v19   ;;  %v1960_v44 = vadd.f32 %v4378_v51, %v1904_v1  ;;  %v1905_v45 = vmax.f32 %v4775_v2, %v1856_v17  ;;  %v4779_v1 = vmax.f32 %v3999_v34, %v4001_v35 }
 0x1e4   :  { %v1961_v38 = vadd.f32 %v4378_v51, %v1905_v45  ;;  %v2009_v7 = vmax.f32 %v1960_v44, 0.0 }
 0x1e5   :  { %v1210_v24 = vpop.f32.mrb[120].mxu0  ;;  %v1640_v25 = vpop.f32.mrb[120].mxu1 }
 0x1e6   :  { %v2010_v48 = vmax.f32 %v1961_v38, 0.0  ;;  %v1857_v49 = vmax.f32 %v1210_v24, %v1640_v25  ;;  %v3199_v8 = vpop.f32.mrb[121].mxu0  ;;  %v3315_v47 = vpop.f32.mrb[121].mxu1 }
 0x1e7   :  { %v1213_v39 = vpop.f32.mrb[122].mxu0  ;;  %v1643_v9 = vpop.f32.mrb[122].mxu1 }
 0x1e8   :  { %v2677_v21 = vpack.c.bf16 %v2010_v48, %v2009_v7  ;;  %v1906_v14 = vmax.f32 %v4776_v26, %v1857_v49  ;;  %v1858_v12 = vmax.f32 %v1213_v39, %v1643_v9  ;;  %v3200_v31 = vpop.f32.mrb[123].mxu0  ;;  %v3316_v55 = vpop.f32.mrb[123].mxu1  ;;  %v4780_v48 = vmax.f32 %v4009_v42, %v4011_v46 }
 0x1e9   :  { %v4781_v39 = vmax.f32 %v4021_v58, %v4023_v59 }
 0x1ea   :  { %2777 = vst [vmem:[%s4654_s3 + $0x20] sm:$0xff] %v2677_v21   ;;  %v1962_v56 = vadd.f32 %v4378_v51, %v1906_v14  ;;  %v1907_v13 = vmax.f32 %v4777_v32, %v1858_v12 }
 0x1ec   :  { %v1963_v0 = vadd.f32 %v4378_v51, %v1907_v13  ;;  %v2011_v23 = vmax.f32 %v1962_v56, 0.0 }
 0x1ed   :  { %v1218_v5 = vpop.f32.mrb[124].mxu0  ;;  %v1648_v33 = vpop.f32.mrb[124].mxu1 }
 0x1ee   :  { %v2012_v60 = vmax.f32 %v1963_v0, 0.0  ;;  %v1859_v61 = vmax.f32 %v1218_v5, %v1648_v33  ;;  %v3203_v3 = vpop.f32.mrb[125].mxu0  ;;  %v3319_v36 = vpop.f32.mrb[125].mxu1  ;;  %v4782_v0 = vmax.f32 %v4031_v6, %v4033_v16 }
 0x1ef   :  { %v1221_v37 = vpop.f32.mrb[126].mxu0  ;;  %v1651_v57 = vpop.f32.mrb[126].mxu1 }
 0x1f0   :  { %v2682_v62 = vpack.c.bf16 %v2012_v60, %v2011_v23  ;;  %v1908_v63 = vmax.f32 %v4778_v50, %v1859_v61  ;;  %v1860_v19 = vmax.f32 %v1221_v37, %v1651_v57  ;;  %v3204_v20 = vpop.f32.mrb[127].mxu0  ;;  %v3320_v10 = vpop.f32.mrb[127].mxu1  ;;  %v4783_v60 = vmax.f32 %v4043_v40, %v4045_v41 }
 0x1f1   :  { %v4784_v10 = vmax.f32 %v4053_v54, %v4055_v4 }
 0x1f2   :  { %2778 = vst [vmem:[%s4654_s3 + $0x28] sm:$0xff] %v2682_v62   ;;  %v1964_v11 = vadd.f32 %v4378_v51, %v1908_v63  ;;  %v1909_v17 = vmax.f32 %v4779_v1, %v1860_v19 }
 0x1f4   :  { %v1965_v15 = vadd.f32 %v4378_v51, %v1909_v17  ;;  %v2013_v2 = vmax.f32 %v1964_v11, 0.0 }
 0x1f5   :  { %v1226_v43 = vpop.f32.mrb[128].mxu0  ;;  %v1656_v44 = vpop.f32.mrb[128].mxu1 }
 0x1f6   :  { %v2014_v18 = vmax.f32 %v1965_v15, 0.0  ;;  %v1861_v22 = vmax.f32 %v1226_v43, %v1656_v44  ;;  %v3207_v45 = vpop.f32.mrb[129].mxu0  ;;  %v3323_v38 = vpop.f32.mrb[129].mxu1  ;;  %v4785_v15 = vmax.f32 %v4065_v52, %v4067_v53 }
 0x1f7   :  { %v1229_v24 = vpop.f32.mrb[130].mxu0  ;;  %v1659_v25 = vpop.f32.mrb[130].mxu1 }
 0x1f8   :  { %v2687_v7 = vpack.c.bf16 %v2014_v18, %v2013_v2  ;;  %v1910_v49 = vmax.f32 %v4780_v48, %v1861_v22  ;;  %v1862_v8 = vmax.f32 %v1229_v24, %v1659_v25  ;;  %v3208_v47 = vpop.f32.mrb[131].mxu0  ;;  %v3324_v34 = vpop.f32.mrb[131].mxu1  ;;  %v4786_v48 = vmax.f32 %v4075_v27, %v4077_v28 }
 0x1f9   :  { %v4787_v34 = vmax.f32 %v4087_v29, %v4089_v30 }
 0x1fa   :  { %2779 = vst [vmem:[%s4654_s3 + $0x30] sm:$0xff] %v2687_v7   ;;  %v1966_v35 = vadd.f32 %v4378_v51, %v1910_v49  ;;  %v1911_v9 = vmax.f32 %v4781_v39, %v1862_v8 }
 0x1fc   :  { %v1967_v21 = vadd.f32 %v4378_v51, %v1911_v9  ;;  %v2015_v12 = vmax.f32 %v1966_v35, 0.0 }
 0x1fd   :  { %v1234_v26 = vpop.f32.mrb[132].mxu0  ;;  %v1664_v14 = vpop.f32.mrb[132].mxu1 }
 0x1fe   :  { %v2016_v42 = vmax.f32 %v1967_v21, 0.0  ;;  %v1863_v46 = vmax.f32 %v1234_v26, %v1664_v14  ;;  %v3211_v31 = vpop.f32.mrb[133].mxu0  ;;  %v3327_v55 = vpop.f32.mrb[133].mxu1 }
 0x1ff   :  { %v1237_v56 = vpop.f32.mrb[134].mxu0  ;;  %v1667_v32 = vpop.f32.mrb[134].mxu1  ;;  %v4788_v55 = vld [vmem:[#allocation2_spill] sm:$0xff] }
 0x200   :  { %v2692_v13 = vpack.c.bf16 %v2016_v42, %v2015_v12  ;;  %v1912_v5 = vmax.f32 %v4782_v0, %v1863_v46  ;;  %v1864_v33 = vmax.f32 %v1237_v56, %v1667_v32  ;;  %v3212_v23 = vpop.f32.mrb[135].mxu0  ;;  %v3328_v58 = vpop.f32.mrb[135].mxu1  ;;  %v4789_v56 = vld [vmem:[#allocation3_spill] sm:$0xff] }
 0x201   :  { %v4790_v32 = vmax.f32 %v4788_v55, %v4789_v56  ;;  %v4792_v23 = vld [vmem:[#allocation5_spill] sm:$0xff] }
 0x202   :  { %2780 = vst [vmem:[%s4654_s3 + $0x38] sm:$0xff] %v2692_v13   ;;  %v1968_v59 = vadd.f32 %v4378_v51, %v1912_v5  ;;  %v1913_v61 = vmax.f32 %v4783_v60, %v1864_v33  ;;  %v4791_v33 = vld [vmem:[#allocation4_spill] sm:$0xff] }
 0x203   :  { %v4793_v58 = vmax.f32 %v4791_v33, %v4792_v23 }
 0x204   :  { %v1969_v3 = vadd.f32 %v4378_v51, %v1913_v61  ;;  %v2017_v57 = vmax.f32 %v1968_v59, 0.0 }
 0x205   :  { %v1242_v36 = vpop.f32.mrb[136].mxu0  ;;  %v1672_v37 = vpop.f32.mrb[136].mxu1 }
 0x206   :  { %v2018_v6 = vmax.f32 %v1969_v3, 0.0  ;;  %v1865_v16 = vmax.f32 %v1242_v36, %v1672_v37  ;;  %v3215_v62 = vpop.f32.mrb[137].mxu0  ;;  %v3331_v50 = vpop.f32.mrb[137].mxu1 }
 0x207   :  { %v1245_v63 = vpop.f32.mrb[138].mxu0  ;;  %v1675_v19 = vpop.f32.mrb[138].mxu1 }
 0x208   :  { %v2697_v20 = vpack.c.bf16 %v2018_v6, %v2017_v57  ;;  %v1914_v11 = vmax.f32 %v4784_v10, %v1865_v16  ;;  %v1866_v1 = vmax.f32 %v1245_v63, %v1675_v19  ;;  %v3216_v17 = vpop.f32.mrb[139].mxu0  ;;  %v3332_v40 = vpop.f32.mrb[139].mxu1  ;;  %v4794_v19 = vld [vmem:[#allocation6_spill] sm:$0xff] }
 0x20a   :  { %2781 = vst [vmem:[%s4654_s3 + $0x40] sm:$0xff] %v2697_v20   ;;  %v1970_v41 = vadd.f32 %v4378_v51, %v1914_v11  ;;  %v1915_v43 = vmax.f32 %v4785_v15, %v1866_v1  ;;  %v4795_v20 = vld [vmem:[#allocation7_spill] sm:$0xff]  ;;  %v4797_v15 = vld [vmem:[#allocation8_spill] sm:$0xff] }
 0x20b   :  { %v4796_v10 = vmax.f32 %v4794_v19, %v4795_v20 }
 0x20c   :  { %v1971_v44 = vadd.f32 %v4378_v51, %v1915_v43  ;;  %v2019_v22 = vmax.f32 %v1970_v41, 0.0  ;;  %v4798_v43 = vld [vmem:[#allocation9_spill] sm:$0xff] }
 0x20d   :  { %v1250_v2 = vpop.f32.mrb[140].mxu0  ;;  %v1680_v18 = vpop.f32.mrb[140].mxu1 }
 0x20e   :  { %v2020_v54 = vmax.f32 %v1971_v44, 0.0  ;;  %v1867_v4 = vmax.f32 %v1250_v2, %v1680_v18  ;;  %v3219_v45 = vpop.f32.mrb[141].mxu0  ;;  %v3335_v38 = vpop.f32.mrb[141].mxu1  ;;  %v4799_v44 = vmax.f32 %v4797_v15, %v4798_v43 }
 0x20f   :  { %v1253_v24 = vpop.f32.mrb[142].mxu0  ;;  %v1683_v25 = vpop.f32.mrb[142].mxu1 }
 0x210   :  { %v2702_v7 = vpack.c.bf16 %v2020_v54, %v2019_v22  ;;  %v1916_v49 = vmax.f32 %v4786_v48, %v1867_v4  ;;  %v1868_v8 = vmax.f32 %v1253_v24, %v1683_v25  ;;  %v3220_v47 = vpop.f32.mrb[143].mxu0  ;;  %v3336_v52 = vpop.f32.mrb[143].mxu1 }
 0x211   :  { %v4801_v47 = vld [vmem:[#allocation11_spill] sm:$0xff] }
 0x212   :  { %2782 = vst [vmem:[%s4654_s3 + $0x48] sm:$0xff] %v2702_v7   ;;  %v1972_v53 = vadd.f32 %v4378_v51, %v1916_v49  ;;  %v1917_v35 = vmax.f32 %v4787_v34, %v1868_v8  ;;  %v4800_v8 = vld [vmem:[#allocation10_spill] sm:$0xff] }
 0x213   :  { %v4802_v52 = vmax.f32 %v4800_v8, %v4801_v47 }
 0x214   :  { %v1973_v39 = vadd.f32 %v4378_v51, %v1917_v35  ;;  %v2021_v26 = vmax.f32 %v1972_v53, 0.0 }
 0x215   :  { %v1258_v9 = vpop.f32.mrb[144].mxu0  ;;  %v1688_v21 = vpop.f32.mrb[144].mxu1 }
 0x216   :  { %v2022_v27 = vmax.f32 %v1973_v39, 0.0  ;;  %v1869_v28 = vmax.f32 %v1258_v9, %v1688_v21  ;;  %v3223_v14 = vpop.f32.mrb[145].mxu0  ;;  %v3339_v12 = vpop.f32.mrb[145].mxu1  ;;  %v4803_v21 = vld [vmem:[#allocation12_spill] sm:$0xff] }
 0x217   :  { %v1261_v42 = vpop.f32.mrb[146].mxu0  ;;  %v1691_v46 = vpop.f32.mrb[146].mxu1 }
 0x218   :  { %v2707_v31 = vpack.c.bf16 %v2022_v27, %v2021_v26  ;;  %v1918_v13 = vmax.f32 %v4790_v32, %v1869_v28  ;;  %v1870_v0 = vmax.f32 %v1261_v42, %v1691_v46  ;;  %v3224_v5 = vpop.f32.mrb[147].mxu0  ;;  %v3340_v29 = vpop.f32.mrb[147].mxu1  ;;  %v4804_v26 = vld [vmem:[#allocation13_spill] sm:$0xff] }
 0x219   :  { %v4805_v27 = vmax.f32 %v4803_v21, %v4804_v26  ;;  %v4806_v29 = vld [vmem:[#allocation14_spill] sm:$0xff] }
 0x21a   :  { %2783 = vst [vmem:[%s4654_s3 + $0x50] sm:$0xff] %v2707_v31   ;;  %v1974_v30 = vadd.f32 %v4378_v51, %v1918_v13  ;;  %v1919_v59 = vmax.f32 %v4793_v58, %v1870_v0 }
 0x21c   :  { %v1975_v60 = vadd.f32 %v4378_v51, %v1919_v59  ;;  %v2023_v36 = vmax.f32 %v1974_v30, 0.0  ;;  %v4807_v30 = vld [vmem:[#allocation15_spill] sm:$0xff] }
 0x21d   :  { %v1266_v61 = vpop.f32.mrb[148].mxu0  ;;  %v1696_v3 = vpop.f32.mrb[148].mxu1  ;;  %v4808_v33 = vmax.f32 %v4806_v29, %v4807_v30 }
 0x21e   :  { %v2024_v37 = vmax.f32 %v1975_v60, 0.0  ;;  %v1871_v57 = vmax.f32 %v1266_v61, %v1696_v3  ;;  %v3227_v6 = vpop.f32.mrb[149].mxu0  ;;  %v3343_v16 = vpop.f32.mrb[149].mxu1  ;;  %v4809_v3 = vld [vmem:[#allocation16_spill] sm:$0xff] }
 0x21f   :  { %v1269_v62 = vpop.f32.mrb[150].mxu0  ;;  %v1699_v50 = vpop.f32.mrb[150].mxu1 }
 0x220   :  { %v2712_v63 = vpack.c.bf16 %v2024_v37, %v2023_v36  ;;  %v1920_v11 = vmax.f32 %v4796_v10, %v1871_v57  ;;  %v1872_v1 = vmax.f32 %v1269_v62, %v1699_v50  ;;  %v3228_v17 = vpop.f32.mrb[151].mxu0  ;;  %v3344_v40 = vpop.f32.mrb[151].mxu1  ;;  %v4810_v36 = vld [vmem:[#allocation17_spill] sm:$0xff] }
 0x221   :  { %v4811_v37 = vmax.f32 %v4809_v3, %v4810_v36  ;;  %v4812_v40 = vld [vmem:[#allocation18_spill] sm:$0xff] }
 0x222   :  { %2784 = vst [vmem:[%s4654_s3 + $0x58] sm:$0xff] %v2712_v63   ;;  %v1976_v41 = vadd.f32 %v4378_v51, %v1920_v11  ;;  %v1921_v2 = vmax.f32 %v4799_v44, %v1872_v1 }
 0x224   :  { %v1977_v18 = vadd.f32 %v4378_v51, %v1921_v2  ;;  %v2025_v4 = vmax.f32 %v1976_v41, 0.0  ;;  %v4813_v41 = vld [vmem:[#allocation19_spill] sm:$0xff] }
 0x225   :  { %v1274_v22 = vpop.f32.mrb[152].mxu0  ;;  %v1704_v54 = vpop.f32.mrb[152].mxu1  ;;  %v4814_v15 = vmax.f32 %v4812_v40, %v4813_v41 }
 0x226   :  { %v2026_v45 = vmax.f32 %v1977_v18, 0.0  ;;  %v1873_v38 = vmax.f32 %v1274_v22, %v1704_v54  ;;  %v3231_v24 = vpop.f32.mrb[153].mxu0  ;;  %v3347_v25 = vpop.f32.mrb[153].mxu1  ;;  %v4815_v54 = vld [vmem:[#allocation20_spill] sm:$0xff] }
 0x227   :  { %v1277_v7 = vpop.f32.mrb[154].mxu0  ;;  %v1707_v48 = vpop.f32.mrb[154].mxu1 }
 0x228   :  { %v2717_v49 = vpack.c.bf16 %v2026_v45, %v2025_v4  ;;  %v1922_v53 = vmax.f32 %v4802_v52, %v1873_v38  ;;  %v1874_v34 = vmax.f32 %v1277_v7, %v1707_v48  ;;  %v3232_v35 = vpop.f32.mrb[155].mxu0  ;;  %v3348_v39 = vpop.f32.mrb[155].mxu1  ;;  %v4816_v4 = vld [vmem:[#allocation21_spill] sm:$0xff] }
 0x229   :  { %v4817_v45 = vmax.f32 %v4815_v54, %v4816_v4  ;;  %v4818_v39 = vld [vmem:[#allocation22_spill] sm:$0xff] }
 0x22a   :  { %2785 = vst [vmem:[%s4654_s3 + $0x60] sm:$0xff] %v2717_v49   ;;  %v1978_v9 = vadd.f32 %v4378_v51, %v1922_v53  ;;  %v1923_v28 = vmax.f32 %v4805_v27, %v1874_v34 }
 0x22c   :  { %v1979_v14 = vadd.f32 %v4378_v51, %v1923_v28  ;;  %v2027_v46 = vmax.f32 %v1978_v9, 0.0  ;;  %v4819_v9 = vld [vmem:[#allocation23_spill] sm:$0xff] }
 0x22d   :  { %v1282_v12 = vpop.f32.mrb[156].mxu0  ;;  %v1712_v42 = vpop.f32.mrb[156].mxu1  ;;  %v4820_v21 = vmax.f32 %v4818_v39, %v4819_v9 }
 0x22e   :  { %v2028_v31 = vmax.f32 %v1979_v14, 0.0  ;;  %v1875_v55 = vmax.f32 %v1282_v12, %v1712_v42  ;;  %v3235_v56 = vpop.f32.mrb[157].mxu0  ;;  %v3351_v32 = vpop.f32.mrb[157].mxu1  ;;  %v4821_v42 = vld [vmem:[#allocation24_spill] sm:$0xff] }
 0x22f   :  { %v1285_v13 = vpop.f32.mrb[158].mxu0  ;;  %v1715_v0 = vpop.f32.mrb[158].mxu1 }
 0x230   :  { %v2722_v5 = vpack.c.bf16 %v2028_v31, %v2027_v46  ;;  %v1924_v23 = vmax.f32 %v4808_v33, %v1875_v55  ;;  %v1876_v58 = vmax.f32 %v1285_v13, %v1715_v0  ;;  %v3236_v59 = vpop.f32.mrb[159].mxu0  ;;  %v3352_v60 = vpop.f32.mrb[159].mxu1  ;;  %v4822_v46 = vld [vmem:[#allocation25_spill] sm:$0xff] }
 0x231   :  { %v4823_v31 = vmax.f32 %v4821_v42, %v4822_v46  ;;  %v4824_v60 = vld [vmem:[#allocation26_spill] sm:$0xff] }
 0x232   :  { %2786 = vst [vmem:[%s4654_s3 + $0x68] sm:$0xff] %v2722_v5   ;;  %v1980_v61 = vadd.f32 %v4378_v51, %v1924_v23  ;;  %v1925_v57 = vmax.f32 %v4811_v37, %v1876_v58 }
 0x234   :  { %v1981_v6 = vadd.f32 %v4378_v51, %v1925_v57  ;;  %v2029_v50 = vmax.f32 %v1980_v61, 0.0  ;;  %v4825_v61 = vld [vmem:[#allocation27_spill] sm:$0xff] }
 0x235   :  { %v1290_v16 = vpop.f32.mrb[160].mxu0  ;;  %v1720_v62 = vpop.f32.mrb[160].mxu1  ;;  %v4826_v3 = vmax.f32 %v4824_v60, %v4825_v61 }
 0x236   :  { %v2030_v63 = vmax.f32 %v1981_v6, 0.0  ;;  %v1877_v19 = vmax.f32 %v1290_v16, %v1720_v62  ;;  %v3239_v20 = vpop.f32.mrb[161].mxu0  ;;  %v3355_v10 = vpop.f32.mrb[161].mxu1  ;;  %v4827_v62 = vld [vmem:[#allocation28_spill] sm:$0xff] }
 0x237   :  { %v1293_v11 = vpop.f32.mrb[162].mxu0  ;;  %v1723_v1 = vpop.f32.mrb[162].mxu1 }
 0x238   :  { %v2727_v17 = vpack.c.bf16 %v2030_v63, %v2029_v50  ;;  %v1926_v43 = vmax.f32 %v4814_v15, %v1877_v19  ;;  %v1878_v44 = vmax.f32 %v1293_v11, %v1723_v1  ;;  %v3240_v2 = vpop.f32.mrb[163].mxu0  ;;  %v3356_v18 = vpop.f32.mrb[163].mxu1  ;;  %v4828_v50 = vld [vmem:[#allocation29_spill] sm:$0xff] }
 0x239   :  { %v4829_v63 = vmax.f32 %v4827_v62, %v4828_v50  ;;  %v4830_v18 = vld [vmem:[#allocation30_spill] sm:$0xff] }
 0x23a   :  { %2787 = vst [vmem:[%s4654_s3 + $0x70] sm:$0xff] %v2727_v17   ;;  %v1982_v22 = vadd.f32 %v4378_v51, %v1926_v43  ;;  %v1927_v38 = vmax.f32 %v4817_v45, %v1878_v44 }
 0x23c   :  { %v1983_v24 = vadd.f32 %v4378_v51, %v1927_v38  ;;  %v2031_v48 = vmax.f32 %v1982_v22, 0.0  ;;  %v4831_v22 = vld [vmem:[#allocation31_spill] sm:$0xff] }
 0x23d   :  { %v1298_v25 = vpop.f32.mrb[164].mxu0  ;;  %v1728_v7 = vpop.f32.mrb[164].mxu1  ;;  %v4832_v54 = vmax.f32 %v4830_v18, %v4831_v22 }
 0x23e   :  { %v2032_v49 = vmax.f32 %v1983_v24, 0.0  ;;  %v1879_v8 = vmax.f32 %v1298_v25, %v1728_v7  ;;  %v3243_v47 = vpop.f32.mrb[165].mxu0  ;;  %v3359_v52 = vpop.f32.mrb[165].mxu1  ;;  %v4833_v7 = vld [vmem:[#allocation32_spill] sm:$0xff] }
 0x23f   :  { %v1301_v53 = vpop.f32.mrb[166].mxu0  ;;  %v1731_v34 = vpop.f32.mrb[166].mxu1 }
 0x240   :  { %v2732_v35 = vpack.c.bf16 %v2032_v49, %v2031_v48  ;;  %v1928_v26 = vmax.f32 %v4820_v21, %v1879_v8  ;;  %v1880_v27 = vmax.f32 %v1301_v53, %v1731_v34  ;;  %v3244_v28 = vpop.f32.mrb[167].mxu0  ;;  %v3360_v14 = vpop.f32.mrb[167].mxu1  ;;  %v4834_v48 = vld [vmem:[#allocation33_spill] sm:$0xff] }
 0x241   :  { %v4835_v49 = vmax.f32 %v4833_v7, %v4834_v48  ;;  %v4836_v14 = vld [vmem:[#allocation34_spill] sm:$0xff] }
 0x242   :  { %2788 = vst [vmem:[%s4654_s3 + $0x78] sm:$0xff] %v2732_v35   ;;  %v1984_v12 = vadd.f32 %v4378_v51, %v1928_v26  ;;  %v1929_v55 = vmax.f32 %v4823_v31, %v1880_v27 }
 0x244   :  { %v1985_v56 = vadd.f32 %v4378_v51, %v1929_v55  ;;  %v2033_v0 = vmax.f32 %v1984_v12, 0.0  ;;  %v4837_v12 = vld [vmem:[#allocation35_spill] sm:$0xff] }
 0x245   :  { %v1306_v32 = vpop.f32.mrb[168].mxu0  ;;  %v1736_v13 = vpop.f32.mrb[168].mxu1  ;;  %v4838_v42 = vmax.f32 %v4836_v14, %v4837_v12 }
 0x246   :  { %v2034_v5 = vmax.f32 %v1985_v56, 0.0  ;;  %v1881_v29 = vmax.f32 %v1306_v32, %v1736_v13  ;;  %v3247_v30 = vpop.f32.mrb[169].mxu0  ;;  %v3363_v33 = vpop.f32.mrb[169].mxu1  ;;  %v4839_v13 = vld [vmem:[#allocation36_spill] sm:$0xff] }
 0x247   :  { %v1309_v23 = vpop.f32.mrb[170].mxu0  ;;  %v1739_v58 = vpop.f32.mrb[170].mxu1 }
 0x248   :  { %v2737_v59 = vpack.c.bf16 %v2034_v5, %v2033_v0  ;;  %v1930_v36 = vmax.f32 %v4826_v3, %v1881_v29  ;;  %v1882_v37 = vmax.f32 %v1309_v23, %v1739_v58  ;;  %v3248_v57 = vpop.f32.mrb[171].mxu0  ;;  %v3364_v6 = vpop.f32.mrb[171].mxu1  ;;  %v4840_v0 = vld [vmem:[#allocation37_spill] sm:$0xff] }
 0x249   :  { %v4841_v5 = vmax.f32 %v4839_v13, %v4840_v0  ;;  %v4842_v6 = vld [vmem:[#allocation38_spill] sm:$0xff] }
 0x24a   :  { %2789 = vst [vmem:[%s4654_s3 + $0x80] sm:$0xff] %v2737_v59   ;;  %v1986_v16 = vadd.f32 %v4378_v51, %v1930_v36  ;;  %v1931_v19 = vmax.f32 %v4829_v63, %v1882_v37 }
 0x24c   :  { %v1987_v20 = vadd.f32 %v4378_v51, %v1931_v19  ;;  %v2035_v1 = vmax.f32 %v1986_v16, 0.0  ;;  %v4843_v16 = vld [vmem:[#allocation39_spill] sm:$0xff] }
 0x24d   :  { %v1314_v10 = vpop.f32.mrb[172].mxu0  ;;  %v1744_v11 = vpop.f32.mrb[172].mxu1  ;;  %v4844_v62 = vmax.f32 %v4842_v6, %v4843_v16 }
 0x24e   :  { %v2036_v17 = vmax.f32 %v1987_v20, 0.0  ;;  %v1883_v40 = vmax.f32 %v1314_v10, %v1744_v11  ;;  %v3251_v41 = vpop.f32.mrb[173].mxu0  ;;  %v3367_v15 = vpop.f32.mrb[173].mxu1  ;;  %v4845_v11 = vld [vmem:[#allocation40_spill] sm:$0xff] }
 0x24f   :  { %v1317_v43 = vpop.f32.mrb[174].mxu0  ;;  %v1747_v44 = vpop.f32.mrb[174].mxu1 }
 0x250   :  { %v2742_v2 = vpack.c.bf16 %v2036_v17, %v2035_v1  ;;  %v1932_v4 = vmax.f32 %v4832_v54, %v1883_v40  ;;  %v1884_v45 = vmax.f32 %v1317_v43, %v1747_v44  ;;  %v3252_v38 = vpop.f32.mrb[175].mxu0  ;;  %v3368_v24 = vpop.f32.mrb[175].mxu1  ;;  %v4846_v1 = vld [vmem:[#allocation41_spill] sm:$0xff] }
 0x251   :  { %v4847_v17 = vmax.f32 %v4845_v11, %v4846_v1  ;;  %v4848_v24 = vld [vmem:[#allocation42_spill] sm:$0xff] }
 0x252   :  { %2790 = vst [vmem:[%s4654_s3 + $0x88] sm:$0xff] %v2742_v2   ;;  %v1988_v25 = vadd.f32 %v4378_v51, %v1932_v4  ;;  %v1933_v8 = vmax.f32 %v4835_v49, %v1884_v45 }
 0x254   :  { %v1989_v47 = vadd.f32 %v4378_v51, %v1933_v8  ;;  %v2037_v34 = vmax.f32 %v1988_v25, 0.0  ;;  %v4849_v25 = vld [vmem:[#allocation43_spill] sm:$0xff] }
 0x255   :  { %v1322_v52 = vpop.f32.mrb[176].mxu0  ;;  %v1752_v53 = vpop.f32.mrb[176].mxu1  ;;  %v4850_v7 = vmax.f32 %v4848_v24, %v4849_v25 }
 0x256   :  { %v2038_v35 = vmax.f32 %v1989_v47, 0.0  ;;  %v1885_v39 = vmax.f32 %v1322_v52, %v1752_v53  ;;  %v3255_v9 = vpop.f32.mrb[177].mxu0  ;;  %v3371_v21 = vpop.f32.mrb[177].mxu1  ;;  %v4851_v53 = vld [vmem:[#allocation44_spill] sm:$0xff] }
 0x257   :  { %v1325_v26 = vpop.f32.mrb[178].mxu0  ;;  %v1755_v27 = vpop.f32.mrb[178].mxu1 }
 0x258   :  { %v2747_v28 = vpack.c.bf16 %v2038_v35, %v2037_v34  ;;  %v1934_v46 = vmax.f32 %v4838_v42, %v1885_v39  ;;  %v1886_v31 = vmax.f32 %v1325_v26, %v1755_v27  ;;  %v3256_v55 = vpop.f32.mrb[179].mxu0  ;;  %v3372_v56 = vpop.f32.mrb[179].mxu1  ;;  %v4852_v34 = vld [vmem:[#allocation45_spill] sm:$0xff] }
 0x259   :  { %v4853_v35 = vmax.f32 %v4851_v53, %v4852_v34  ;;  %v4854_v56 = vld [vmem:[#allocation46_spill] sm:$0xff] }
 0x25a   :  { %2791 = vst [vmem:[%s4654_s3 + $0x90] sm:$0xff] %v2747_v28   ;;  %v1990_v32 = vadd.f32 %v4378_v51, %v1934_v46  ;;  %v1935_v29 = vmax.f32 %v4841_v5, %v1886_v31 }
 0x25c   :  { %v1991_v30 = vadd.f32 %v4378_v51, %v1935_v29  ;;  %v2039_v58 = vmax.f32 %v1990_v32, 0.0  ;;  %v4855_v32 = vld [vmem:[#allocation47_spill] sm:$0xff] }
 0x25d   :  { %v1330_v33 = vpop.f32.mrb[180].mxu0  ;;  %v1760_v23 = vpop.f32.mrb[180].mxu1  ;;  %v4856_v13 = vmax.f32 %v4854_v56, %v4855_v32 }
 0x25e   :  { %v2040_v59 = vmax.f32 %v1991_v30, 0.0  ;;  %v1887_v60 = vmax.f32 %v1330_v33, %v1760_v23  ;;  %v3259_v61 = vpop.f32.mrb[181].mxu0  ;;  %v3375_v3 = vpop.f32.mrb[181].mxu1  ;;  %v4857_v23 = vld [vmem:[#allocation48_spill] sm:$0xff] }
 0x25f   :  { %v1333_v36 = vpop.f32.mrb[182].mxu0  ;;  %v1763_v37 = vpop.f32.mrb[182].mxu1 }
 0x260   :  { %v2752_v57 = vpack.c.bf16 %v2040_v59, %v2039_v58  ;;  %v1936_v50 = vmax.f32 %v4844_v62, %v1887_v60  ;;  %v1888_v63 = vmax.f32 %v1333_v36, %v1763_v37  ;;  %v3260_v19 = vpop.f32.mrb[183].mxu0  ;;  %v3376_v20 = vpop.f32.mrb[183].mxu1  ;;  %v4858_v58 = vld [vmem:[#allocation49_spill] sm:$0xff] }
 0x261   :  { %v4859_v59 = vmax.f32 %v4857_v23, %v4858_v58  ;;  %v4860_v20 = vld [vmem:[#allocation50_spill] sm:$0xff] }
 0x262   :  { %2792 = vst [vmem:[%s4654_s3 + $0x98] sm:$0xff] %v2752_v57   ;;  %v1992_v10 = vadd.f32 %v4378_v51, %v1936_v50  ;;  %v1937_v40 = vmax.f32 %v4847_v17, %v1888_v63 }
 0x264   :  { %v1993_v41 = vadd.f32 %v4378_v51, %v1937_v40  ;;  %v2041_v44 = vmax.f32 %v1992_v10, 0.0  ;;  %v4861_v10 = vld [vmem:[#allocation51_spill] sm:$0xff] }
 0x265   :  { %v1338_v15 = vpop.f32.mrb[184].mxu0  ;;  %v1768_v43 = vpop.f32.mrb[184].mxu1  ;;  %v4862_v11 = vmax.f32 %v4860_v20, %v4861_v10 }
 0x266   :  { %v2042_v2 = vmax.f32 %v1993_v41, 0.0  ;;  %v1889_v18 = vmax.f32 %v1338_v15, %v1768_v43  ;;  %v3263_v22 = vpop.f32.mrb[185].mxu0  ;;  %v3379_v54 = vpop.f32.mrb[185].mxu1  ;;  %v4863_v43 = vld [vmem:[#allocation52_spill] sm:$0xff] }
 0x267   :  { %v1341_v4 = vpop.f32.mrb[186].mxu0  ;;  %v1771_v45 = vpop.f32.mrb[186].mxu1 }
 0x268   :  { %v2757_v38 = vpack.c.bf16 %v2042_v2, %v2041_v44  ;;  %v1938_v48 = vmax.f32 %v4850_v7, %v1889_v18  ;;  %v1890_v49 = vmax.f32 %v1341_v4, %v1771_v45  ;;  %v3264_v8 = vpop.f32.mrb[187].mxu0  ;;  %v3380_v47 = vpop.f32.mrb[187].mxu1  ;;  %v4864_v44 = vld [vmem:[#allocation53_spill] sm:$0xff] }
 0x269   :  { %v4865_v2 = vmax.f32 %v4863_v43, %v4864_v44  ;;  %v4866_v47 = vld [vmem:[#allocation54_spill] sm:$0xff] }
 0x26a   :  { %2793 = vst [vmem:[%s4654_s3 + $0xa0] sm:$0xff] %v2757_v38   ;;  %v1994_v52 = vadd.f32 %v4378_v51, %v1938_v48  ;;  %v1939_v39 = vmax.f32 %v4853_v35, %v1890_v49 }
 0x26c   :  { %v1995_v9 = vadd.f32 %v4378_v51, %v1939_v39  ;;  %v2043_v27 = vmax.f32 %v1994_v52, 0.0  ;;  %v4867_v52 = vld [vmem:[#allocation55_spill] sm:$0xff] }
 0x26d   :  { %v1346_v21 = vpop.f32.mrb[188].mxu0  ;;  %v1776_v26 = vpop.f32.mrb[188].mxu1  ;;  %v4868_v53 = vmax.f32 %v4866_v47, %v4867_v52 }
 0x26e   :  { %v2044_v28 = vmax.f32 %v1995_v9, 0.0  ;;  %v1891_v14 = vmax.f32 %v1346_v21, %v1776_v26  ;;  %v3267_v12 = vpop.f32.mrb[189].mxu0  ;;  %v3383_v42 = vpop.f32.mrb[189].mxu1 }
 0x26f   :  { %v1349_v46 = vpop.f32.mrb[190].mxu0  ;;  %v1779_v31 = vpop.f32.mrb[190].mxu1 }
 0x270   :  { %v2762_v55 = vpack.c.bf16 %v2044_v28, %v2043_v27  ;;  %v1940_v0 = vmax.f32 %v4856_v13, %v1891_v14  ;;  %v1892_v5 = vmax.f32 %v1349_v46, %v1779_v31  ;;  %v3268_v29 = vpop.f32.mrb[191].mxu0  ;;  %v3384_v30 = vpop.f32.mrb[191].mxu1 }
 0x272   :  { %2794 = vst [vmem:[%s4654_s3 + $0xa8] sm:$0xff] %v2762_v55   ;;  %v1996_v33 = vadd.f32 %v4378_v51, %v1940_v0  ;;  %v1941_v60 = vmax.f32 %v4859_v59, %v1892_v5 }
 0x274   :  { %v1997_v61 = vadd.f32 %v4378_v51, %v1941_v60  ;;  %v2045_v37 = vmax.f32 %v1996_v33, 0.0 }
 0x275   :  { %v1354_v3 = vpop.f32.mrb[192].mxu0  ;;  %v1784_v36 = vpop.f32.mrb[192].mxu1 }
 0x276   :  { %v2046_v57 = vmax.f32 %v1997_v61, 0.0  ;;  %v1893_v6 = vmax.f32 %v1354_v3, %v1784_v36  ;;  %v3271_v16 = vpop.f32.mrb[193].mxu0  ;;  %v3387_v62 = vpop.f32.mrb[193].mxu1 }
 0x277   :  { %v1357_v50 = vpop.f32.mrb[194].mxu0  ;;  %v1787_v63 = vpop.f32.mrb[194].mxu1 }
 0x278   :  { %v2767_v19 = vpack.c.bf16 %v2046_v57, %v2045_v37  ;;  %v1942_v1 = vmax.f32 %v4862_v11, %v1893_v6  ;;  %v1894_v17 = vmax.f32 %v1357_v50, %v1787_v63  ;;  %v3272_v40 = vpop.f32.mrb[195].mxu0  ;;  %v3388_v41 = vpop.f32.mrb[195].mxu1 }
 0x27a   :  { %2795 = vst [vmem:[%s4654_s3 + $0xb0] sm:$0xff] %v2767_v19   ;;  %v1998_v15 = vadd.f32 %v4378_v51, %v1942_v1  ;;  %v1943_v18 = vmax.f32 %v4865_v2, %v1894_v17 }
 0x27c   :  { %v1999_v22 = vadd.f32 %v4378_v51, %v1943_v18  ;;  %v2047_v45 = vmax.f32 %v1998_v15, 0.0 }
 0x27d   :  { %v1362_v54 = vpop.f32.mrb[196].mxu0  ;;  %v1792_v4 = vpop.f32.mrb[196].mxu1 }
 0x27e   :  { %v2048_v38 = vmax.f32 %v1999_v22, 0.0  ;;  %v1895_v24 = vmax.f32 %v1362_v54, %v1792_v4  ;;  %v3275_v25 = vpop.f32.mrb[197].mxu0  ;;  %v3391_v7 = vpop.f32.mrb[197].mxu1 }
 0x27f   :  { %v1365_v48 = vpop.f32.mrb[198].mxu0  ;;  %v1795_v49 = vpop.f32.mrb[198].mxu1 }
 0x280   :  { %v2772_v8 = vpack.c.bf16 %v2048_v38, %v2047_v45  ;;  %v1944_v34 = vmax.f32 %v4868_v53, %v1895_v24  ;;  %v3276_v35 = vpop.f32.mrb[199].mxu0  ;;  %v3392_v39 = vpop.f32.mrb[199].mxu1 }
 0x282   :  { %2796 = vst [vmem:[%s4654_s3 + $0xb8] sm:$0xff] %v2772_v8   ;;  %v2000_v9 = vadd.f32 %v4378_v51, %v1944_v34 }
 0x284   :  { %v2049_v21 = vmax.f32 %v2000_v9, 0.0 }
 0x286   :  { %v2653_v26 = vpack.c.bf16 %v2049_v21, %v2049_v21 }
 0x288   :  { %2295 = vst [vmem:[%s4654_s3 + $0xc0] sm:$0xf] %v2653_v26 }

// kernel: net_forward.4
= control target key start
LH: loop header
LB: loop body
LE: loop exit
PB: predicated region body
PF: predicated region fallthrough
CT: control target
= control target key end

     0   :  { %s1274_s1 = inlined_call_operand.vmem [shape: bf16[256,128], index: 1, kind: input, shape index: {}]   ;;  %s1275_s0 = inlined_call_operand.vmem [shape: bf16[4,50,256], index: 0, kind: input, shape index: {}]   ;;  %s1276_s2 = inlined_call_operand.vmem [shape: f32[1,128], index: 2, kind: input, shape index: {}]   ;;  %s1277_s3 = inlined_call_operand.vmem [shape: bf16[50,128], index: 3, kind: output, shape index: {}]  }
   0x1   :  { %v921_v0 = vld [vmem:[%s1274_s1 + $0x40] sm:$0xff]   ;;  %v923_v2 = vld [vmem:[%s1274_s1 + $0x48] sm:$0xff]   ;;  %v925_v4 = vld [vmem:[%s1274_s1 + $0x50] sm:$0xff]  }
   0x2   :  { %v922_v1 = vld [vmem:[%s1274_s1] sm:$0xff]   ;;  %761 = vmatprep.subr.bf16.mxu0 %v921_v0  ;;  %801 = vmatprep.subr.bf16.mxu1 %v921_v0  ;;  %v924_v3 = vld [vmem:[%s1274_s1 + $0x8] sm:$0xff]   ;;  %v1019_v5 = vld [vmem:[%s1274_s1 + $0x10] sm:$0xff]  }
   0x3   :  { %762 = vmatpush3.bf16.msra.mxu0 %v922_v1  ;;  %802 = vmatpush3.bf16.msra.mxu1 %v922_v1  ;;  %v1024_v6 = vld [vmem:[%s1274_s1 + $0x58] sm:$0xff]   ;;  %v1038_v8 = vld [vmem:[%s1274_s1 + $0x60] sm:$0xff]   ;;  %v1052_v10 = vld [vmem:[%s1274_s1 + $0x68] sm:$0xff]  }
   0x4   :  { %763 = vmatprep.subr.bf16.mxu0 %v923_v2  ;;  %803 = vmatprep.subr.bf16.mxu1 %v923_v2  ;;  %v1031_v7 = vld [vmem:[%s1274_s1 + $0x18] sm:$0xff]   ;;  %v1045_v9 = vld [vmem:[%s1274_s1 + $0x20] sm:$0xff]   ;;  %v1065_v13 = vld [vmem:[%s1274_s1 + $0x28] sm:$0xff]  }
   0x5   :  { %v939_v11 = vld [vmem:[%s1275_s0 + $0x4] ss:$8 sps:$4 sm:$0xff]   ;;  %v1072_v14 = vld [vmem:[%s1274_s1 + $0x70] sm:$0xff]   ;;  %v1086_v16 = vld [vmem:[%s1274_s1 + $0x78] sm:$0xff]  }
   0x6   :  { %v942_v12 = vld [vmem:[%s1275_s0 + $0x3c] ss:$8 sps:$4 sm:$0xff]   ;;  %219 = vmatprep.mubr.bf16.mxu0 %v939_v11  ;;  %v1079_v15 = vld [vmem:[%s1274_s1 + $0x30] sm:$0xff]   ;;  %v937_v18 = vld [vmem:[%s1275_s0] ss:$8 sps:$4 sm:$0xff]  }
   0x7   :  { %764 = vmatpush3.bf16.msra.mxu0 %v924_v3  ;;  %804 = vmatpush3.bf16.msra.mxu1 %v924_v3  ;;  %v1093_v17 = vld [vmem:[%s1274_s1 + $0x38] sm:$0xff]   ;;  %v945_v21 = vld [vmem:[%s1275_s0 + $0x4c] ss:$8 sps:$4 sm:$0xff]   ;;  %v948_v23 = vld [vmem:[%s1275_s0 + $0x48] ss:$8 sps:$4 sm:$0xff]  }
   0x8   :  { %765 = vmatprep.subr.bf16.mxu0 %v925_v4  ;;  %805 = vmatprep.subr.bf16.mxu1 %v925_v4  ;;  %v940_v19 = vld [vmem:[%s1275_s0 + $0x38] ss:$8 sps:$4 sm:$0xff]   ;;  %v943_v20 = vld [vmem:[%s1275_s0 + $0x14] ss:$8 sps:$4 sm:$0xff]   ;;  %v949_v24 = vld [vmem:[%s1275_s0 + $0x24] ss:$8 sps:$4 sm:$0xff]  }
   0x9   :  { %328 = vmatprep.mubr.bf16.mxu1 %v942_v12  ;;  %v947_v22 = vld [vmem:[%s1275_s0 + $0x10] ss:$8 sps:$4 sm:$0xff]   ;;  %v951_v25 = vld [vmem:[%s1275_s0 + $0x5c] ss:$8 sps:$4 sm:$0xff]   ;;  %v953_v26 = vld [vmem:[%s1275_s0 + $0x20] ss:$8 sps:$4 sm:$0xff]  }
   0xa   :  { %v954_v27 = vld [vmem:[%s1275_s0 + $0x58] ss:$8 sps:$4 sm:$0xff]   ;;  %v53_v28 = vld [vmem:[%s1275_s0 + $0x30] sm:$0x11]  ;;  %v690_v29 = vld [vmem:[%s1275_s0 + $0x68] sm:$0x11] }
   0xb   :  { %766 = vmatpush3.bf16.msra.mxu0 %v1019_v5  ;;  %806 = vmatpush3.bf16.msra.mxu1 %v1019_v5  ;;  %v667_v30 = vcombine.high %v53_v28, %v53_v28  ;;  %v698_v31 = vcombine.high %v690_v29, %v690_v29  ;;  %v666_v32 = vcombine.low %v53_v28, %v53_v28  ;;  %v961_v34 = vld [vmem:[%s1275_s0 + $0x74] ss:$8 sps:$4 sm:$0xff]   ;;  %v959_v36 = vld [vmem:[%s1275_s0 + $0x70] ss:$8 sps:$4 sm:$0xff]   ;;  %v965_v38 = vld [vmem:[%s1275_s0 + $0x84] ss:$8 sps:$4 sm:$0xff]  }
   0xc   :  { %767 = vmatprep.subr.bf16.mxu0 %v1024_v6  ;;  %807 = vmatprep.subr.bf16.mxu1 %v1024_v6  ;;  %v697_v33 = vcombine.low %v690_v29, %v690_v29  ;;  %v964_v35 = vld [vmem:[%s1275_s0 + $0xac] ss:$8 sps:$4 sm:$0xff]   ;;  %v962_v37 = vld [vmem:[%s1275_s0 + $0xa8] ss:$8 sps:$4 sm:$0xff]   ;;  %v967_v39 = vld [vmem:[%s1275_s0 + $0xbc] ss:$8 sps:$4 sm:$0xff]  }
   0xd   :  { %v969_v40 = vld [vmem:[%s1275_s0 + $0x80] ss:$8 sps:$4 sm:$0xff]   ;;  %v971_v42 = vld [vmem:[%s1275_s0 + $0x94] ss:$8 sps:$4 sm:$0xff]   ;;  %v975_v46 = vld [vmem:[%s1275_s0 + $0x90] ss:$8 sps:$4 sm:$0xff]  }
   0xe   :  { %v970_v41 = vld [vmem:[%s1275_s0 + $0xb8] ss:$8 sps:$4 sm:$0xff]   ;;  %v973_v43 = vld [vmem:[%s1275_s0 + $0xcc] ss:$8 sps:$4 sm:$0xff]   ;;  %v976_v47 = vld [vmem:[%s1275_s0 + $0xc8] ss:$8 sps:$4 sm:$0xff]  }
   0xf   :  { %768 = vmatpush3.bf16.msra.mxu0 %v1031_v7  ;;  %808 = vmatpush3.bf16.msra.mxu1 %v1031_v7  ;;  %v705_v44 = vld [vmem:[%s1275_s0 + $0xa0] sm:$0x11]  ;;  %v720_v45 = vld [vmem:[%s1275_s0 + $0xd8] sm:$0x11] }
  0x10   :  { %769 = vmatprep.subr.bf16.mxu0 %v1038_v8  ;;  %809 = vmatprep.subr.bf16.mxu1 %v1038_v8  ;;  %v713_v48 = vcombine.high %v705_v44, %v705_v44  ;;  %v728_v49 = vcombine.high %v720_v45, %v720_v45  ;;  %v712_v50 = vcombine.low %v705_v44, %v705_v44 }
  0x11   :  { %v727_v51 = vcombine.low %v720_v45, %v720_v45 }
  0x13   :  { %770 = vmatpush3.bf16.msra.mxu0 %v1045_v9  ;;  %810 = vmatpush3.bf16.msra.mxu1 %v1045_v9 }
  0x14   :  { %771 = vmatprep.subr.bf16.mxu0 %v1052_v10  ;;  %811 = vmatprep.subr.bf16.mxu1 %v1052_v10 }
  0x17   :  { %772 = vmatpush3.bf16.msra.mxu0 %v1065_v13  ;;  %812 = vmatpush3.bf16.msra.mxu1 %v1065_v13 }
  0x18   :  { %773 = vmatprep.subr.bf16.mxu0 %v1072_v14  ;;  %813 = vmatprep.subr.bf16.mxu1 %v1072_v14 }
  0x1b   :  { %774 = vmatpush3.bf16.msra.mxu0 %v1079_v15  ;;  %814 = vmatpush3.bf16.msra.mxu1 %v1079_v15 }
  0x1c   :  { %775 = vmatprep.subr.bf16.mxu0 %v1086_v16  ;;  %815 = vmatprep.subr.bf16.mxu1 %v1086_v16 }
  0x1f   :  { %776 = vmatpush3.bf16.msra.mxu0 %v1093_v17  ;;  %816 = vmatpush3.bf16.msra.mxu1 %v1093_v17 }
  0x20   :  { %841 = vmatprep.subr.bf16.mxu0 %v921_v0  ;;  %881 = vmatprep.subr.bf16.mxu1 %v921_v0 }
  0x22   :  { %220 = vmatmul.mubr.bf16.vlgmr.msra.gmra.mrb[0].mxu0 %v937_v18  ;;  %329 = vmatmul.mubr.bf16.vlgmr.msra.gmra.mrb[0].mxu1 %v940_v19 }
  0x23   :  { %842 = vmatpush3.bf16.msra.mxu0 %v922_v1  ;;  %882 = vmatpush3.bf16.msra.mxu1 %v922_v1 }
  0x24   :  { %843 = vmatprep.subr.bf16.mxu0 %v923_v2  ;;  %883 = vmatprep.subr.bf16.mxu1 %v923_v2 }
  0x25   :  { %227 = vmatprep.mubr.bf16.mxu0 %v943_v20  ;;  %336 = vmatprep.mubr.bf16.mxu1 %v945_v21 }
  0x27   :  { %844 = vmatpush3.bf16.msra.mxu0 %v924_v3  ;;  %884 = vmatpush3.bf16.msra.mxu1 %v924_v3 }
  0x28   :  { %845 = vmatprep.subr.bf16.mxu0 %v925_v4  ;;  %885 = vmatprep.subr.bf16.mxu1 %v925_v4 }
  0x2a   :  { %228 = vmatmul.mubr.bf16.gmra.mrb[4].mxu0 %v947_v22  ;;  %337 = vmatmul.mubr.bf16.gmra.mrb[4].mxu1 %v948_v23 }
  0x2b   :  { %846 = vmatpush3.bf16.msra.mxu0 %v1019_v5  ;;  %886 = vmatpush3.bf16.msra.mxu1 %v1019_v5 }
  0x2c   :  { %847 = vmatprep.subr.bf16.mxu0 %v1024_v6  ;;  %887 = vmatprep.subr.bf16.mxu1 %v1024_v6 }
  0x2d   :  { %235 = vmatprep.mubr.bf16.mxu0 %v949_v24  ;;  %344 = vmatprep.mubr.bf16.mxu1 %v951_v25 }
  0x2f   :  { %848 = vmatpush3.bf16.msra.mxu0 %v1031_v7  ;;  %888 = vmatpush3.bf16.msra.mxu1 %v1031_v7 }
  0x30   :  { %849 = vmatprep.subr.bf16.mxu0 %v1038_v8  ;;  %889 = vmatprep.subr.bf16.mxu1 %v1038_v8 }
  0x32   :  { %236 = vmatmul.mubr.bf16.gmra.mrb[8].mxu0 %v953_v26  ;;  %345 = vmatmul.mubr.bf16.gmra.mrb[8].mxu1 %v954_v27 }
  0x33   :  { %850 = vmatpush3.bf16.msra.mxu0 %v1045_v9  ;;  %890 = vmatpush3.bf16.msra.mxu1 %v1045_v9 }
  0x34   :  { %851 = vmatprep.subr.bf16.mxu0 %v1052_v10  ;;  %891 = vmatprep.subr.bf16.mxu1 %v1052_v10 }
  0x35   :  { %243 = vmatprep.mubr.bf16.mxu0 %v667_v30  ;;  %352 = vmatprep.mubr.bf16.mxu1 %v698_v31 }
  0x37   :  { %852 = vmatpush3.bf16.msra.mxu0 %v1065_v13  ;;  %892 = vmatpush3.bf16.msra.mxu1 %v1065_v13 }
  0x38   :  { %853 = vmatprep.subr.bf16.mxu0 %v1072_v14  ;;  %893 = vmatprep.subr.bf16.mxu1 %v1072_v14 }
  0x3a   :  { %244 = vmatmul.mubr.bf16.gmra.mrb[12].mxu0 %v666_v32  ;;  %353 = vmatmul.mubr.bf16.gmra.mrb[12].mxu1 %v697_v33 }
  0x3b   :  { %854 = vmatpush3.bf16.msra.mxu0 %v1079_v15  ;;  %894 = vmatpush3.bf16.msra.mxu1 %v1079_v15 }
  0x3c   :  { %855 = vmatprep.subr.bf16.mxu0 %v1086_v16  ;;  %895 = vmatprep.subr.bf16.mxu1 %v1086_v16 }
  0x3d   :  { %437 = vmatprep.mubr.bf16.mxu0 %v961_v34  ;;  %546 = vmatprep.mubr.bf16.mxu1 %v964_v35 }
  0x3f   :  { %856 = vmatpush3.bf16.msra.mxu0 %v1093_v17  ;;  %896 = vmatpush3.bf16.msra.mxu1 %v1093_v17 }
  0x42   :  { %438 = vmatmul.mubr.bf16.vlgmr.msra.gmra.mrb[16].mxu0 %v959_v36  ;;  %547 = vmatmul.mubr.bf16.vlgmr.msra.gmra.mrb[16].mxu1 %v962_v37 }
  0x43   :  { %445 = vmatprep.mubr.bf16.mxu0 %v965_v38  ;;  %554 = vmatprep.mubr.bf16.mxu1 %v967_v39 }
  0x4a   :  { %446 = vmatmul.mubr.bf16.gmra.mrb[20].mxu0 %v969_v40  ;;  %555 = vmatmul.mubr.bf16.gmra.mrb[20].mxu1 %v970_v41 }
  0x4b   :  { %453 = vmatprep.mubr.bf16.mxu0 %v971_v42  ;;  %562 = vmatprep.mubr.bf16.mxu1 %v973_v43 }
  0x52   :  { %454 = vmatmul.mubr.bf16.gmra.mrb[24].mxu0 %v975_v46  ;;  %563 = vmatmul.mubr.bf16.gmra.mrb[24].mxu1 %v976_v47 }
  0x53   :  { %461 = vmatprep.mubr.bf16.mxu0 %v713_v48  ;;  %570 = vmatprep.mubr.bf16.mxu1 %v728_v49 }
  0x5a   :  { %462 = vmatmul.mubr.bf16.gmra.mrb[28].mxu0 %v712_v50  ;;  %571 = vmatmul.mubr.bf16.gmra.mrb[28].mxu1 %v727_v51 }
  0xf5   :  { %v777_v52 = vpop.f32.mrb[0].mxu0  ;;  %v817_v53 = vpop.f32.mrb[0].mxu1 }
  0xf6   :  { %v778_v54 = vpop.f32.mrb[1].mxu0  ;;  %v818_v55 = vpop.f32.mrb[1].mxu1 }
  0xf7   :  { %v1199_v56 = vadd.f32 %v778_v54, %v777_v52  ;;  %v1201_v57 = vadd.f32 %v818_v55, %v817_v53  ;;  %v780_v58 = vpop.f32.mrb[2].mxu0  ;;  %v820_v59 = vpop.f32.mrb[2].mxu1  ;;  %v1238_v54 = vld [vmem:[%s1276_s2] ss:$0 sm:$0xff] }
  0xf8   :  { %v781_v60 = vpop.f32.mrb[3].mxu0  ;;  %v821_v61 = vpop.f32.mrb[3].mxu1 }
  0xf9   :  { %v578_v62 = vmax.f32 %v1199_v56, %v1201_v57  ;;  %v782_v63 = vadd.f32 %v781_v60, %v780_v58  ;;  %v822_v0 = vadd.f32 %v821_v61, %v820_v59 }
  0xfb   :  { %v579_v1 = vmax.f32 %v782_v63, %v822_v0 }
  0xfd   :  { %v783_v2 = vpop.f32.mrb[4].mxu0  ;;  %v823_v3 = vpop.f32.mrb[4].mxu1 }
  0xfe   :  { %v784_v4 = vpop.f32.mrb[5].mxu0  ;;  %v824_v5 = vpop.f32.mrb[5].mxu1 }
  0xff   :  { %v1205_v6 = vadd.f32 %v784_v4, %v783_v2  ;;  %v1207_v7 = vadd.f32 %v824_v5, %v823_v3  ;;  %v786_v8 = vpop.f32.mrb[6].mxu0  ;;  %v826_v9 = vpop.f32.mrb[6].mxu1 }
 0x100   :  { %v787_v10 = vpop.f32.mrb[7].mxu0  ;;  %v827_v11 = vpop.f32.mrb[7].mxu1 }
 0x101   :  { %v580_v12 = vmax.f32 %v1205_v6, %v1207_v7  ;;  %v1211_v13 = vadd.f32 %v787_v10, %v786_v8  ;;  %v1213_v14 = vadd.f32 %v827_v11, %v826_v9 }
 0x103   :  { %v581_v15 = vmax.f32 %v1211_v13, %v1213_v14 }
 0x105   :  { %v789_v16 = vpop.f32.mrb[8].mxu0  ;;  %v829_v17 = vpop.f32.mrb[8].mxu1 }
 0x106   :  { %v790_v18 = vpop.f32.mrb[9].mxu0  ;;  %v830_v19 = vpop.f32.mrb[9].mxu1 }
 0x107   :  { %v1217_v20 = vadd.f32 %v790_v18, %v789_v16  ;;  %v1219_v21 = vadd.f32 %v830_v19, %v829_v17  ;;  %v792_v22 = vpop.f32.mrb[10].mxu0  ;;  %v832_v23 = vpop.f32.mrb[10].mxu1 }
 0x108   :  { %v793_v24 = vpop.f32.mrb[11].mxu0  ;;  %v833_v25 = vpop.f32.mrb[11].mxu1 }
 0x109   :  { %v582_v26 = vmax.f32 %v1217_v20, %v1219_v21  ;;  %v1223_v27 = vadd.f32 %v793_v24, %v792_v22  ;;  %v1225_v28 = vadd.f32 %v833_v25, %v832_v23 }
 0x10b   :  { %v583_v29 = vmax.f32 %v1223_v27, %v1225_v28 }
 0x10d   :  { %v795_v30 = vpop.f32.mrb[12].mxu0  ;;  %v835_v31 = vpop.f32.mrb[12].mxu1 }
 0x10e   :  { %v796_v32 = vpop.f32.mrb[13].mxu0  ;;  %v836_v33 = vpop.f32.mrb[13].mxu1 }
 0x10f   :  { %v1229_v34 = vadd.f32 %v796_v32, %v795_v30  ;;  %v1231_v35 = vadd.f32 %v836_v33, %v835_v31  ;;  %v798_v36 = vpop.f32.mrb[14].mxu0  ;;  %v838_v37 = vpop.f32.mrb[14].mxu1 }
 0x110   :  { %v799_v38 = vpop.f32.mrb[15].mxu0  ;;  %v839_v39 = vpop.f32.mrb[15].mxu1 }
 0x111   :  { %v584_v40 = vmax.f32 %v1229_v34, %v1231_v35 }
 0x115   :  { %v857_v41 = vpop.f32.mrb[16].mxu0  ;;  %v897_v42 = vpop.f32.mrb[16].mxu1 }
 0x116   :  { %v858_v43 = vpop.f32.mrb[17].mxu0  ;;  %v898_v44 = vpop.f32.mrb[17].mxu1 }
 0x117   :  { %v859_v45 = vadd.f32 %v858_v43, %v857_v41  ;;  %v899_v46 = vadd.f32 %v898_v44, %v897_v42  ;;  %v860_v47 = vpop.f32.mrb[18].mxu0  ;;  %v900_v48 = vpop.f32.mrb[18].mxu1 }
 0x118   :  { %v861_v49 = vpop.f32.mrb[19].mxu0  ;;  %v901_v50 = vpop.f32.mrb[19].mxu1 }
 0x119   :  { %v585_v51 = vmax.f32 %v859_v45, %v899_v46  ;;  %v862_v52 = vadd.f32 %v861_v49, %v860_v47  ;;  %v902_v53 = vadd.f32 %v901_v50, %v900_v48 }
 0x11b   :  { %v592_v55 = vmax.f32 %v578_v62, %v585_v51  ;;  %v586_v56 = vmax.f32 %v862_v52, %v902_v53 }
 0x11d   :  { %v606_v57 = vadd.f32 %v1238_v54, %v592_v55  ;;  %v593_v58 = vmax.f32 %v579_v1, %v586_v56  ;;  %v863_v59 = vpop.f32.mrb[20].mxu0  ;;  %v903_v60 = vpop.f32.mrb[20].mxu1 }
 0x11e   :  { %v864_v61 = vpop.f32.mrb[21].mxu0  ;;  %v904_v63 = vpop.f32.mrb[21].mxu1 }
 0x11f   :  { %v607_v0 = vadd.f32 %v1238_v54, %v593_v58  ;;  %v865_v2 = vadd.f32 %v864_v61, %v863_v59  ;;  %v905_v3 = vadd.f32 %v904_v63, %v903_v60  ;;  %v866_v4 = vpop.f32.mrb[22].mxu0  ;;  %v906_v5 = vpop.f32.mrb[22].mxu1  ;;  %v613_v8 = vmax.f32 %v606_v57, 0.0 }
 0x120   :  { %v867_v9 = vpop.f32.mrb[23].mxu0  ;;  %v907_v10 = vpop.f32.mrb[23].mxu1 }
 0x121   :  { %v614_v11 = vmax.f32 %v607_v0, 0.0  ;;  %v587_v16 = vmax.f32 %v865_v2, %v905_v3  ;;  %v868_v62 = vadd.f32 %v867_v9, %v866_v4  ;;  %v908_v17 = vadd.f32 %v907_v10, %v906_v5 }
 0x123   :  { %v747_v18 = vpack.c.bf16 %v614_v11, %v613_v8  ;;  %v594_v1 = vmax.f32 %v580_v12, %v587_v16  ;;  %v588_v19 = vmax.f32 %v868_v62, %v908_v17 }
 0x125   :  { %748 = vst [vmem:[%s1277_s3] sm:$0xff] %v747_v18   ;;  %v608_v22 = vadd.f32 %v1238_v54, %v594_v1  ;;  %v595_v23 = vmax.f32 %v581_v15, %v588_v19  ;;  %v869_v24 = vpop.f32.mrb[24].mxu0  ;;  %v909_v25 = vpop.f32.mrb[24].mxu1 }
 0x126   :  { %v870_v30 = vpop.f32.mrb[25].mxu0  ;;  %v910_v31 = vpop.f32.mrb[25].mxu1 }
 0x127   :  { %v609_v32 = vadd.f32 %v1238_v54, %v595_v23  ;;  %v871_v33 = vadd.f32 %v870_v30, %v869_v24  ;;  %v911_v6 = vadd.f32 %v910_v31, %v909_v25  ;;  %v872_v7 = vpop.f32.mrb[26].mxu0  ;;  %v912_v12 = vpop.f32.mrb[26].mxu1  ;;  %v615_v36 = vmax.f32 %v608_v22, 0.0 }
 0x128   :  { %v873_v37 = vpop.f32.mrb[27].mxu0  ;;  %v913_v38 = vpop.f32.mrb[27].mxu1 }
 0x129   :  { %v616_v39 = vmax.f32 %v609_v32, 0.0  ;;  %v589_v41 = vmax.f32 %v871_v33, %v911_v6  ;;  %v874_v42 = vadd.f32 %v873_v37, %v872_v7  ;;  %v914_v43 = vadd.f32 %v913_v38, %v912_v12 }
 0x12b   :  { %v752_v44 = vpack.c.bf16 %v616_v39, %v615_v36  ;;  %v596_v13 = vmax.f32 %v582_v26, %v589_v41  ;;  %v590_v14 = vmax.f32 %v874_v42, %v914_v43 }
 0x12d   :  { %759 = vst [vmem:[%s1277_s3 + $0x8] sm:$0xff] %v752_v44   ;;  %v610_v15 = vadd.f32 %v1238_v54, %v596_v13  ;;  %v597_v45 = vmax.f32 %v583_v29, %v590_v14  ;;  %v875_v46 = vpop.f32.mrb[28].mxu0  ;;  %v915_v47 = vpop.f32.mrb[28].mxu1 }
 0x12e   :  { %v876_v48 = vpop.f32.mrb[29].mxu0  ;;  %v916_v49 = vpop.f32.mrb[29].mxu1 }
 0x12f   :  { %v611_v50 = vadd.f32 %v1238_v54, %v597_v45  ;;  %v877_v51 = vadd.f32 %v876_v48, %v875_v46  ;;  %v917_v20 = vadd.f32 %v916_v49, %v915_v47  ;;  %v878_v21 = vpop.f32.mrb[30].mxu0  ;;  %v918_v26 = vpop.f32.mrb[30].mxu1  ;;  %v617_v55 = vmax.f32 %v610_v15, 0.0 }
 0x130   :  { %v879_v52 = vpop.f32.mrb[31].mxu0  ;;  %v919_v53 = vpop.f32.mrb[31].mxu1 }
 0x131   :  { %v618_v56 = vmax.f32 %v611_v50, 0.0  ;;  %v591_v57 = vmax.f32 %v877_v51, %v917_v20 }
 0x133   :  { %v757_v58 = vpack.c.bf16 %v618_v56, %v617_v55  ;;  %v598_v27 = vmax.f32 %v584_v40, %v591_v57 }
 0x135   :  { %760 = vst [vmem:[%s1277_s3 + $0x10] sm:$0xff] %v757_v58   ;;  %v612_v28 = vadd.f32 %v1238_v54, %v598_v27 }
 0x137   :  { %v619_v29 = vmax.f32 %v612_v28, 0.0 }
 0x139   :  { %v743_v59 = vpack.c.bf16 %v619_v29, %v619_v29 }
 0x13b   :  { %655 = vst [vmem:[%s1277_s3 + $0x18] sm:$0x1] %v743_v59 }

// kernel: net_forward.5
= control target key start
LH: loop header
LB: loop body
LE: loop exit
PB: predicated region body
PF: predicated region fallthrough
CT: control target
= control target key end

     0   :  { %v447_v27 = vlaneseq  ;;  %v3408_v35 = vmov 1966171168   ;;  %vm3410_vm0 = vmmov 0   ;;  %s4199_s0 = inlined_call_operand.vmem [shape: bf16[2,3200], index: 0, kind: input, shape index: {}]   ;;  %s4200_s1 = inlined_call_operand.vmem [shape: bf16[3200,128], index: 1, kind: input, shape index: {}]   ;;  %s4201_s2 = inlined_call_operand.vmem [shape: f32[1,128], index: 2, kind: input, shape index: {}]   ;;  %s4202_s3 = inlined_call_operand.vmem [shape: bf16[128,128], index: 3, kind: input, shape index: {}]   ;;  %s4203_s4 = inlined_call_operand.vmem [shape: f32[1,128], index: 4, kind: input, shape index: {}]   ;;  %s4204_s5 = inlined_call_operand.vmem [shape: bf16[128,128], index: 5, kind: input, shape index: {}]   ;;  %s4205_s6 = inlined_call_operand.vmem [shape: f32[1,128], index: 6, kind: input, shape index: {}]   ;;  %s4206_s7 = inlined_call_operand.hbm [shape: f32[2,128], index: 7, kind: output, shape index: {}]  }
   0x1   :  { %v3165_v0 = vld [vmem:[%s4200_s1 + $0x40] sm:$0xff]   ;;  %v3169_v4 = vld [vmem:[%s4200_s1 + $0x48] sm:$0xff]   ;;  %v3173_v8 = vld [vmem:[%s4200_s1 + $0x50] sm:$0xff]   ;;  %v445_v36 = vunpack.c.l.s4 %v3408_v35 }
   0x2   :  { %v3166_v1 = vld [vmem:[%s4200_s1] sm:$0xff]   ;;  %2810 = vmatprep.subr.bf16.mxu0 %v3165_v0  ;;  %v3170_v5 = vld [vmem:[%s4200_s1 + $0x8] sm:$0xff]   ;;  %v3174_v9 = vld [vmem:[%s4200_s1 + $0x10] sm:$0xff]   ;;  %v448_v32 = vshrl.u32 %v447_v27, 7 }
   0x3   :  { %v3167_v2 = vld [vmem:[%s4200_s1 + $0xc0] sm:$0xff]   ;;  %2811 = vmatpush3.bf16.msra.mxu0 %v3166_v1  ;;  %v3171_v6 = vld [vmem:[%s4200_s1 + $0xc8] sm:$0xff]   ;;  %v3175_v10 = vld [vmem:[%s4200_s1 + $0xd0] sm:$0xff]   ;;  %v446_v39 = vunpack.c.0.s8 %v445_v36 }
   0x4   :  { %v3168_v3 = vld [vmem:[%s4200_s1 + $0x80] sm:$0xff]   ;;  %2832 = vmatprep.subr.bf16.mxu1 %v3167_v2  ;;  %2812 = vmatprep.subr.bf16.mxu0 %v3169_v4  ;;  %v3172_v7 = vld [vmem:[%s4200_s1 + $0x88] sm:$0xff]   ;;  %v3176_v11 = vld [vmem:[%s4200_s1 + $0x90] sm:$0xff]  }
   0x5   :  { %2833 = vmatpush3.bf16.msra.mxu1 %v3168_v3  ;;  %v3177_v12 = vld [vmem:[%s4200_s1 + $0x58] sm:$0xff]   ;;  %v3181_v16 = vld [vmem:[%s4200_s1 + $0x60] sm:$0xff]   ;;  %v3185_v20 = vld [vmem:[%s4200_s1 + $0x68] sm:$0xff]   ;;  %v3557_v41 = vsub.s32 %v446_v39, %v448_v32 }
   0x6   :  { %2834 = vmatprep.subr.bf16.mxu1 %v3171_v6  ;;  %v3178_v13 = vld [vmem:[%s4200_s1 + $0x18] sm:$0xff]   ;;  %v3182_v17 = vld [vmem:[%s4200_s1 + $0x20] sm:$0xff]   ;;  %v3186_v21 = vld [vmem:[%s4200_s1 + $0x28] sm:$0xff]  }
   0x7   :  { %2813 = vmatpush3.bf16.msra.mxu0 %v3170_v5  ;;  %v3179_v14 = vld [vmem:[%s4200_s1 + $0xd8] sm:$0xff]   ;;  %v3183_v18 = vld [vmem:[%s4200_s1 + $0xe0] sm:$0xff]   ;;  %v3187_v22 = vld [vmem:[%s4200_s1 + $0xe8] sm:$0xff]  }
   0x8   :  { %2814 = vmatprep.subr.bf16.mxu0 %v3173_v8  ;;  %v3180_v15 = vld [vmem:[%s4200_s1 + $0x98] sm:$0xff]   ;;  %v3184_v19 = vld [vmem:[%s4200_s1 + $0xa0] sm:$0xff]   ;;  %v3188_v23 = vld [vmem:[%s4200_s1 + $0xa8] sm:$0xff]  }
   0x9   :  { %2835 = vmatpush3.bf16.msra.mxu1 %v3172_v7  ;;  %v3189_v24 = vld [vmem:[%s4200_s1 + $0x70] sm:$0xff]   ;;  %v3193_v29 = vld [vmem:[%s4200_s1 + $0x78] sm:$0xff]   ;;  %v28_v33 = vld [vmem:[%s4199_s0] sm:$0xff] }
   0xa   :  { %2836 = vmatprep.subr.bf16.mxu1 %v3175_v10  ;;  %v3190_v25 = vld [vmem:[%s4200_s1 + $0x30] sm:$0xff]   ;;  %v3194_v30 = vld [vmem:[%s4200_s1 + $0x38] sm:$0xff]   ;;  %v3198_v37 = vld [vmem:[%s4200_s1 + $0x140] sm:$0xff]   ;;  %v443_v38 = vcombine.high %v28_v33, %v28_v33  ;;  %v450_v42 = vrot.slane %v28_v33, %v3557_v41 }
   0xb   :  { %2815 = vmatpush3.bf16.msra.mxu0 %v3174_v9  ;;  %v3191_v26 = vld [vmem:[%s4200_s1 + $0xf0] sm:$0xff]   ;;  %v3195_v31 = vld [vmem:[%s4200_s1 + $0xf8] sm:$0xff]   ;;  %v3200_v40 = vld [vmem:[%s4200_s1 + $0x1c0] sm:$0xff]  }
   0xc   :  { %2816 = vmatprep.subr.bf16.mxu0 %v3177_v12  ;;  %v3192_v28 = vld [vmem:[%s4200_s1 + $0xb0] sm:$0xff]   ;;  %v3197_v34 = vld [vmem:[%s4200_s1 + $0xb8] sm:$0xff]   ;;  %v3561_v43 = vrot.slane %v443_v38, %v3557_v41  ;;  %v458_v44 = vcombine.high %v450_v42, %v450_v42  ;;  %v466_v45 = vrot.slane %v450_v42, %v3557_v41  ;;  %v3199_v48 = vld [vmem:[%s4200_s1 + $0x100] sm:$0xff]  }
   0xd   :  { %2837 = vmatpush3.bf16.msra.mxu1 %v3176_v11  ;;  %v3202_v51 = vld [vmem:[%s4200_s1 + $0x148] sm:$0xff]   ;;  %v3201_v53 = vld [vmem:[%s4200_s1 + $0x180] sm:$0xff]   ;;  %v3206_v57 = vld [vmem:[%s4200_s1 + $0x150] sm:$0xff]  }
   0xe   :  { %2838 = vmatprep.subr.bf16.mxu1 %v3179_v14  ;;  %v459_v46 = vcombine.high %v3561_v43, %v3561_v43  ;;  %v480_v47 = vrot.slane %v458_v44, %v3557_v41  ;;  %v488_v50 = vcombine.high %v466_v45, %v466_v45  ;;  %v3204_v54 = vld [vmem:[%s4200_s1 + $0x1c8] sm:$0xff]   ;;  %v3208_v59 = vld [vmem:[%s4200_s1 + $0x1d0] sm:$0xff]   ;;  %v3210_v61 = vld [vmem:[%s4200_s1 + $0x158] sm:$0xff]  }
   0xf   :  { %2817 = vmatpush3.bf16.msra.mxu0 %v3178_v13  ;;  %v3203_v56 = vld [vmem:[%s4200_s1 + $0x108] sm:$0xff]   ;;  %v3207_v60 = vld [vmem:[%s4200_s1 + $0x110] sm:$0xff]   ;;  %v3212_v63 = vld [vmem:[%s4200_s1 + $0x1d8] sm:$0xff]  }
  0x10   :  { %2818 = vmatprep.subr.bf16.mxu0 %v3181_v16  ;;  %v487_v49 = vrot.slane %v459_v46, %v3557_v41  ;;  %1861 = vmatprep.mubr.bf16.mxu0 %v480_v47  ;;  %v490_v52 = vcombine.high %v480_v47, %v480_v47  ;;  %v3205_v58 = vld [vmem:[%s4200_s1 + $0x188] sm:$0xff]   ;;  %v3209_v62 = vld [vmem:[%s4200_s1 + $0x190] sm:$0xff]   ;;  %v3211_v0 = vld [vmem:[%s4200_s1 + $0x118] sm:$0xff]  }
  0x11   :  { %2839 = vmatpush3.bf16.msra.mxu1 %v3180_v15  ;;  %v3214_v1 = vld [vmem:[%s4200_s1 + $0x160] sm:$0xff]   ;;  %v3213_v2 = vld [vmem:[%s4200_s1 + $0x198] sm:$0xff]   ;;  %v3218_v5 = vld [vmem:[%s4200_s1 + $0x168] sm:$0xff]  }
  0x12   :  { %2840 = vmatprep.subr.bf16.mxu1 %v3183_v18  ;;  %v491_v55 = vcombine.high %v487_v49, %v487_v49  ;;  %1901 = vmatprep.mubr.bf16.mxu1 %v490_v52  ;;  %v3216_v3 = vld [vmem:[%s4200_s1 + $0x1e0] sm:$0xff]   ;;  %v3220_v7 = vld [vmem:[%s4200_s1 + $0x1e8] sm:$0xff]   ;;  %v3222_v9 = vld [vmem:[%s4200_s1 + $0x170] sm:$0xff]  }
  0x13   :  { %2819 = vmatpush3.bf16.msra.mxu0 %v3182_v17  ;;  %v3215_v4 = vld [vmem:[%s4200_s1 + $0x120] sm:$0xff]   ;;  %v3219_v8 = vld [vmem:[%s4200_s1 + $0x128] sm:$0xff]   ;;  %v3224_v11 = vld [vmem:[%s4200_s1 + $0x1f0] sm:$0xff]   ;;  %v473_v17 = vrot.slane %v3561_v43, %v3557_v41 }
  0x14   :  { %2820 = vmatprep.subr.bf16.mxu0 %v3185_v20  ;;  %v3217_v6 = vld [vmem:[%s4200_s1 + $0x1a0] sm:$0xff]   ;;  %v3221_v10 = vld [vmem:[%s4200_s1 + $0x1a8] sm:$0xff]   ;;  %v3223_v12 = vld [vmem:[%s4200_s1 + $0x130] sm:$0xff]  }
  0x15   :  { %2841 = vmatpush3.bf16.msra.mxu1 %v3184_v19  ;;  %v3226_v13 = vld [vmem:[%s4200_s1 + $0x178] sm:$0xff]   ;;  %v3225_v14 = vld [vmem:[%s4200_s1 + $0x1b0] sm:$0xff]   ;;  %v3230_v18 = vld [vmem:[%s4200_s1 + $0x240] sm:$0xff]  }
  0x16   :  { %2842 = vmatprep.subr.bf16.mxu1 %v3187_v22  ;;  %v3228_v15 = vld [vmem:[%s4200_s1 + $0x1f8] sm:$0xff]   ;;  %v3232_v20 = vld [vmem:[%s4200_s1 + $0x2c0] sm:$0xff]   ;;  %v489_v22 = vcombine.high %v473_v17, %v473_v17  ;;  %v3238_v27 = vld [vmem:[%s4200_s1 + $0x250] sm:$0xff]  }
  0x17   :  { %2821 = vmatpush3.bf16.msra.mxu0 %v3186_v21  ;;  %v3227_v16 = vld [vmem:[%s4200_s1 + $0x138] sm:$0xff]   ;;  %v3231_v21 = vld [vmem:[%s4200_s1 + $0x200] sm:$0xff]   ;;  %v3241_v32 = vld [vmem:[%s4200_s1 + $0x290] sm:$0xff]  }
  0x18   :  { %2822 = vmatprep.subr.bf16.mxu0 %v3189_v24  ;;  %v3229_v19 = vld [vmem:[%s4200_s1 + $0x1b8] sm:$0xff]   ;;  %v3233_v24 = vld [vmem:[%s4200_s1 + $0x280] sm:$0xff]   ;;  %v3250_v39 = vld [vmem:[%s4200_s1 + $0x268] sm:$0xff]  }
  0x19   :  { %2843 = vmatpush3.bf16.msra.mxu1 %v3188_v23  ;;  %v3234_v23 = vld [vmem:[%s4200_s1 + $0x248] sm:$0xff]   ;;  %v3244_v33 = vld [vmem:[%s4200_s1 + $0x2d8] sm:$0xff]   ;;  %v3246_v35 = vld [vmem:[%s4200_s1 + $0x260] sm:$0xff]  }
  0x1a   :  { %2844 = vmatprep.subr.bf16.mxu1 %v3191_v26  ;;  %v3235_v26 = vld [vmem:[%s4200_s1 + $0x208] sm:$0xff]   ;;  %v3245_v36 = vld [vmem:[%s4200_s1 + $0x298] sm:$0xff]   ;;  %v3247_v38 = vld [vmem:[%s4200_s1 + $0x220] sm:$0xff]  }
  0x1b   :  { %2823 = vmatpush3.bf16.msra.mxu0 %v3190_v25  ;;  %v3236_v25 = vld [vmem:[%s4200_s1 + $0x2c8] sm:$0xff]   ;;  %v3254_v44 = vld [vmem:[%s4200_s1 + $0x270] sm:$0xff]  }
  0x1c   :  { %2824 = vmatprep.subr.bf16.mxu0 %v3193_v29  ;;  %v3240_v29 = vld [vmem:[%s4200_s1 + $0x2d0] sm:$0xff]   ;;  %v3252_v42 = vld [vmem:[%s4200_s1 + $0x2e8] sm:$0xff]  }
  0x1d   :  { %2845 = vmatpush3.bf16.msra.mxu1 %v3192_v28  ;;  %v3237_v28 = vld [vmem:[%s4200_s1 + $0x288] sm:$0xff]  }
  0x1e   :  { %2846 = vmatprep.subr.bf16.mxu1 %v3195_v31  ;;  %v3242_v31 = vld [vmem:[%s4200_s1 + $0x258] sm:$0xff]   ;;  %v3251_v43 = vld [vmem:[%s4200_s1 + $0x228] sm:$0xff]  }
  0x1f   :  { %2825 = vmatpush3.bf16.msra.mxu0 %v3194_v30  ;;  %v3239_v30 = vld [vmem:[%s4200_s1 + $0x210] sm:$0xff]   ;;  %v3253_v46 = vld [vmem:[%s4200_s1 + $0x2a8] sm:$0xff]  }
  0x20   :  { %2854 = vmatprep.subr.bf16.mxu0 %v3198_v37  ;;  %v3248_v37 = vld [vmem:[%s4200_s1 + $0x2e0] sm:$0xff]  }
  0x21   :  { %2847 = vmatpush3.bf16.msra.mxu1 %v3197_v34  ;;  %v3243_v34 = vld [vmem:[%s4200_s1 + $0x218] sm:$0xff]  }
  0x22   :  { %2876 = vmatprep.subr.bf16.mxu1 %v3200_v40  ;;  %1862 = vmatmul.mubr.bf16.vlgmr.msra.gmra.mrb[0].mxu0 %v466_v45  ;;  %v3249_v40 = vld [vmem:[%s4200_s1 + $0x2a0] sm:$0xff]   ;;  %v29_v45 = vld [vmem:[%s4199_s0 + $0x8] sm:$0xff] }
  0x23   :  { %2855 = vmatpush3.bf16.msra.mxu0 %v3199_v48  ;;  %1941 = vmatprep.mubr.bf16.mxu0 %v487_v49  ;;  %v499_v47 = vrot.slane %v29_v45, %v3557_v41  ;;  %v492_v48 = vcombine.high %v29_v45, %v29_v45  ;;  %v3256_v49 = vld [vmem:[%s4200_s1 + $0x2f0] sm:$0xff]  }
  0x24   :  { %1902 = vmatmul.mubr.bf16.vlgmr.msra.gmra.mrb[0].mxu1 %v488_v50  ;;  %2856 = vmatprep.subr.bf16.mxu0 %v3202_v51  ;;  %v3255_v50 = vld [vmem:[%s4200_s1 + $0x230] sm:$0xff]  }
  0x25   :  { %2877 = vmatpush3.bf16.msra.mxu1 %v3201_v53  ;;  %1981 = vmatprep.mubr.bf16.mxu1 %v491_v55  ;;  %v507_v51 = vcombine.high %v499_v47, %v499_v47  ;;  %v3746_v52 = vrot.slane %v492_v48, %v3557_v41  ;;  %v3258_v53 = vld [vmem:[%s4200_s1 + $0x278] sm:$0xff]   ;;  %v3305_v45 = vld [vmem:[%s4200_s1 + $0x4d0] sm:$0xff]  }
  0x26   :  { %2878 = vmatprep.subr.bf16.mxu1 %v3204_v54  ;;  %v3257_v54 = vld [vmem:[%s4200_s1 + $0x2b0] sm:$0xff]  }
  0x27   :  { %2857 = vmatpush3.bf16.msra.mxu0 %v3203_v56  ;;  %v529_v55 = vrot.slane %v507_v51, %v3557_v41  ;;  %v508_v56 = vcombine.high %v3746_v52, %v3746_v52  ;;  %v3306_v48 = vld [vmem:[%s4200_s1 + $0x490] sm:$0xff]   ;;  %v3311_v51 = vld [vmem:[%s4200_s1 + $0x460] sm:$0xff]  }
  0x28   :  { %2858 = vmatprep.subr.bf16.mxu0 %v3206_v57  ;;  %v3260_v57 = vld [vmem:[%s4200_s1 + $0x2f8] sm:$0xff]  }
  0x29   :  { %2879 = vmatpush3.bf16.msra.mxu1 %v3205_v58  ;;  %v3259_v58 = vld [vmem:[%s4200_s1 + $0x238] sm:$0xff]  }
  0x2a   :  { %2880 = vmatprep.subr.bf16.mxu1 %v3208_v59  ;;  %v539_v59 = vcombine.high %v529_v55, %v529_v55 }
  0x2b   :  { %2859 = vmatpush3.bf16.msra.mxu0 %v3207_v60  ;;  %v515_v60 = vrot.slane %v499_v47, %v3557_v41  ;;  %v3307_v47 = vld [vmem:[%s4200_s1 + $0x458] sm:$0xff]  }
  0x2c   :  { %2860 = vmatprep.subr.bf16.mxu0 %v3210_v61  ;;  %v3262_v61 = vld [vmem:[%s4200_s1 + $0x340] sm:$0xff]  }
  0x2d   :  { %2881 = vmatpush3.bf16.msra.mxu1 %v3209_v62  ;;  %v3261_v62 = vld [vmem:[%s4200_s1 + $0x2b8] sm:$0xff]  }
  0x2e   :  { %2882 = vmatprep.subr.bf16.mxu1 %v3212_v63  ;;  %v536_v63 = vrot.slane %v508_v56, %v3557_v41  ;;  %v3314_v56 = vld [vmem:[%s4200_s1 + $0x4a0] sm:$0xff]  }
  0x2f   :  { %2861 = vmatpush3.bf16.msra.mxu0 %v3211_v0  ;;  %v3264_v0 = vld [vmem:[%s4200_s1 + $0x3c0] sm:$0xff]  }
  0x30   :  { %2862 = vmatprep.subr.bf16.mxu0 %v3214_v1  ;;  %v3263_v1 = vld [vmem:[%s4200_s1 + $0x300] sm:$0xff]  }
  0x31   :  { %2883 = vmatpush3.bf16.msra.mxu1 %v3213_v2  ;;  %v537_v2 = vcombine.high %v515_v60, %v515_v60 }
  0x32   :  { %2884 = vmatprep.subr.bf16.mxu1 %v3216_v3  ;;  %v3266_v3 = vld [vmem:[%s4200_s1 + $0x348] sm:$0xff]  }
  0x33   :  { %2863 = vmatpush3.bf16.msra.mxu0 %v3215_v4  ;;  %v3265_v4 = vld [vmem:[%s4200_s1 + $0x380] sm:$0xff]  }
  0x34   :  { %2864 = vmatprep.subr.bf16.mxu0 %v3218_v5  ;;  %v540_v5 = vcombine.high %v536_v63, %v536_v63 }
  0x35   :  { %2885 = vmatpush3.bf16.msra.mxu1 %v3217_v6  ;;  %v3268_v6 = vld [vmem:[%s4200_s1 + $0x3c8] sm:$0xff]  }
  0x36   :  { %2886 = vmatprep.subr.bf16.mxu1 %v3220_v7  ;;  %v3267_v7 = vld [vmem:[%s4200_s1 + $0x308] sm:$0xff]  }
  0x37   :  { %2865 = vmatpush3.bf16.msra.mxu0 %v3219_v8  ;;  %v3270_v8 = vld [vmem:[%s4200_s1 + $0x350] sm:$0xff]  }
  0x38   :  { %2866 = vmatprep.subr.bf16.mxu0 %v3222_v9  ;;  %v3269_v9 = vld [vmem:[%s4200_s1 + $0x388] sm:$0xff]  }
  0x39   :  { %2887 = vmatpush3.bf16.msra.mxu1 %v3221_v10  ;;  %v3272_v10 = vld [vmem:[%s4200_s1 + $0x3d0] sm:$0xff]  }
  0x3a   :  { %2888 = vmatprep.subr.bf16.mxu1 %v3224_v11  ;;  %v3271_v11 = vld [vmem:[%s4200_s1 + $0x310] sm:$0xff]  }
  0x3b   :  { %2867 = vmatpush3.bf16.msra.mxu0 %v3223_v12  ;;  %v3274_v12 = vld [vmem:[%s4200_s1 + $0x358] sm:$0xff]  }
  0x3c   :  { %2868 = vmatprep.subr.bf16.mxu0 %v3226_v13  ;;  %v3273_v13 = vld [vmem:[%s4200_s1 + $0x390] sm:$0xff]  }
  0x3d   :  { %2889 = vmatpush3.bf16.msra.mxu1 %v3225_v14  ;;  %v3276_v14 = vld [vmem:[%s4200_s1 + $0x3d8] sm:$0xff]  }
  0x3e   :  { %2890 = vmatprep.subr.bf16.mxu1 %v3228_v15  ;;  %v3275_v15 = vld [vmem:[%s4200_s1 + $0x318] sm:$0xff]  }
  0x3f   :  { %2869 = vmatpush3.bf16.msra.mxu0 %v3227_v16  ;;  %v3278_v16 = vld [vmem:[%s4200_s1 + $0x360] sm:$0xff]  }
  0x40   :  { %2898 = vmatprep.subr.bf16.mxu0 %v3230_v18  ;;  %v3280_v18 = vld [vmem:[%s4200_s1 + $0x3e0] sm:$0xff]  }
  0x41   :  { %2891 = vmatpush3.bf16.msra.mxu1 %v3229_v19  ;;  %v3279_v19 = vld [vmem:[%s4200_s1 + $0x320] sm:$0xff]  }
  0x42   :  { %1942 = vmatmul.mubr.bf16.vlgmr.msra.gmra.mrb[4].mxu0 %v473_v17  ;;  %2920 = vmatprep.subr.bf16.mxu1 %v3232_v20  ;;  %v3277_v17 = vld [vmem:[%s4200_s1 + $0x398] sm:$0xff]   ;;  %v3282_v20 = vld [vmem:[%s4200_s1 + $0x368] sm:$0xff]  }
  0x43   :  { %2899 = vmatpush3.bf16.msra.mxu0 %v3231_v21  ;;  %2021 = vmatprep.mubr.bf16.mxu0 %v529_v55  ;;  %v3281_v21 = vld [vmem:[%s4200_s1 + $0x3a0] sm:$0xff]   ;;  %v3315_v55 = vld [vmem:[%s4200_s1 + $0x468] sm:$0xff]  }
  0x44   :  { %1982 = vmatmul.mubr.bf16.vlgmr.msra.gmra.mrb[4].mxu1 %v489_v22  ;;  %2900 = vmatprep.subr.bf16.mxu0 %v3234_v23  ;;  %v3284_v22 = vld [vmem:[%s4200_s1 + $0x3e8] sm:$0xff]  }
  0x45   :  { %2921 = vmatpush3.bf16.msra.mxu1 %v3233_v24  ;;  %2061 = vmatprep.mubr.bf16.mxu1 %v539_v59  ;;  %v3283_v23 = vld [vmem:[%s4200_s1 + $0x328] sm:$0xff]   ;;  %v3286_v24 = vld [vmem:[%s4200_s1 + $0x370] sm:$0xff]  }
  0x46   :  { %2922 = vmatprep.subr.bf16.mxu1 %v3236_v25  ;;  %v3285_v25 = vld [vmem:[%s4200_s1 + $0x3a8] sm:$0xff]   ;;  %v3319_v59 = vld [vmem:[%s4200_s1 + $0x470] sm:$0xff]  }
  0x47   :  { %2901 = vmatpush3.bf16.msra.mxu0 %v3235_v26  ;;  %v3288_v26 = vld [vmem:[%s4200_s1 + $0x3f0] sm:$0xff]  }
  0x48   :  { %2902 = vmatprep.subr.bf16.mxu0 %v3238_v27  ;;  %v3287_v27 = vld [vmem:[%s4200_s1 + $0x330] sm:$0xff]  }
  0x49   :  { %2923 = vmatpush3.bf16.msra.mxu1 %v3237_v28  ;;  %v3290_v28 = vld [vmem:[%s4200_s1 + $0x378] sm:$0xff]  }
  0x4a   :  { %2924 = vmatprep.subr.bf16.mxu1 %v3240_v29  ;;  %v3289_v29 = vld [vmem:[%s4200_s1 + $0x3b0] sm:$0xff]  }
  0x4b   :  { %2903 = vmatpush3.bf16.msra.mxu0 %v3239_v30  ;;  %v3292_v30 = vld [vmem:[%s4200_s1 + $0x3f8] sm:$0xff]  }
  0x4c   :  { %2904 = vmatprep.subr.bf16.mxu0 %v3242_v31  ;;  %v3291_v31 = vld [vmem:[%s4200_s1 + $0x338] sm:$0xff]  }
  0x4d   :  { %2925 = vmatpush3.bf16.msra.mxu1 %v3241_v32  ;;  %v522_v32 = vrot.slane %v3746_v52, %v3557_v41  ;;  %v3310_v52 = vld [vmem:[%s4200_s1 + $0x498] sm:$0xff]  }
  0x4e   :  { %2926 = vmatprep.subr.bf16.mxu1 %v3244_v33  ;;  %v3295_v33 = vld [vmem:[%s4200_s1 + $0x440] sm:$0xff]  }
  0x4f   :  { %2905 = vmatpush3.bf16.msra.mxu0 %v3243_v34  ;;  %v3294_v34 = vld [vmem:[%s4200_s1 + $0x3b8] sm:$0xff]  }
  0x50   :  { %2906 = vmatprep.subr.bf16.mxu0 %v3246_v35  ;;  %v3297_v35 = vld [vmem:[%s4200_s1 + $0x4c0] sm:$0xff]  }
  0x51   :  { %2927 = vmatpush3.bf16.msra.mxu1 %v3245_v36  ;;  %v3296_v36 = vld [vmem:[%s4200_s1 + $0x400] sm:$0xff]  }
  0x52   :  { %2928 = vmatprep.subr.bf16.mxu1 %v3248_v37  ;;  %v538_v37 = vcombine.high %v522_v32, %v522_v32 }
  0x53   :  { %2907 = vmatpush3.bf16.msra.mxu0 %v3247_v38  ;;  %v3299_v38 = vld [vmem:[%s4200_s1 + $0x448] sm:$0xff]  }
  0x54   :  { %2908 = vmatprep.subr.bf16.mxu0 %v3250_v39  ;;  %v3298_v39 = vld [vmem:[%s4200_s1 + $0x480] sm:$0xff]  }
  0x55   :  { %2929 = vmatpush3.bf16.msra.mxu1 %v3249_v40  ;;  %v3301_v40 = vld [vmem:[%s4200_s1 + $0x4c8] sm:$0xff]  }
  0x56   :  { %2930 = vmatprep.subr.bf16.mxu1 %v3252_v42  ;;  %v3300_v42 = vld [vmem:[%s4200_s1 + $0x408] sm:$0xff]  }
  0x57   :  { %2909 = vmatpush3.bf16.msra.mxu0 %v3251_v43  ;;  %v3303_v43 = vld [vmem:[%s4200_s1 + $0x450] sm:$0xff]  }
  0x58   :  { %2910 = vmatprep.subr.bf16.mxu0 %v3254_v44  ;;  %v3302_v44 = vld [vmem:[%s4200_s1 + $0x488] sm:$0xff]  }
  0x59   :  { %2931 = vmatpush3.bf16.msra.mxu1 %v3253_v46  ;;  %v3304_v46 = vld [vmem:[%s4200_s1 + $0x410] sm:$0xff]  }
  0x5a   :  { %2932 = vmatprep.subr.bf16.mxu1 %v3256_v49  ;;  %v3309_v49 = vld [vmem:[%s4200_s1 + $0x4d8] sm:$0xff]  }
  0x5b   :  { %2911 = vmatpush3.bf16.msra.mxu0 %v3255_v50  ;;  %v3308_v50 = vld [vmem:[%s4200_s1 + $0x418] sm:$0xff]  }
  0x5c   :  { %2912 = vmatprep.subr.bf16.mxu0 %v3258_v53  ;;  %v3313_v53 = vld [vmem:[%s4200_s1 + $0x4e0] sm:$0xff]  }
  0x5d   :  { %2933 = vmatpush3.bf16.msra.mxu1 %v3257_v54  ;;  %v3312_v54 = vld [vmem:[%s4200_s1 + $0x420] sm:$0xff]  }
  0x5e   :  { %2934 = vmatprep.subr.bf16.mxu1 %v3260_v57  ;;  %v3317_v57 = vld [vmem:[%s4200_s1 + $0x4e8] sm:$0xff]  }
  0x5f   :  { %2913 = vmatpush3.bf16.msra.mxu0 %v3259_v58  ;;  %v3316_v58 = vld [vmem:[%s4200_s1 + $0x428] sm:$0xff]  }
  0x60   :  { %2942 = vmatprep.subr.bf16.mxu0 %v3262_v61  ;;  %v3318_v61 = vld [vmem:[%s4200_s1 + $0x4a8] sm:$0xff]  }
  0x61   :  { %2935 = vmatpush3.bf16.msra.mxu1 %v3261_v62 }
  0x62   :  { %2022 = vmatmul.mubr.bf16.vlgmr.msra.gmra.mrb[8].mxu0 %v515_v60  ;;  %2964 = vmatprep.subr.bf16.mxu1 %v3264_v0  ;;  %v30_v60 = vld [vmem:[%s4199_s0 + $0x10] sm:$0xff] }
  0x63   :  { %2943 = vmatpush3.bf16.msra.mxu0 %v3263_v1  ;;  %2101 = vmatprep.mubr.bf16.mxu0 %v536_v63  ;;  %v548_v62 = vrot.slane %v30_v60, %v3557_v41  ;;  %v541_v63 = vcombine.high %v30_v60, %v30_v60  ;;  %v3321_v0 = vld [vmem:[%s4200_s1 + $0x4f0] sm:$0xff]  }
  0x64   :  { %2062 = vmatmul.mubr.bf16.vlgmr.msra.gmra.mrb[8].mxu1 %v537_v2  ;;  %2944 = vmatprep.subr.bf16.mxu0 %v3266_v3  ;;  %v3320_v1 = vld [vmem:[%s4200_s1 + $0x430] sm:$0xff]  }
  0x65   :  { %2965 = vmatpush3.bf16.msra.mxu1 %v3265_v4  ;;  %2141 = vmatprep.mubr.bf16.mxu1 %v540_v5  ;;  %v556_v2 = vcombine.high %v548_v62, %v548_v62  ;;  %v3952_v3 = vrot.slane %v541_v63, %v3557_v41  ;;  %v3323_v4 = vld [vmem:[%s4200_s1 + $0x478] sm:$0xff]   ;;  %v3322_v5 = vld [vmem:[%s4200_s1 + $0x4b0] sm:$0xff]  }
  0x66   :  { %2966 = vmatprep.subr.bf16.mxu1 %v3268_v6 }
  0x67   :  { %2945 = vmatpush3.bf16.msra.mxu0 %v3267_v7  ;;  %v578_v6 = vrot.slane %v556_v2, %v3557_v41  ;;  %v557_v7 = vcombine.high %v3952_v3, %v3952_v3 }
  0x68   :  { %2946 = vmatprep.subr.bf16.mxu0 %v3270_v8  ;;  %v3325_v8 = vld [vmem:[%s4200_s1 + $0x4f8] sm:$0xff]  }
  0x69   :  { %2967 = vmatpush3.bf16.msra.mxu1 %v3269_v9  ;;  %v3324_v9 = vld [vmem:[%s4200_s1 + $0x438] sm:$0xff]  }
  0x6a   :  { %2968 = vmatprep.subr.bf16.mxu1 %v3272_v10  ;;  %v588_v10 = vcombine.high %v578_v6, %v578_v6 }
  0x6b   :  { %2947 = vmatpush3.bf16.msra.mxu0 %v3271_v11  ;;  %v564_v11 = vrot.slane %v548_v62, %v3557_v41 }
  0x6c   :  { %2948 = vmatprep.subr.bf16.mxu0 %v3274_v12  ;;  %v3327_v12 = vld [vmem:[%s4200_s1 + $0x540] sm:$0xff]  }
  0x6d   :  { %2969 = vmatpush3.bf16.msra.mxu1 %v3273_v13  ;;  %v3326_v13 = vld [vmem:[%s4200_s1 + $0x4b8] sm:$0xff]  }
  0x6e   :  { %2970 = vmatprep.subr.bf16.mxu1 %v3276_v14  ;;  %v585_v14 = vrot.slane %v557_v7, %v3557_v41 }
  0x6f   :  { %2949 = vmatpush3.bf16.msra.mxu0 %v3275_v15  ;;  %v3329_v15 = vld [vmem:[%s4200_s1 + $0x5c0] sm:$0xff]  }
  0x70   :  { %2950 = vmatprep.subr.bf16.mxu0 %v3278_v16  ;;  %v3328_v16 = vld [vmem:[%s4200_s1 + $0x500] sm:$0xff]  }
  0x71   :  { %2971 = vmatpush3.bf16.msra.mxu1 %v3277_v17  ;;  %v586_v17 = vcombine.high %v564_v11, %v564_v11 }
  0x72   :  { %2972 = vmatprep.subr.bf16.mxu1 %v3280_v18  ;;  %v3331_v18 = vld [vmem:[%s4200_s1 + $0x548] sm:$0xff]  }
  0x73   :  { %2951 = vmatpush3.bf16.msra.mxu0 %v3279_v19  ;;  %v3330_v19 = vld [vmem:[%s4200_s1 + $0x580] sm:$0xff]  }
  0x74   :  { %2952 = vmatprep.subr.bf16.mxu0 %v3282_v20  ;;  %v589_v20 = vcombine.high %v585_v14, %v585_v14 }
  0x75   :  { %2973 = vmatpush3.bf16.msra.mxu1 %v3281_v21  ;;  %v3333_v21 = vld [vmem:[%s4200_s1 + $0x5c8] sm:$0xff]  }
  0x76   :  { %2974 = vmatprep.subr.bf16.mxu1 %v3284_v22  ;;  %v3332_v22 = vld [vmem:[%s4200_s1 + $0x508] sm:$0xff]  }
  0x77   :  { %2953 = vmatpush3.bf16.msra.mxu0 %v3283_v23  ;;  %v3335_v23 = vld [vmem:[%s4200_s1 + $0x550] sm:$0xff]  }
  0x78   :  { %2954 = vmatprep.subr.bf16.mxu0 %v3286_v24  ;;  %v3334_v24 = vld [vmem:[%s4200_s1 + $0x588] sm:$0xff]  }
  0x79   :  { %2975 = vmatpush3.bf16.msra.mxu1 %v3285_v25  ;;  %v3337_v25 = vld [vmem:[%s4200_s1 + $0x5d0] sm:$0xff]  }
  0x7a   :  { %2976 = vmatprep.subr.bf16.mxu1 %v3288_v26  ;;  %v3336_v26 = vld [vmem:[%s4200_s1 + $0x510] sm:$0xff]  }
  0x7b   :  { %2955 = vmatpush3.bf16.msra.mxu0 %v3287_v27  ;;  %v3339_v27 = vld [vmem:[%s4200_s1 + $0x558] sm:$0xff]  }
  0x7c   :  { %2956 = vmatprep.subr.bf16.mxu0 %v3290_v28  ;;  %v3338_v28 = vld [vmem:[%s4200_s1 + $0x590] sm:$0xff]  }
  0x7d   :  { %2977 = vmatpush3.bf16.msra.mxu1 %v3289_v29  ;;  %v3341_v29 = vld [vmem:[%s4200_s1 + $0x5d8] sm:$0xff]  }
  0x7e   :  { %2978 = vmatprep.subr.bf16.mxu1 %v3292_v30  ;;  %v3340_v30 = vld [vmem:[%s4200_s1 + $0x518] sm:$0xff]  }
  0x7f   :  { %2957 = vmatpush3.bf16.msra.mxu0 %v3291_v31  ;;  %v3343_v31 = vld [vmem:[%s4200_s1 + $0x560] sm:$0xff]  }
  0x80   :  { %2986 = vmatprep.subr.bf16.mxu0 %v3295_v33  ;;  %v3345_v33 = vld [vmem:[%s4200_s1 + $0x5e0] sm:$0xff]  }
  0x81   :  { %2979 = vmatpush3.bf16.msra.mxu1 %v3294_v34  ;;  %v3344_v34 = vld [vmem:[%s4200_s1 + $0x520] sm:$0xff]  }
  0x82   :  { %2102 = vmatmul.mubr.bf16.vlgmr.msra.gmra.mrb[12].mxu0 %v522_v32  ;;  %3008 = vmatprep.subr.bf16.mxu1 %v3297_v35  ;;  %v3342_v32 = vld [vmem:[%s4200_s1 + $0x598] sm:$0xff]   ;;  %v3347_v35 = vld [vmem:[%s4200_s1 + $0x568] sm:$0xff]  }
  0x83   :  { %2987 = vmatpush3.bf16.msra.mxu0 %v3296_v36  ;;  %2181 = vmatprep.mubr.bf16.mxu0 %v578_v6  ;;  %v3346_v36 = vld [vmem:[%s4200_s1 + $0x5a0] sm:$0xff]  }
  0x84   :  { %2142 = vmatmul.mubr.bf16.vlgmr.msra.gmra.mrb[12].mxu1 %v538_v37  ;;  %2988 = vmatprep.subr.bf16.mxu0 %v3299_v38  ;;  %v3349_v37 = vld [vmem:[%s4200_s1 + $0x5e8] sm:$0xff]  }
  0x85   :  { %3009 = vmatpush3.bf16.msra.mxu1 %v3298_v39  ;;  %2221 = vmatprep.mubr.bf16.mxu1 %v588_v10  ;;  %v3348_v38 = vld [vmem:[%s4200_s1 + $0x528] sm:$0xff]   ;;  %v3351_v39 = vld [vmem:[%s4200_s1 + $0x570] sm:$0xff]  }
  0x86   :  { %3010 = vmatprep.subr.bf16.mxu1 %v3301_v40  ;;  %v3350_v40 = vld [vmem:[%s4200_s1 + $0x5a8] sm:$0xff]  }
  0x87   :  { %2989 = vmatpush3.bf16.msra.mxu0 %v3300_v42  ;;  %v3353_v42 = vld [vmem:[%s4200_s1 + $0x5f0] sm:$0xff]  }
  0x88   :  { %2990 = vmatprep.subr.bf16.mxu0 %v3303_v43  ;;  %v3352_v43 = vld [vmem:[%s4200_s1 + $0x530] sm:$0xff]  }
  0x89   :  { %3011 = vmatpush3.bf16.msra.mxu1 %v3302_v44  ;;  %v3355_v44 = vld [vmem:[%s4200_s1 + $0x578] sm:$0xff]  }
  0x8a   :  { %3012 = vmatprep.subr.bf16.mxu1 %v3305_v45  ;;  %v3354_v45 = vld [vmem:[%s4200_s1 + $0x5b0] sm:$0xff]  }
  0x8b   :  { %2991 = vmatpush3.bf16.msra.mxu0 %v3304_v46  ;;  %v3357_v46 = vld [vmem:[%s4200_s1 + $0x5f8] sm:$0xff]  }
  0x8c   :  { %2992 = vmatprep.subr.bf16.mxu0 %v3307_v47  ;;  %v3356_v47 = vld [vmem:[%s4200_s1 + $0x538] sm:$0xff]  }
  0x8d   :  { %3013 = vmatpush3.bf16.msra.mxu1 %v3306_v48  ;;  %v571_v48 = vrot.slane %v3952_v3, %v3557_v41 }
  0x8e   :  { %3014 = vmatprep.subr.bf16.mxu1 %v3309_v49  ;;  %v3359_v49 = vld [vmem:[%s4200_s1 + $0x5b8] sm:$0xff]  }
  0x8f   :  { %2993 = vmatpush3.bf16.msra.mxu0 %v3308_v50  ;;  %v3360_v50 = vld [vmem:[%s4200_s1 + $0x600] sm:$0xff]  }
  0x90   :  { %2994 = vmatprep.subr.bf16.mxu0 %v3311_v51  ;;  %v3409_v51 = vmov 0.0  }
  0x91   :  { %3015 = vmatpush3.bf16.msra.mxu1 %v3310_v52  ;;  %v587_v52 = vcombine.high %v571_v48, %v571_v48 }
  0x92   :  { %3016 = vmatprep.subr.bf16.mxu1 %v3313_v53  ;;  %v3361_v53 = vld [vmem:[%s4200_s1 + $0x608] sm:$0xff]  }
  0x93   :  { %2995 = vmatpush3.bf16.msra.mxu0 %v3312_v54  ;;  %v3362_v54 = vld [vmem:[%s4200_s1 + $0x610] sm:$0xff]  }
  0x94   :  { %2996 = vmatprep.subr.bf16.mxu0 %v3315_v55 }
  0x95   :  { %3017 = vmatpush3.bf16.msra.mxu1 %v3314_v56 }
  0x96   :  { %3018 = vmatprep.subr.bf16.mxu1 %v3317_v57 }
  0x97   :  { %2997 = vmatpush3.bf16.msra.mxu0 %v3316_v58 }
  0x98   :  { %2998 = vmatprep.subr.bf16.mxu0 %v3319_v59 }
  0x99   :  { %3019 = vmatpush3.bf16.msra.mxu1 %v3318_v61 }
  0x9a   :  { %3020 = vmatprep.subr.bf16.mxu1 %v3321_v0 }
  0x9b   :  { %2999 = vmatpush3.bf16.msra.mxu0 %v3320_v1 }
  0x9c   :  { %3000 = vmatprep.subr.bf16.mxu0 %v3323_v4 }
  0x9d   :  { %3021 = vmatpush3.bf16.msra.mxu1 %v3322_v5 }
  0x9e   :  { %3022 = vmatprep.subr.bf16.mxu1 %v3325_v8 }
  0x9f   :  { %3001 = vmatpush3.bf16.msra.mxu0 %v3324_v9 }
  0xa0   :  { %3030 = vmatprep.subr.bf16.mxu0 %v3327_v12 }
  0xa1   :  { %3023 = vmatpush3.bf16.msra.mxu1 %v3326_v13 }
  0xa2   :  { %2182 = vmatmul.mubr.bf16.vlgmr.msra.gmra.mrb[16].mxu0 %v564_v11  ;;  %3052 = vmatprep.subr.bf16.mxu1 %v3329_v15 }
  0xa3   :  { %3031 = vmatpush3.bf16.msra.mxu0 %v3328_v16  ;;  %2261 = vmatprep.mubr.bf16.mxu0 %v585_v14 }
  0xa4   :  { %2222 = vmatmul.mubr.bf16.vlgmr.msra.gmra.mrb[16].mxu1 %v586_v17  ;;  %3032 = vmatprep.subr.bf16.mxu0 %v3331_v18 }
  0xa5   :  { %3053 = vmatpush3.bf16.msra.mxu1 %v3330_v19  ;;  %2301 = vmatprep.mubr.bf16.mxu1 %v589_v20 }
  0xa6   :  { %3054 = vmatprep.subr.bf16.mxu1 %v3333_v21 }
  0xa7   :  { %3033 = vmatpush3.bf16.msra.mxu0 %v3332_v22 }
  0xa8   :  { %3034 = vmatprep.subr.bf16.mxu0 %v3335_v23 }
  0xa9   :  { %3055 = vmatpush3.bf16.msra.mxu1 %v3334_v24 }
  0xaa   :  { %3056 = vmatprep.subr.bf16.mxu1 %v3337_v25 }
  0xab   :  { %3035 = vmatpush3.bf16.msra.mxu0 %v3336_v26 }
  0xac   :  { %3036 = vmatprep.subr.bf16.mxu0 %v3339_v27 }
  0xad   :  { %3057 = vmatpush3.bf16.msra.mxu1 %v3338_v28 }
  0xae   :  { %3058 = vmatprep.subr.bf16.mxu1 %v3341_v29 }
  0xaf   :  { %3037 = vmatpush3.bf16.msra.mxu0 %v3340_v30 }
  0xb0   :  { %3038 = vmatprep.subr.bf16.mxu0 %v3343_v31 }
  0xb1   :  { %3059 = vmatpush3.bf16.msra.mxu1 %v3342_v32 }
  0xb2   :  { %3060 = vmatprep.subr.bf16.mxu1 %v3345_v33 }
  0xb3   :  { %3039 = vmatpush3.bf16.msra.mxu0 %v3344_v34 }
  0xb4   :  { %3040 = vmatprep.subr.bf16.mxu0 %v3347_v35 }
  0xb5   :  { %3061 = vmatpush3.bf16.msra.mxu1 %v3346_v36 }
  0xb6   :  { %3062 = vmatprep.subr.bf16.mxu1 %v3349_v37 }
  0xb7   :  { %3041 = vmatpush3.bf16.msra.mxu0 %v3348_v38 }
  0xb8   :  { %3042 = vmatprep.subr.bf16.mxu0 %v3351_v39 }
  0xb9   :  { %3063 = vmatpush3.bf16.msra.mxu1 %v3350_v40 }
  0xba   :  { %3064 = vmatprep.subr.bf16.mxu1 %v3353_v42 }
  0xbb   :  { %3043 = vmatpush3.bf16.msra.mxu0 %v3352_v43 }
  0xbc   :  { %3044 = vmatprep.subr.bf16.mxu0 %v3355_v44 }
  0xbd   :  { %3065 = vmatpush3.bf16.msra.mxu1 %v3354_v45 }
  0xbe   :  { %3066 = vmatprep.subr.bf16.mxu1 %v3357_v46 }
  0xbf   :  { %3045 = vmatpush3.bf16.msra.mxu0 %v3356_v47 }
  0xc0   :  { %3101 = vmatprep.subr.bf16.mxu0 %v3409_v51 }
  0xc1   :  { %3067 = vmatpush3.bf16.msra.mxu1 %v3359_v49 }
  0xc2   :  { %2262 = vmatmul.mubr.bf16.vlgmr.msra.gmra.mrb[20].mxu0 %v571_v48  ;;  %3121 = vmatprep.subr.bf16.mxu1 %v3409_v51 }
  0xc3   :  { %3102 = vmatpush3.bf16.msra.mxu0 %v3360_v50  ;;  %3117 = vmatprep.mubr.msk.bf16.mxu0 %vm3410_vm0, %v3409_v51 }
  0xc4   :  { %2302 = vmatmul.mubr.bf16.vlgmr.msra.gmra.mrb[20].mxu1 %v587_v52  ;;  %3103 = vmatprep.subr.bf16.mxu0 %v3409_v51 }
  0xc5   :  { %3137 = vmatprep.mubr.msk.bf16.mxu1 %vm3410_vm0, %v3409_v51 }
  0xc7   :  { %3104 = vmatpush3.bf16.msra.mxu0 %v3361_v53 }
  0xc8   :  { %3105 = vmatprep.subr.bf16.mxu0 %v3409_v51 }
  0xc9   :  { %12 = vsyncpa [#allocation3], 0  ;;  %v3363_v55 = vld [vmem:[%s4200_s1 + $0x618] sm:$0xff]   ;;  %v3364_v56 = vld [vmem:[%s4200_s1 + $0x620] sm:$0xff]   ;;  %s3411_s26 = smov [#allocation2]  }
  0xca   :  { %v3365_v57 = vld [vmem:[%s4200_s1 + $0x628] sm:$0xff]   ;;  %v3366_v58 = vld [vmem:[%s4200_s1 + $0x630] sm:$0xff]   ;;  %v3367_v59 = vld [vmem:[%s4200_s1 + $0x638] sm:$0xff]   ;;  %s2582_s27 = sshll.u32 %s3411_s26, 4  ;;  %s2583_s27 = int_to_ptr.vmem [resolvable:$true] %s2582_s27 }
  0xcb   :  { %3106 = vmatpush3.bf16.msra.mxu0 %v3362_v54  ;;  %v2591_v60 = vld.sshfl [vmem:[%s4199_s0 + $0x18] sm:$0x1 pattern:$0x75316420]  ;;  %v2590_v63 = vld [vmem:[%s4201_s2] ss:$0 sm:$0xff]  ;;  %p3389_p1 = scmp.lt.s32.totalorder %s2583_s27, %s2583_s27 }
  0xcc   :  { %3107 = vmatprep.subr.bf16.mxu0 %v3409_v51  ;;  %v603_v61 = vrot.slane %v2591_v60, %v3557_v41  ;;  %v3368_v20 = vld [vmem:[%s4202_s3] sm:$0xff]   ;;  %v3369_v23 = vld [vmem:[%s4202_s3 + $0x8] sm:$0xff]   ;;  %v3370_v24 = vld [vmem:[%s4202_s3 + $0x10] sm:$0xff]  }
  0xcd   :  { %3122 = vmatpush3.bf16.msra.mxu1 %v3368_v20  ;;  %v3371_v25 = vld [vmem:[%s4202_s3 + $0x18] sm:$0xff]   ;;  %v3372_v26 = vld [vmem:[%s4202_s3 + $0x20] sm:$0xff]   ;;  %v3373_v27 = vld [vmem:[%s4202_s3 + $0x28] sm:$0xff]  }
  0xce   :  { %3123 = vmatprep.subr.bf16.mxu1 %v3409_v51  ;;  %v3374_v28 = vld [vmem:[%s4202_s3 + $0x30] sm:$0xff]   ;;  %v3375_v34 = vld [vmem:[%s4202_s3 + $0x38] sm:$0xff]   ;;  %v3376_v43 = vld [vmem:[%s4204_s5] sm:$0xff]  }
  0xcf   :  { %3108 = vmatpush3.bf16.msra.mxu0 %v3363_v55  ;;  %v3377_v44 = vld [vmem:[%s4204_s5 + $0x8] sm:$0xff]   ;;  %v3378_v45 = vld [vmem:[%s4204_s5 + $0x10] sm:$0xff]   ;;  %v3379_v46 = vld [vmem:[%s4204_s5 + $0x18] sm:$0xff]  }
  0xd0   :  { %3109 = vmatprep.subr.bf16.mxu0 %v3409_v51  ;;  %v3380_v47 = vld [vmem:[%s4204_s5 + $0x20] sm:$0xff]   ;;  %v3381_v48 = vld [vmem:[%s4204_s5 + $0x28] sm:$0xff]  }
  0xd1   :  { %3124 = vmatpush3.bf16.msra.mxu1 %v3369_v23 }
  0xd2   :  { %3125 = vmatprep.subr.bf16.mxu1 %v3409_v51 }
  0xd3   :  { %3110 = vmatpush3.bf16.msra.mxu0 %v3364_v56 }
  0xd4   :  { %3111 = vmatprep.subr.bf16.mxu0 %v3409_v51 }
  0xd5   :  { %3126 = vmatpush3.bf16.msra.mxu1 %v3370_v24 }
  0xd6   :  { %3127 = vmatprep.subr.bf16.mxu1 %v3409_v51 }
  0xd7   :  { %3112 = vmatpush3.bf16.msra.mxu0 %v3365_v57 }
  0xd8   :  { %3113 = vmatprep.subr.bf16.mxu0 %v3409_v51 }
  0xd9   :  { %3128 = vmatpush3.bf16.msra.mxu1 %v3371_v25 }
  0xda   :  { %3129 = vmatprep.subr.bf16.mxu1 %v3409_v51 }
  0xdb   :  { %3114 = vmatpush3.bf16.msra.mxu0 %v3366_v58 }
  0xdc   :  { %3115 = vmatprep.subr.bf16.mxu0 %v3409_v51 }
  0xdd   :  { %3130 = vmatpush3.bf16.msra.mxu1 %v3372_v26 }
  0xde   :  { %3131 = vmatprep.subr.bf16.mxu1 %v3409_v51 }
  0xdf   :  { %3116 = vmatpush3.bf16.msra.mxu0 %v3367_v59 }
  0xe0   :  { %3141 = vmatprep.subr.bf16.mxu0 %v3409_v51 }
  0xe1   :  { %3132 = vmatpush3.bf16.msra.mxu1 %v3373_v27 }
  0xe2   :  { %3118 = vmatmul.mubr.bf16.vlgmr.msra.gmra.mrb[24].mxu0 %v603_v61  ;;  %3133 = vmatprep.subr.bf16.mxu1 %v3409_v51 }
  0xe3   :  { %3157 = vmatprep.mubr.msk.bf16.mxu0 %vm3410_vm0, %v3409_v51  ;;  %3142 = vmatpush3.bf16.msra.mxu0 %v3376_v43 }
  0xe4   :  { %3143 = vmatprep.subr.bf16.mxu0 %v3409_v51 }
  0xe5   :  { %3134 = vmatpush3.bf16.msra.mxu1 %v3374_v28  ;;  %v3382_v28 = vld [vmem:[%s4204_s5 + $0x30] sm:$0xff]  }
  0xe6   :  { %3135 = vmatprep.subr.bf16.mxu1 %v3409_v51 }
  0xe7   :  { %3144 = vmatpush3.bf16.msra.mxu0 %v3377_v44 }
  0xe8   :  { %3145 = vmatprep.subr.bf16.mxu0 %v3409_v51 }
  0xe9   :  { %3136 = vmatpush3.bf16.msra.mxu1 %v3375_v34 }
  0xeb   :  { %3146 = vmatpush3.bf16.msra.mxu0 %v3378_v45 }
  0xec   :  { %3147 = vmatprep.subr.bf16.mxu0 %v3409_v51 }
  0xef   :  { %3148 = vmatpush3.bf16.msra.mxu0 %v3379_v46 }
  0xf0   :  { %3149 = vmatprep.subr.bf16.mxu0 %v3409_v51 }
  0xf3   :  { %3150 = vmatpush3.bf16.msra.mxu0 %v3380_v47 }
  0xf4   :  { %3151 = vmatprep.subr.bf16.mxu0 %v3409_v51 }
  0xf5   :  { %v2826_v62 = vpop.f32.mrb[0].mxu0 }
  0xf6   :  { %v2827_v0 = vpop.f32.mrb[1].mxu0 }
  0xf7   :  { %v2828_v1 = vadd.f32 %v2827_v0, %v2826_v62  ;;  %v2829_v2 = vpop.f32.mrb[2].mxu0  ;;  %v2848_v3 = vpop.f32.mrb[0].mxu1  ;;  %3152 = vmatpush3.bf16.msra.mxu0 %v3381_v48 }
  0xf8   :  { %v2830_v4 = vpop.f32.mrb[3].mxu0  ;;  %v2849_v5 = vpop.f32.mrb[1].mxu1  ;;  %3153 = vmatprep.subr.bf16.mxu0 %v3409_v51 }
  0xf9   :  { %v1864_v6 = vadd.f32 %v2828_v1, %v2590_v63  ;;  %v2850_v41 = vadd.f32 %v2849_v5, %v2848_v3  ;;  %v2851_v7 = vpop.f32.mrb[2].mxu1 }
  0xfa   :  { %v2852_v8 = vpop.f32.mrb[3].mxu1 }
  0xfb   :  { %v1904_v9 = vadd.f32 %v2850_v41, %v1864_v6  ;;  %3154 = vmatpush3.bf16.msra.mxu0 %v3382_v28 }
  0xfc   :  { %3155 = vmatprep.subr.bf16.mxu0 %v3409_v51  ;;  %v2801_v51 = vld [vmem:[%s4205_s6] ss:$0 sm:$0xff] }
 0x115   :  { %v2870_v10 = vpop.f32.mrb[4].mxu0 }
 0x116   :  { %v2871_v11 = vpop.f32.mrb[5].mxu0 }
 0x117   :  { %v2872_v12 = vadd.f32 %v2871_v11, %v2870_v10  ;;  %v2873_v13 = vpop.f32.mrb[6].mxu0  ;;  %v2892_v14 = vpop.f32.mrb[4].mxu1 }
 0x118   :  { %v2874_v15 = vpop.f32.mrb[7].mxu0  ;;  %v2893_v16 = vpop.f32.mrb[5].mxu1 }
 0x119   :  { %v1944_v17 = vadd.f32 %v2872_v12, %v1904_v9  ;;  %v2894_v18 = vadd.f32 %v2893_v16, %v2892_v14  ;;  %v2895_v19 = vpop.f32.mrb[6].mxu1 }
 0x11a   :  { %v2896_v21 = vpop.f32.mrb[7].mxu1 }
 0x11b   :  { %v1984_v22 = vadd.f32 %v2894_v18, %v1944_v17 }
 0x135   :  { %v2914_v29 = vpop.f32.mrb[8].mxu0 }
 0x136   :  { %v2915_v30 = vpop.f32.mrb[9].mxu0 }
 0x137   :  { %v2916_v31 = vadd.f32 %v2915_v30, %v2914_v29  ;;  %v2917_v32 = vpop.f32.mrb[10].mxu0  ;;  %v2936_v33 = vpop.f32.mrb[8].mxu1  ;;  %v3383_v29 = vld [vmem:[%s4204_s5 + $0x38] sm:$0xff]   ;;  %v2792_v30 = vld [vmem:[%s4203_s4] ss:$0 sm:$0xff]  ;;  %s3384_s4 = scalar_lea.vmem %s2583_s27, 32 }
 0x138   :  { %v2918_v35 = vpop.f32.mrb[11].mxu0  ;;  %v2937_v36 = vpop.f32.mrb[9].mxu1  ;;  %3156 = vmatpush3.bf16.msra.mxu0 %v3383_v29  ;;  %p3385_p0 = scmp.ne.s32.totalorder %s2583_s27, %s3384_s4  ;;  %p3390_p2 = scmp.lt.s32.totalorder %s3384_s4, %s3384_s4 }
 0x139   :  { %v2024_v37 = vadd.f32 %v2916_v31, %v1984_v22  ;;  %v2938_v38 = vadd.f32 %v2937_v36, %v2936_v33  ;;  %v2939_v39 = vpop.f32.mrb[10].mxu1 }
 0x13a   :  { %v2940_v40 = vpop.f32.mrb[11].mxu1  ;;  %p3391_p3 = por %p3390_p2, %p3389_p1 }
 0x13b   :  { %v2064_v42 = vadd.f32 %v2938_v38, %v2024_v37 }
 0x13c   :  { %p3392_p4 = pnand %p3391_p3, %p3385_p0 }
 0x155   :  { %v2958_v49 = vpop.f32.mrb[12].mxu0 }
 0x156   :  { %v2959_v50 = vpop.f32.mrb[13].mxu0 }
 0x157   :  { %v2960_v52 = vadd.f32 %v2959_v50, %v2958_v49  ;;  %v2961_v53 = vpop.f32.mrb[14].mxu0  ;;  %v2980_v54 = vpop.f32.mrb[12].mxu1 }
 0x158   :  { %v2962_v55 = vpop.f32.mrb[15].mxu0  ;;  %v2981_v56 = vpop.f32.mrb[13].mxu1 }
 0x159   :  { %v2104_v57 = vadd.f32 %v2960_v52, %v2064_v42  ;;  %v2982_v58 = vadd.f32 %v2981_v56, %v2980_v54  ;;  %v2983_v59 = vpop.f32.mrb[14].mxu1 }
 0x15a   :  { %v2984_v60 = vpop.f32.mrb[15].mxu1 }
 0x15b   :  { %v2144_v61 = vadd.f32 %v2982_v58, %v2104_v57 }
 0x175   :  { %v3002_v62 = vpop.f32.mrb[16].mxu0 }
 0x176   :  { %v3003_v63 = vpop.f32.mrb[17].mxu0 }
 0x177   :  { %v3004_v0 = vadd.f32 %v3003_v63, %v3002_v62  ;;  %v3005_v1 = vpop.f32.mrb[18].mxu0  ;;  %v3024_v2 = vpop.f32.mrb[16].mxu1 }
 0x178   :  { %v3006_v3 = vpop.f32.mrb[19].mxu0  ;;  %v3025_v4 = vpop.f32.mrb[17].mxu1 }
 0x179   :  { %v2184_v5 = vadd.f32 %v3004_v0, %v2144_v61  ;;  %v3026_v6 = vadd.f32 %v3025_v4, %v3024_v2  ;;  %v3027_v41 = vpop.f32.mrb[18].mxu1 }
 0x17a   :  { %v3028_v7 = vpop.f32.mrb[19].mxu1 }
 0x17b   :  { %v2224_v8 = vadd.f32 %v3026_v6, %v2184_v5 }
 0x195   :  { %v3046_v9 = vpop.f32.mrb[20].mxu0 }
 0x196   :  { %v3047_v10 = vpop.f32.mrb[21].mxu0 }
 0x197   :  { %v3048_v11 = vadd.f32 %v3047_v10, %v3046_v9  ;;  %v3049_v12 = vpop.f32.mrb[22].mxu0  ;;  %v3068_v13 = vpop.f32.mrb[20].mxu1 }
 0x198   :  { %v3050_v14 = vpop.f32.mrb[23].mxu0  ;;  %v3069_v15 = vpop.f32.mrb[21].mxu1 }
 0x199   :  { %v2264_v16 = vadd.f32 %v3048_v11, %v2224_v8  ;;  %v3070_v17 = vadd.f32 %v3069_v15, %v3068_v13  ;;  %v3071_v18 = vpop.f32.mrb[22].mxu1 }
 0x19a   :  { %v3072_v19 = vpop.f32.mrb[23].mxu1 }
 0x19b   :  { %v2304_v20 = vadd.f32 %v3070_v17, %v2264_v16 }
 0x1b5   :  { %v2343_v21 = vpop.f32.mrb[24].mxu0 }
 0x1b6   :  { %v2344_v22 = vadd.f32 %v2343_v21, %v2304_v20  ;;  %v3119_v23 = vpop.f32.mrb[25].mxu0 }
 0x1b7   :  { %v2346_v24 = vpop.f32.mrb[26].mxu0 }
 0x1b8   :  { %v2349_v25 = vmax.f32 %v2344_v22, 0.0  ;;  %v3120_v26 = vpop.f32.mrb[27].mxu0 }
 0x1ba   :  { %v2350_v27 = vpack.c.bf16 %v2349_v25, %v2349_v25 }
 0x1bc   :  { %3138 = vmatmul.mubr.bf16.vlgmr.msra.gmra.mrb[24].mxu1 %v2350_v27 }
 0x28f   :  { %v2456_v31 = vpop.f32.mrb[24].mxu1 }
 0x290   :  { %v2457_v32 = vadd.f32 %v2792_v30, %v2456_v31  ;;  %v3139_v33 = vpop.f32.mrb[25].mxu1 }
 0x291   :  { %v2459_v34 = vpop.f32.mrb[26].mxu1 }
 0x292   :  { %v2462_v35 = vmax.f32 %v2457_v32, 0.0  ;;  %v3140_v36 = vpop.f32.mrb[27].mxu1 }
 0x294   :  { %v2463_v37 = vpack.c.bf16 %v2462_v35, %v2462_v35 }
 0x296   :  { %3158 = vmatmul.mubr.bf16.vlgmr.msra.gmra.mrb[28].mxu0 %v2463_v37 }
 0x369   :  { %v2569_v38 = vpop.f32.mrb[28].mxu0 }
 0x36a   :  { %v2570_v39 = vadd.f32 %v2801_v51, %v2569_v38  ;;  %v3159_v40 = vpop.f32.mrb[29].mxu0 }
 0x36b   :  { %v2572_v42 = vpop.f32.mrb[30].mxu0 }
 0x36c   :  { %2575 = vst [vmem:[#allocation2] sm:$0x3] %v2570_v39  ;;  %v3160_v43 = vpop.f32.mrb[31].mxu0 }
 0x36d   :  { %3395 = shalt.err (!%p3392_p4)
}
 0x36e   :  { %s3396_s6 = scalar_lea.hbm %s4206_s7, 32 }
 0x36f   :  { %p3397_p5 = scmp.ne.s32.totalorder %s4206_s7, %s3396_s6  ;;  %p3400_p6 = scmp.lt.u32.totalorder %s3396_s6, %s4206_s7 }
 0x371   :  { %p3402_p7 = pnand %p3400_p6, %p3397_p5 }
 0x373   :  { %3405 = shalt.err (!%p3402_p7)
}
 0x374   :  { %2585 = dma.vmem_to_hbm [thread:$0]  %s2583_s27, 32, %s4206_s7, [#allocation3]  }
 0x375   :  { %3406 = dma.done.wait [#allocation3], 32  }
 0x376   :  { %3407 = vsyncadd [#allocation3], 4294967264 }
 0x377   :  { %2589 = vsyncpa [#allocation3], 1 }

</bundles_post_ra>
